<compile_context>
chip_gen: v7x
topology: tpu7x:2x2x1
jax: 0.10.0
libtpu: 0.0.40
codegen_flags: <defaults>
</compile_context>

<pallas_src>
import jax
import jax.numpy as jnp
from jax.experimental import pallas as pl
from jax.experimental.pallas import tpu as pltpu


def _round_up(n, m):
    return (n + m - 1) // m * m


# ---------------------------------------------------------------------------
# Kernel: the whole 3-layer MLP for one batch tile, weights VMEM-resident.
# ---------------------------------------------------------------------------
def decoder_kernel(x_ref, w1_ref, b1_ref, w2_ref, b2_ref, w3_ref, b3_ref, o_ref):
    # Layer 1: Linear -> Dropout (eval = identity) -> ReLU   (f32)
    h1 = jnp.dot(x_ref[...], w1_ref[...], preferred_element_type=jnp.float32)
    h1 = jnp.maximum(h1 + b1_ref[...], 0.0)

    # Layer 2: Linear (bf16 weights, f32 accumulate) -> Dropout -> ReLU
    h2 = jnp.dot(h1.astype(w2_ref.dtype), w2_ref[...],
                 preferred_element_type=jnp.float32)
    h2 = jnp.maximum(h2 + b2_ref[...], 0.0)

    # Layer 3: Linear -> Sigmoid
    logits = jnp.dot(h2.astype(w3_ref.dtype), w3_ref[...],
                     preferred_element_type=jnp.float32)
    o_ref[...] = jax.nn.sigmoid(logits + b3_ref[...]).astype(o_ref.dtype)


# ---------------------------------------------------------------------------
# One-time parameter preparation (transpose + pad + bf16)
# ---------------------------------------------------------------------------
def prepare_params(params, *, weight_dtype=jnp.bfloat16):
    """Convert torch-layout f32 params to TPU-friendly layout, ONCE.

    - transpose to (in, out) so the kernel computes y = x @ W (no per-call .T)
    - pad hidden -> multiple of 128, out_nodes -> multiple of 128 (dense MXU
      tiles, unmasked lane stores); zero padding is mathematically inert here
    - cast the big weights (w2, w3) to bf16; w1 (8 x hidden) stays f32
      (negligible bytes)
    """
    w1, b1 = params["w1"], params["b1"]
    w2, b2 = params["w2"], params["b2"]
    w3, b3 = params["w3"], params["b3"]
    latent, hidden, out_nodes = w1.shape[1], w1.shape[0], w3.shape[0]
    Hp = _round_up(hidden, 128)
    Np = _round_up(out_nodes, 128)

    def pad2(a, r, c):
        return jnp.pad(a, ((0, r - a.shape[0]), (0, c - a.shape[1])))

    return {
        "w1": pad2(w1.T, latent, Hp).astype(jnp.float32),     # (latent, Hp)
        "w2": pad2(w2.T, Hp, Hp).astype(weight_dtype),        # (Hp, Hp)
        "w3": pad2(w3.T, Hp, Np).astype(weight_dtype),        # (Hp, Np)
        "b1": jnp.pad(b1, (0, Hp - hidden))[None, :].astype(jnp.float32),
        "b2": jnp.pad(b2, (0, Hp - hidden))[None, :].astype(jnp.float32),
        "b3": jnp.pad(b3, (0, Np - out_nodes))[None, :].astype(jnp.float32),
    }


# ---------------------------------------------------------------------------
# Forward wrapper
# ---------------------------------------------------------------------------
def decoder_forward(x, prep, out_nodes, *, tb_max=256, out_dtype=jnp.float32):
    """x: (B, latent) f32.  prep: output of prepare_params().  Returns (B, out_nodes)."""
    B, latent = x.shape
    Hp = prep["w2"].shape[0]
    Np = prep["w3"].shape[1]

    # Batch tiling: tb multiple of 8; weights (constant index_maps) are DMA'd
    # once and stay VMEM-resident across batch tiles.
    tb = min(tb_max, _round_up(B, 8))
    B_pad = _round_up(B, tb)
    if B_pad != B:
        x = jnp.pad(x, ((0, B_pad - B), (0, 0)))
    x = x.astype(jnp.float32)
    nb = B_pad // tb

    out = pl.pallas_call(
        decoder_kernel,
        out_shape=jax.ShapeDtypeStruct((B_pad, Np), out_dtype),
        grid_spec=pltpu.PrefetchScalarGridSpec(
            num_scalar_prefetch=0,
            grid=(nb,),
            in_specs=[
                pl.BlockSpec((tb, latent), lambda i: (i, 0)),   # x batch tile
                pl.BlockSpec((latent, Hp), lambda i: (0, 0)),   # w1 (resident)
                pl.BlockSpec((1, Hp),      lambda i: (0, 0)),   # b1 (resident)
                pl.BlockSpec((Hp, Hp),     lambda i: (0, 0)),   # w2 (resident)
                pl.BlockSpec((1, Hp),      lambda i: (0, 0)),   # b2 (resident)
                pl.BlockSpec((Hp, Np),     lambda i: (0, 0)),   # w3 (resident)
                pl.BlockSpec((1, Np),      lambda i: (0, 0)),   # b3 (resident)
            ],
            out_specs=pl.BlockSpec((tb, Np), lambda i: (i, 0)),
        ),
        compiler_params=pltpu.CompilerParams(
            dimension_semantics=("parallel",),
            vmem_limit_bytes=32 * 1024 * 1024,
        ),
    )(x, prep["w1"], prep["b1"], prep["w2"], prep["b2"], prep["w3"], prep["b3"])

    return out[:B, :out_nodes]


# ---------------------------------------------------------------------------
# Synthetic init (torch Linear layout: weight (out, in)) + pure-JAX references
# ---------------------------------------------------------------------------
def init_params(key, latent_nodes, out_nodes, hidden=1000):
    ks = jax.random.split(key, 6)

    def lin(kw, kb, fan_in, fan_out):
        bound = 1.0 / jnp.sqrt(fan_in)
        w = jax.random.uniform(kw, (fan_out, fan_in), jnp.float32, -bound, bound)
        b = jax.random.uniform(kb, (fan_out,), jnp.float32, -bound, bound)
        return w, b

    w1, b1 = lin(ks[0], ks[1], latent_nodes, hidden)
    w2, b2 = lin(ks[2], ks[3], hidden, hidden)
    w3, b3 = lin(ks[4], ks[5], hidden, out_nodes)
    return {"w1": w1, "b1": b1, "w2": w2, "b2": b2, "w3": w3, "b3": b3}


def decoder_ref_f32(x, params):
    """Full-precision reference with original torch-layout params."""
    h = jnp.maximum(x @ params["w1"].T + params["b1"], 0.0)
    h = jnp.maximum(h @ params["w2"].T + params["b2"], 0.0)
    return jax.nn.sigmoid(h @ params["w3"].T + params["b3"])


def decoder_ref_prepared(x, prep, out_nodes):
    """Reference that mirrors the kernel's bf16-weight / f32-accumulate math."""
    h1 = jnp.maximum(x @ prep["w1"] + prep["b1"], 0.0)
    h2 = jnp.dot(h1.astype(jnp.bfloat16), prep["w2"],
                 preferred_element_type=jnp.float32) + prep["b2"]
    h2 = jnp.maximum(h2, 0.0)
    logits = jnp.dot(h2.astype(jnp.bfloat16), prep["w3"],
                     preferred_element_type=jnp.float32) + prep["b3"]
    return jax.nn.sigmoid(logits)[:, :out_nodes]


if __name__ == "__main__":
    key = jax.random.PRNGKey(0)
    k_x, k_p = jax.random.split(key)

    latent_nodes = 8
    out_nodes = 784      # e.g. 28*28 image decoder
    batch = 8

    x = jax.random.normal(k_x, (batch, latent_nodes), dtype=jnp.float32)
    params = init_params(k_p, latent_nodes, out_nodes)
    prep = prepare_params(params)          # one-time transpose + pad + bf16

    out = decoder_forward(x, prep, out_nodes)
    out = jax.block_until_ready(out)
    assert out.shape == (batch, out_nodes)

    # Tight check against a reference using the same bf16/padded weights.
    ref_bf16 = decoder_ref_prepared(x, prep, out_nodes)
    assert jnp.allclose(out, ref_bf16, atol=1e-2, rtol=1e-2), "mismatch vs bf16-weight reference"

    # Loose check against the full f32 torch-semantics reference (bf16 weight streaming).
    ref_f32 = decoder_ref_f32(x, params)
    assert jnp.allclose(out, ref_f32, atol=2.5e-2, rtol=2.5e-2), "mismatch vs f32 reference"

    print("KERNEL_OK")
</pallas_src>

<mosaic_0001>
module attributes {stable_mosaic.version = 11 : i64} {
  func.func @decoder_kernel(%arg0: i32, %arg1: memref<8x8xf32, #tpu.memory_space<vmem>>, %arg2: memref<8x1024xf32, #tpu.memory_space<vmem>>, %arg3: memref<1x1024xf32, #tpu.memory_space<vmem>>, %arg4: memref<1024x1024xbf16, #tpu.memory_space<vmem>>, %arg5: memref<1x1024xf32, #tpu.memory_space<vmem>>, %arg6: memref<1024x896xbf16, #tpu.memory_space<vmem>>, %arg7: memref<1x896xf32, #tpu.memory_space<vmem>>, %arg8: memref<8x896xf32, #tpu.memory_space<vmem>>) attributes {dimension_semantics = [#tpu.dimension_semantics<parallel>], iteration_bounds = array<i64: 1>, scalar_prefetch = 0 : i64, scratch_operands = 0 : i64, tpu.core_type = #tpu.core_type<tc>, window_params = [{transform_indices = @transform_0, window_bounds = array<i64: 8, 8>}, {pipeline_mode = #tpu.pipeline_mode<synchronous>, transform_indices = @transform_1, window_bounds = array<i64: 8, 1024>}, {pipeline_mode = #tpu.pipeline_mode<synchronous>, transform_indices = @transform_2, window_bounds = array<i64: 1, 1024>}, {pipeline_mode = #tpu.pipeline_mode<synchronous>, transform_indices = @transform_3, window_bounds = array<i64: 1024, 1024>}, {pipeline_mode = #tpu.pipeline_mode<synchronous>, transform_indices = @transform_4, window_bounds = array<i64: 1, 1024>}, {pipeline_mode = #tpu.pipeline_mode<synchronous>, transform_indices = @transform_5, window_bounds = array<i64: 1024, 896>}, {pipeline_mode = #tpu.pipeline_mode<synchronous>, transform_indices = @transform_6, window_bounds = array<i64: 1, 896>}, {transform_indices = @transform_7, window_bounds = array<i64: 8, 896>}]} {
    %c0 = arith.constant 0 : index
    %c0_0 = arith.constant 0 : index
    %0 = vector.load %arg1[%c0, %c0_0] : memref<8x8xf32, #tpu.memory_space<vmem>>, vector<8x8xf32>
    %c0_1 = arith.constant 0 : index
    %c0_2 = arith.constant 0 : index
    %1 = vector.load %arg2[%c0_1, %c0_2] : memref<8x1024xf32, #tpu.memory_space<vmem>>, vector<8x1024xf32>
    %cst = arith.constant dense<0.000000e+00> : vector<8x1024xf32>
    %2 = tpu.matmul %0, %1, %cst {dimension_numbers = #tpu.dot_dimension_numbers<[1], [0], [0], [1], [0, 0, 1, 1], [], []>} : vector<8x8xf32>, vector<8x1024xf32>, vector<8x1024xf32> -> vector<8x1024xf32>
    %c0_3 = arith.constant 0 : index
    %c0_4 = arith.constant 0 : index
    %3 = vector.load %arg3[%c0_3, %c0_4] : memref<1x1024xf32, #tpu.memory_space<vmem>>, vector<1x1024xf32>
    %4 = vector.broadcast %3 : vector<1x1024xf32> to vector<8x1024xf32>
    %5 = arith.addf %2, %4 : vector<8x1024xf32>
    %cst_5 = arith.constant 0.000000e+00 : f32
    %6 = vector.broadcast %cst_5 : f32 to vector<8x1024xf32>
    %7 = arith.maximumf %5, %6 : vector<8x1024xf32>
    %8 = arith.truncf %7 : vector<8x1024xf32> to vector<8x1024xbf16>
    %c0_6 = arith.constant 0 : index
    %c0_7 = arith.constant 0 : index
    %9 = vector.load %arg4[%c0_6, %c0_7] : memref<1024x1024xbf16, #tpu.memory_space<vmem>>, vector<1024x1024xbf16>
    %cst_8 = arith.constant dense<0.000000e+00> : vector<8x1024xf32>
    %10 = tpu.matmul %8, %9, %cst_8 {dimension_numbers = #tpu.dot_dimension_numbers<[1], [0], [0], [1], [0, 0, 1, 1], [], []>} : vector<8x1024xbf16>, vector<1024x1024xbf16>, vector<8x1024xf32> -> vector<8x1024xf32>
    %c0_9 = arith.constant 0 : index
    %c0_10 = arith.constant 0 : index
    %11 = vector.load %arg5[%c0_9, %c0_10] : memref<1x1024xf32, #tpu.memory_space<vmem>>, vector<1x1024xf32>
    %12 = vector.broadcast %11 : vector<1x1024xf32> to vector<8x1024xf32>
    %13 = arith.addf %10, %12 : vector<8x1024xf32>
    %cst_11 = arith.constant 0.000000e+00 : f32
    %14 = vector.broadcast %cst_11 : f32 to vector<8x1024xf32>
    %15 = arith.maximumf %13, %14 : vector<8x1024xf32>
    %16 = arith.truncf %15 : vector<8x1024xf32> to vector<8x1024xbf16>
    %c0_12 = arith.constant 0 : index
    %c0_13 = arith.constant 0 : index
    %17 = vector.load %arg6[%c0_12, %c0_13] : memref<1024x896xbf16, #tpu.memory_space<vmem>>, vector<1024x896xbf16>
    %cst_14 = arith.constant dense<0.000000e+00> : vector<8x896xf32>
    %18 = tpu.matmul %16, %17, %cst_14 {dimension_numbers = #tpu.dot_dimension_numbers<[1], [0], [0], [1], [0, 0, 1, 1], [], []>} : vector<8x1024xbf16>, vector<1024x896xbf16>, vector<8x896xf32> -> vector<8x896xf32>
    %c0_15 = arith.constant 0 : index
    %c0_16 = arith.constant 0 : index
    %19 = vector.load %arg7[%c0_15, %c0_16] : memref<1x896xf32, #tpu.memory_space<vmem>>, vector<1x896xf32>
    %20 = vector.broadcast %19 : vector<1x896xf32> to vector<8x896xf32>
    %21 = arith.addf %18, %20 : vector<8x896xf32>
    %22 = arith.negf %21 : vector<8x896xf32>
    %23 = math.exp %22 : vector<8x896xf32>
    %cst_17 = arith.constant 1.000000e+00 : f32
    %24 = vector.broadcast %cst_17 : f32 to vector<8x896xf32>
    %25 = arith.addf %24, %23 : vector<8x896xf32>
    %26 = arith.divf %24, %25 : vector<8x896xf32>
    %c0_18 = arith.constant 0 : index
    %c0_19 = arith.constant 0 : index
    %27 = vector.load %arg8[%c0_18, %c0_19] : memref<8x896xf32, #tpu.memory_space<vmem>>, vector<8x896xf32>
    tpu.vector_store %arg8[%c0_18, %c0_19], %26 {strides = array<i32>} : memref<8x896xf32, #tpu.memory_space<vmem>>, vector<8x896xf32>,
    return
  }
  func.func @transform_0(%arg0: i32) -> (i32, i32) {
    %c0_i32 = arith.constant 0 : i32
    %c0_i32_0 = arith.constant 0 : i32
    return %arg0, %c0_i32 : i32, i32
  }
  func.func @transform_1(%arg0: i32) -> (i32, i32) {
    %c0_i32 = arith.constant 0 : i32
    %c0_i32_0 = arith.constant 0 : i32
    %c0_i32_1 = arith.constant 0 : i32
    return %c0_i32, %c0_i32_0 : i32, i32
  }
  func.func @transform_2(%arg0: i32) -> (i32, i32) {
    %c0_i32 = arith.constant 0 : i32
    %c0_i32_0 = arith.constant 0 : i32
    %c0_i32_1 = arith.constant 0 : i32
    return %c0_i32, %c0_i32_0 : i32, i32
  }
  func.func @transform_3(%arg0: i32) -> (i32, i32) {
    %c0_i32 = arith.constant 0 : i32
    %c0_i32_0 = arith.constant 0 : i32
    %c0_i32_1 = arith.constant 0 : i32
    return %c0_i32, %c0_i32_0 : i32, i32
  }
  func.func @transform_4(%arg0: i32) -> (i32, i32) {
    %c0_i32 = arith.constant 0 : i32
    %c0_i32_0 = arith.constant 0 : i32
    %c0_i32_1 = arith.constant 0 : i32
    return %c0_i32, %c0_i32_0 : i32, i32
  }
  func.func @transform_5(%arg0: i32) -> (i32, i32) {
    %c0_i32 = arith.constant 0 : i32
    %c0_i32_0 = arith.constant 0 : i32
    %c0_i32_1 = arith.constant 0 : i32
    return %c0_i32, %c0_i32_0 : i32, i32
  }
  func.func @transform_6(%arg0: i32) -> (i32, i32) {
    %c0_i32 = arith.constant 0 : i32
    %c0_i32_0 = arith.constant 0 : i32
    %c0_i32_1 = arith.constant 0 : i32
    return %c0_i32, %c0_i32_0 : i32, i32
  }
  func.func @transform_7(%arg0: i32) -> (i32, i32) {
    %c0_i32 = arith.constant 0 : i32
    %c0_i32_0 = arith.constant 0 : i32
    return %arg0, %c0_i32 : i32, i32
  }
}

</mosaic_0001>

<bundles_post_ra>
// kernel: tpu_custom_call.1
= control target key start
LH: loop header
LB: loop body
LE: loop exit
PB: predicated region body
PF: predicated region fallthrough
CT: control target
= control target key end

     0   :  { %12 = vsyncpa [#allocation3], 0  ;;  %s10209_s0 = inlined_call_operand.hbm [shape: f32[8,8], index: 0, kind: input, shape index: {}]   ;;  %s10210_s1 = inlined_call_operand.hbm [shape: f32[8,1024], index: 1, kind: input, shape index: {}]   ;;  %s10211_s2 = inlined_call_operand.hbm [shape: f32[1,1024], index: 2, kind: input, shape index: {}]   ;;  %s10212_s3 = inlined_call_operand.hbm [shape: bf16[1024,1024], index: 3, kind: input, shape index: {}]   ;;  %s10213_s4 = inlined_call_operand.hbm [shape: f32[1,1024], index: 4, kind: input, shape index: {}]   ;;  %s10214_s5 = inlined_call_operand.hbm [shape: bf16[1024,896], index: 5, kind: input, shape index: {}]   ;;  %s10215_s6 = inlined_call_operand.hbm [shape: f32[1,896], index: 6, kind: input, shape index: {}]   ;;  %s10216_s7 = inlined_call_operand.hbm [shape: f32[8,896], index: 7, kind: output, shape index: {}]  }
   0x1   :  { %13 = vsyncpa [#allocation6], 0 }
   0x2   :  { %14 = vsyncpa [#allocation9], 0 }
   0x3   :  { %15 = vsyncpa [#allocation12], 0 }
   0x4   :  { %16 = vsyncpa [#allocation4], 0  ;;  %s9849_s24 = smov [#allocation5]   ;;  %s9850_s26 = smov [#allocation8]  }
   0x5   :  { %s33_s25 = sshll.u32 %s9849_s24, 4  ;;  %s52_s27 = sshll.u32 %s9850_s26, 4  ;;  %s34_s25 = int_to_ptr.vmem [resolvable:$true] %s33_s25  ;;  %s9902_s27 = int_to_ptr.vmem [resolvable:$true] %s52_s27 }
   0x6   :  { %s9663_s30 = scalar_lea.hbm %s10210_s1, 1024 }
   0x7   :  { %p9664_p0 = scmp.ne.s32.totalorder %s10210_s1, %s9663_s30  ;;  %p9667_p1 = scmp.lt.u32.totalorder %s9663_s30, %s10210_s1 }
   0x9   :  { %p9669_p2 = pnand %p9667_p1, %p9664_p0 }
   0xb   :  { %9672 = shalt.err (!%p9669_p2)
}
   0xc   :  { %s9673_s12 = scalar_lea.vmem %s34_s25, 1024  ;;  %p9678_p4 = scmp.lt.s32.totalorder %s34_s25, %s34_s25 }
   0xd   :  { %p9674_p3 = scmp.ne.s32.totalorder %s34_s25, %s9673_s12  ;;  %p9679_p5 = scmp.lt.s32.totalorder %s9673_s12, %s9673_s12 }
   0xf   :  { %p9680_p6 = por %p9679_p5, %p9678_p4 }
  0x11   :  { %p9681_p7 = pnand %p9680_p6, %p9674_p3 }
  0x13   :  { %9684 = shalt.err (!%p9681_p7)
}
  0x14   :  { %36 = dma.hbm_to_vmem [thread:$0]  %s10210_s1, 1024, %s34_s25, [#allocation6]  }
  0x15   :  { %s9685_s17 = scalar_lea.hbm %s10212_s3, 65536 }
  0x16   :  { %p9686_p8 = scmp.ne.s32.totalorder %s10212_s3, %s9685_s17  ;;  %p9689_p9 = scmp.lt.u32.totalorder %s9685_s17, %s10212_s3 }
  0x18   :  { %p9691_p10 = pnand %p9689_p9, %p9686_p8 }
  0x1a   :  { %9694 = shalt.err (!%p9691_p10)
}
  0x1b   :  { %s9695_s22 = scalar_lea.vmem %s9902_s27, 65536  ;;  %p9700_p12 = scmp.lt.s32.totalorder %s9902_s27, %s9902_s27 }
  0x1c   :  { %p9696_p11 = scmp.ne.s32.totalorder %s9902_s27, %s9695_s22  ;;  %p9701_p13 = scmp.lt.s32.totalorder %s9695_s22, %s9695_s22 }
  0x1e   :  { %p9702_p0 = por %p9701_p13, %p9700_p12 }
  0x20   :  { %p9703_p1 = pnand %p9702_p0, %p9696_p11 }
  0x22   :  { %9706 = shalt.err (!%p9703_p1)
}
  0x23   :  { %s9851_s1 = smov 512   ;;  %s9852_s23 = smov 32  }
  0x24   :  { %58 = dma.hbm_to_vmem [thread:$0]  %s10212_s3, 65536, %s9902_s27, [#allocation9], %s9851_s1, %s9851_s1, %s9852_s23  }
  0x25   :  { %s9853_s26 = smov [#allocation11]   ;;  %s9707_s8 = scalar_lea.hbm %s10214_s5, 57344 }
  0x26   :  { %s74_s28 = sshll.u32 %s9853_s26, 4  ;;  %p9708_p2 = scmp.ne.s32.totalorder %s10214_s5, %s9707_s8  ;;  %s75_s28 = int_to_ptr.vmem [resolvable:$true] %s74_s28 }
  0x27   :  { %p9711_p3 = scmp.lt.u32.totalorder %s9707_s8, %s10214_s5 }
  0x29   :  { %p9713_p4 = pnand %p9711_p3, %p9708_p2 }
  0x2b   :  { %9716 = shalt.err (!%p9713_p4)
}
  0x2c   :  { %s9717_s13 = scalar_lea.vmem %s75_s28, 57344  ;;  %p9722_p6 = scmp.lt.s32.totalorder %s75_s28, %s75_s28 }
  0x2d   :  { %p9718_p5 = scmp.ne.s32.totalorder %s75_s28, %s9717_s13  ;;  %p9723_p7 = scmp.lt.s32.totalorder %s9717_s13, %s9717_s13 }
  0x2f   :  { %p9724_p8 = por %p9723_p7, %p9722_p6 }
  0x31   :  { %p9725_p9 = pnand %p9724_p8, %p9718_p5 }
  0x33   :  { %9728 = shalt.err (!%p9725_p9)
}
  0x34   :  { %s9854_s3 = smov 448   ;;  %s9855_s27 = smov 28  }
  0x35   :  { %80 = dma.hbm_to_vmem [thread:$0]  %s10214_s5, 57344, %s75_s28, [#allocation12], %s9854_s3, %s9854_s3, %s9855_s27  }
  0x36   :  { %s9856_s16 = smov [#allocation2]   ;;  %s9857_s18 = smov [#allocation7]  }
  0x37   :  { %s23_s17 = sshll.u32 %s9856_s16, 4  ;;  %s43_s19 = sshll.u32 %s9857_s18, 4  ;;  %s24_s17 = int_to_ptr.vmem [resolvable:$true] %s23_s17  ;;  %s44_s19 = int_to_ptr.vmem [resolvable:$true] %s43_s19 }
  0x38   :  { %s9729_s22 = scalar_lea.hbm %s10209_s0, 128 }
  0x39   :  { %p9730_p10 = scmp.ne.s32.totalorder %s10209_s0, %s9729_s22  ;;  %p9733_p11 = scmp.lt.u32.totalorder %s9729_s22, %s10209_s0 }
  0x3b   :  { %p9735_p12 = pnand %p9733_p11, %p9730_p10 }
  0x3d   :  { %9738 = shalt.err (!%p9735_p12)
}
  0x3e   :  { %s9739_s5 = scalar_lea.vmem %s24_s17, 128  ;;  %p9744_p0 = scmp.lt.s32.totalorder %s24_s17, %s24_s17 }
  0x3f   :  { %p9740_p13 = scmp.ne.s32.totalorder %s24_s17, %s9739_s5  ;;  %p9745_p1 = scmp.lt.s32.totalorder %s9739_s5, %s9739_s5 }
  0x41   :  { %p9746_p2 = por %p9745_p1, %p9744_p0 }
  0x43   :  { %p9747_p3 = pnand %p9746_p2, %p9740_p13 }
  0x45   :  { %9750 = shalt.err (!%p9747_p3)
}
  0x46   :  { %26 = dma.hbm_to_vmem [thread:$0]  %s10209_s0, 128, %s24_s17, [#allocation3]  }
  0x47   :  { %s9751_s8 = scalar_lea.hbm %s10211_s2, 128 }
  0x48   :  { %p9752_p4 = scmp.ne.s32.totalorder %s10211_s2, %s9751_s8  ;;  %p9755_p5 = scmp.lt.u32.totalorder %s9751_s8, %s10211_s2 }
  0x4a   :  { %p9757_p6 = pnand %p9755_p5, %p9752_p4 }
  0x4c   :  { %9760 = shalt.err (!%p9757_p6)
}
  0x4d   :  { %s9761_s13 = scalar_lea.vmem %s44_s19, 128  ;;  %p9766_p8 = scmp.lt.s32.totalorder %s44_s19, %s44_s19 }
  0x4e   :  { %p9762_p7 = scmp.ne.s32.totalorder %s44_s19, %s9761_s13  ;;  %p9767_p9 = scmp.lt.s32.totalorder %s9761_s13, %s9761_s13 }
  0x50   :  { %p9768_p10 = por %p9767_p9, %p9766_p8 }
  0x52   :  { %p9769_p11 = pnand %p9768_p10, %p9762_p7 }
  0x54   :  { %9772 = shalt.err (!%p9769_p11)
}
  0x55   :  { %46 = dma.hbm_to_vmem [thread:$0]  %s10211_s2, 128, %s44_s19, [#allocation6]  }
  0x56   :  { %s9858_s27 = smov [#allocation10]   ;;  %s9859_s15 = smov [#allocation13]  }
  0x57   :  { %s65_s14 = sshll.u32 %s9858_s27, 4  ;;  %s87_s16 = sshll.u32 %s9859_s15, 4  ;;  %s66_s14 = int_to_ptr.vmem [resolvable:$true] %s65_s14  ;;  %s88_s16 = int_to_ptr.vmem [resolvable:$true] %s87_s16 }
  0x58   :  { %s9773_s20 = scalar_lea.hbm %s10213_s4, 128 }
  0x59   :  { %p9774_p12 = scmp.ne.s32.totalorder %s10213_s4, %s9773_s20  ;;  %p9777_p13 = scmp.lt.u32.totalorder %s9773_s20, %s10213_s4 }
  0x5b   :  { %p9779_p0 = pnand %p9777_p13, %p9774_p12 }
  0x5d   :  { %9782 = shalt.err (!%p9779_p0)
}
  0x5e   :  { %s9783_s2 = scalar_lea.vmem %s66_s14, 128  ;;  %p9788_p2 = scmp.lt.s32.totalorder %s66_s14, %s66_s14 }
  0x5f   :  { %p9784_p1 = scmp.ne.s32.totalorder %s66_s14, %s9783_s2  ;;  %p9789_p3 = scmp.lt.s32.totalorder %s9783_s2, %s9783_s2 }
  0x61   :  { %p9790_p4 = por %p9789_p3, %p9788_p2 }
  0x63   :  { %p9791_p5 = pnand %p9790_p4, %p9784_p1 }
  0x65   :  { %9794 = shalt.err (!%p9791_p5)
}
  0x66   :  { %68 = dma.hbm_to_vmem [thread:$0]  %s10213_s4, 128, %s66_s14, [#allocation9]  }
  0x67   :  { %s9795_s26 = scalar_lea.hbm %s10215_s6, 112 }
  0x68   :  { %p9796_p6 = scmp.ne.s32.totalorder %s10215_s6, %s9795_s26  ;;  %p9799_p7 = scmp.lt.u32.totalorder %s9795_s26, %s10215_s6 }
  0x6a   :  { %p9801_p8 = pnand %p9799_p7, %p9796_p6 }
  0x6c   :  { %9804 = shalt.err (!%p9801_p8)
}
  0x6d   :  { %s9805_s9 = scalar_lea.vmem %s88_s16, 112  ;;  %s9809_s10 = scalar_lea.vmem %s88_s16, 128 }
  0x6e   :  { %p9806_p9 = scmp.ne.s32.totalorder %s88_s16, %s9805_s9  ;;  %p9810_p10 = scmp.lt.s32.totalorder %s88_s16, %s88_s16 }
  0x6f   :  { %p9811_p11 = scmp.lt.s32.totalorder %s9809_s10, %s9805_s9 }
  0x71   :  { %p9812_p12 = por %p9811_p11, %p9810_p10 }
  0x73   :  { %p9813_p13 = pnand %p9812_p12, %p9806_p9 }
  0x75   :  { %9816 = shalt.err (!%p9813_p13)
}
  0x76   :  { %90 = dma.hbm_to_vmem [thread:$0]  %s10215_s6, 112, %s88_s16, [#allocation12]  }
  0x77   :  { %9839 = dma.done.wait [#allocation3], 128  }
  0x78   :  { %9840 = vsyncadd [#allocation3], 4294967168 }
  0x79   :  { %9841 = dma.done.wait [#allocation6], 1152  }
  0x7a   :  { %9842 = vsyncadd [#allocation6], 4294966144 }
  0x7b   :  { %9843 = dma.done.wait [#allocation9], 65664  }
  0x7c   :  { %9844 = vsyncadd [#allocation9], 4294901632 }
  0x7d   :  { %9845 = dma.done.wait [#allocation12], 57456  }
  0x7e   :  { %9846 = vsyncadd [#allocation12], 4294909840  ;;  %v9860_v0 = vmov 0.0   ;;  %v115_v1 = vld [vmem:[#allocation5 + $0x8] sm:$0xff]  ;;  %v117_v2 = vld [vmem:[#allocation5 + $0x18] sm:$0xff]  ;;  %vm164_vm0 = vcmask 64512  }
  0x7f   :  { %232 = vmatprep.mubr.f32.mxu0 %v9860_v0  ;;  %303 = vmatprep.mubr.f32.mxu1 %v9860_v0  ;;  %v114_v3 = vld [vmem:[#allocation5] sm:$0xff]  ;;  %v116_v4 = vld [vmem:[#allocation5 + $0x10] sm:$0xff]  ;;  %v113_v5 = vld [vmem:[#allocation2] sm:$0xff]  ;;  %s9861_s6 = smov [#allocation14]  }
  0x80   :  { %168 = vmatprep.subr.mxu0 %v115_v1  ;;  %239 = vmatprep.subr.mxu1 %v117_v2  ;;  %v119_v6 = vld [vmem:[#allocation5 + $0x28] sm:$0xff]  ;;  %v118_v7 = vld [vmem:[#allocation5 + $0x20] sm:$0xff]  ;;  %v121_v8 = vld [vmem:[#allocation5 + $0x38] sm:$0xff]  ;;  %s7814_s12 = sshll.u32 %s9861_s6, 4  ;;  %s7815_s12 = int_to_ptr.vmem [resolvable:$true] %s7814_s12 }
  0x81   :  { %169 = vmatpush1.msra.mxu0 %v114_v3  ;;  %240 = vmatpush1.msra.mxu1 %v116_v4  ;;  %v120_v9 = vld [vmem:[#allocation5 + $0x30] sm:$0xff]  ;;  %v468_v10 = vld [vmem:[#allocation8] sm:$0xff]  ;;  %s9817_s13 = scalar_lea.vmem %s7815_s12, 896  ;;  %p9822_p1 = scmp.lt.s32.totalorder %s7815_s12, %s7815_s12 }
  0x82   :  { %7826 = vmatmul.mubr.msk.f32.vlgmr.msra.gmra.mrb[0].mxu0 %vm164_vm0, %v113_v5  ;;  %7827 = vmatmul.mubr.msk.f32.vlgmr.msra.gmra.mrb[0].mxu1 %vm164_vm0, %v113_v5  ;;  %v472_v11 = vld [vmem:[#allocation8 + $0x20] sm:$0xff]  ;;  %p9818_p0 = scmp.ne.s32.totalorder %s7815_s12, %s9817_s13  ;;  %p9823_p2 = scmp.lt.s32.totalorder %s9817_s13, %s9817_s13 }
  0x83   :  { %v596_v12 = vld [vmem:[#allocation8 + $0x400] sm:$0xff]  ;;  %310 = vmatprep.subr.mxu0 %v119_v6  ;;  %374 = vmatprep.mubr.f32.mxu0 %v9860_v0  ;;  %v7831_v13 = vcombine.high %v468_v10, %v472_v11  ;;  %v7830_v17 = vcombine.low %v468_v10, %v472_v11 }
  0x84   :  { %v600_v14 = vld [vmem:[#allocation8 + $0x420] sm:$0xff]  ;;  %311 = vmatpush1.msra.mxu0 %v118_v7  ;;  %381 = vmatprep.subr.mxu1 %v121_v8  ;;  %p9824_p3 = por %p9823_p2, %p9822_p1 }
  0x85   :  { %v476_v15 = vld [vmem:[#allocation8 + $0x40] sm:$0xff]  ;;  %v7958_v18 = vcombine.low %v596_v12, %v600_v14  ;;  %v7959_v19 = vcombine.high %v596_v12, %v600_v14  ;;  %382 = vmatpush1.msra.mxu1 %v120_v9  ;;  %445 = vmatprep.mubr.f32.mxu1 %v9860_v0 }
  0x86   :  { %v480_v16 = vld [vmem:[#allocation8 + $0x60] sm:$0xff]  ;;  %7828 = vmatmul.mubr.msk.f32.vlgmr.msra.gmra.mrb[2].mxu0 %vm164_vm0, %v113_v5  ;;  %7829 = vmatmul.mubr.msk.f32.vlgmr.msra.gmra.mrb[2].mxu1 %vm164_vm0, %v113_v5  ;;  %p9825_p4 = pnand %p9824_p3, %p9818_p0 }
  0x87   :  { %v604_v20 = vld [vmem:[#allocation8 + $0x440] sm:$0xff]  ;;  %v7839_v22 = vcombine.high %v476_v15, %v480_v16  ;;  %3582 = vmatprep.subr.bf16.mxu1 %v7831_v13  ;;  %3623 = vmatprep.subr.bf16.mxu0 %v7959_v19  ;;  %v7838_v28 = vcombine.low %v476_v15, %v480_v16 }
  0x88   :  { %v608_v21 = vld [vmem:[#allocation8 + $0x460] sm:$0xff]  ;;  %3583 = vmatpush1.bf16.msra.mxu1 %v7830_v17  ;;  %3624 = vmatpush1.bf16.msra.mxu0 %v7958_v18 }
  0x89   :  { %v7967_v23 = vcombine.high %v604_v20, %v608_v21  ;;  %v484_v24 = vld [vmem:[#allocation8 + $0x80] sm:$0xff]  ;;  %v7966_v29 = vcombine.low %v604_v20, %v608_v21  ;;  %3584 = vmatprep.subr.bf16.mxu1 %v7839_v22 }
  0x8a   :  { %v488_v25 = vld [vmem:[#allocation8 + $0xa0] sm:$0xff] }
  0x8b   :  { %v612_v26 = vld [vmem:[#allocation8 + $0x480] sm:$0xff]  ;;  %3625 = vmatprep.subr.bf16.mxu0 %v7967_v23  ;;  %v7847_v30 = vcombine.high %v484_v24, %v488_v25  ;;  %v7846_v36 = vcombine.low %v484_v24, %v488_v25 }
  0x8c   :  { %v616_v27 = vld [vmem:[#allocation8 + $0x4a0] sm:$0xff]  ;;  %3585 = vmatpush1.bf16.msra.mxu1 %v7838_v28  ;;  %3626 = vmatpush1.bf16.msra.mxu0 %v7966_v29 }
  0x8d   :  { %v7975_v31 = vcombine.high %v612_v26, %v616_v27  ;;  %v492_v32 = vld [vmem:[#allocation8 + $0xc0] sm:$0xff]  ;;  %v7974_v37 = vcombine.low %v612_v26, %v616_v27  ;;  %3586 = vmatprep.subr.bf16.mxu1 %v7847_v30 }
  0x8e   :  { %v496_v33 = vld [vmem:[#allocation8 + $0xe0] sm:$0xff] }
  0x8f   :  { %v620_v34 = vld [vmem:[#allocation8 + $0x4c0] sm:$0xff]  ;;  %3627 = vmatprep.subr.bf16.mxu0 %v7975_v31  ;;  %v7855_v38 = vcombine.high %v492_v32, %v496_v33  ;;  %v7854_v44 = vcombine.low %v492_v32, %v496_v33 }
  0x90   :  { %v624_v35 = vld [vmem:[#allocation8 + $0x4e0] sm:$0xff]  ;;  %3587 = vmatpush1.bf16.msra.mxu1 %v7846_v36  ;;  %3628 = vmatpush1.bf16.msra.mxu0 %v7974_v37 }
  0x91   :  { %v7983_v39 = vcombine.high %v620_v34, %v624_v35  ;;  %v500_v40 = vld [vmem:[#allocation8 + $0x100] sm:$0xff]  ;;  %v7982_v45 = vcombine.low %v620_v34, %v624_v35  ;;  %3588 = vmatprep.subr.bf16.mxu1 %v7855_v38 }
  0x92   :  { %v504_v41 = vld [vmem:[#allocation8 + $0x120] sm:$0xff] }
  0x93   :  { %v628_v42 = vld [vmem:[#allocation8 + $0x500] sm:$0xff]  ;;  %3629 = vmatprep.subr.bf16.mxu0 %v7983_v39  ;;  %v7863_v46 = vcombine.high %v500_v40, %v504_v41  ;;  %v7862_v52 = vcombine.low %v500_v40, %v504_v41 }
  0x94   :  { %v632_v43 = vld [vmem:[#allocation8 + $0x520] sm:$0xff]  ;;  %3589 = vmatpush1.bf16.msra.mxu1 %v7854_v44  ;;  %3630 = vmatpush1.bf16.msra.mxu0 %v7982_v45 }
  0x95   :  { %v7991_v47 = vcombine.high %v628_v42, %v632_v43  ;;  %v508_v48 = vld [vmem:[#allocation8 + $0x140] sm:$0xff]  ;;  %v7990_v53 = vcombine.low %v628_v42, %v632_v43  ;;  %3590 = vmatprep.subr.bf16.mxu1 %v7863_v46 }
  0x96   :  { %v512_v49 = vld [vmem:[#allocation8 + $0x160] sm:$0xff] }
  0x97   :  { %v636_v50 = vld [vmem:[#allocation8 + $0x540] sm:$0xff]  ;;  %3631 = vmatprep.subr.bf16.mxu0 %v7991_v47  ;;  %v7871_v58 = vcombine.high %v508_v48, %v512_v49  ;;  %v7870_v60 = vcombine.low %v508_v48, %v512_v49 }
  0x98   :  { %v640_v51 = vld [vmem:[#allocation8 + $0x560] sm:$0xff]  ;;  %3591 = vmatpush1.bf16.msra.mxu1 %v7862_v52  ;;  %3632 = vmatpush1.bf16.msra.mxu0 %v7990_v53 }
  0x99   :  { %v516_v54 = vld [vmem:[#allocation8 + $0x180] sm:$0xff]  ;;  %v7999_v59 = vcombine.high %v636_v50, %v640_v51  ;;  %v7998_v61 = vcombine.low %v636_v50, %v640_v51  ;;  %3592 = vmatprep.subr.bf16.mxu1 %v7871_v58 }
  0x9a   :  { %v520_v55 = vld [vmem:[#allocation8 + $0x1a0] sm:$0xff] }
  0x9b   :  { %v644_v56 = vld [vmem:[#allocation8 + $0x580] sm:$0xff]  ;;  %3633 = vmatprep.subr.bf16.mxu0 %v7999_v59  ;;  %v7879_v2 = vcombine.high %v516_v54, %v520_v55  ;;  %v7878_v4 = vcombine.low %v516_v54, %v520_v55 }
  0x9c   :  { %v648_v57 = vld [vmem:[#allocation8 + $0x5a0] sm:$0xff]  ;;  %3593 = vmatpush1.bf16.msra.mxu1 %v7870_v60  ;;  %3634 = vmatpush1.bf16.msra.mxu0 %v7998_v61 }
  0x9d   :  { %v524_v62 = vld [vmem:[#allocation8 + $0x1c0] sm:$0xff]  ;;  %v8007_v3 = vcombine.high %v644_v56, %v648_v57  ;;  %v8006_v5 = vcombine.low %v644_v56, %v648_v57  ;;  %3594 = vmatprep.subr.bf16.mxu1 %v7879_v2 }
  0x9e   :  { %v528_v63 = vld [vmem:[#allocation8 + $0x1e0] sm:$0xff] }
  0x9f   :  { %v652_v0 = vld [vmem:[#allocation8 + $0x5c0] sm:$0xff]  ;;  %3635 = vmatprep.subr.bf16.mxu0 %v8007_v3  ;;  %v7887_v10 = vcombine.high %v524_v62, %v528_v63  ;;  %v7886_v12 = vcombine.low %v524_v62, %v528_v63 }
  0xa0   :  { %v656_v1 = vld [vmem:[#allocation8 + $0x5e0] sm:$0xff]  ;;  %3595 = vmatpush1.bf16.msra.mxu1 %v7878_v4  ;;  %3636 = vmatpush1.bf16.msra.mxu0 %v8006_v5 }
  0xa1   :  { %v532_v6 = vld [vmem:[#allocation8 + $0x200] sm:$0xff]  ;;  %v8015_v11 = vcombine.high %v652_v0, %v656_v1  ;;  %v8014_v13 = vcombine.low %v652_v0, %v656_v1  ;;  %3596 = vmatprep.subr.bf16.mxu1 %v7887_v10 }
  0xa2   :  { %v536_v7 = vld [vmem:[#allocation8 + $0x220] sm:$0xff] }
  0xa3   :  { %v660_v8 = vld [vmem:[#allocation8 + $0x600] sm:$0xff]  ;;  %3637 = vmatprep.subr.bf16.mxu0 %v8015_v11  ;;  %v7895_v18 = vcombine.high %v532_v6, %v536_v7  ;;  %v7894_v20 = vcombine.low %v532_v6, %v536_v7 }
  0xa4   :  { %v664_v9 = vld [vmem:[#allocation8 + $0x620] sm:$0xff]  ;;  %3597 = vmatpush1.bf16.msra.mxu1 %v7886_v12  ;;  %3638 = vmatpush1.bf16.msra.mxu0 %v8014_v13  ;;  %v469_v12 = vld [vmem:[#allocation8 + $0x8] sm:$0xff] }
  0xa5   :  { %v540_v14 = vld [vmem:[#allocation8 + $0x240] sm:$0xff]  ;;  %v8023_v19 = vcombine.high %v660_v8, %v664_v9  ;;  %v8022_v21 = vcombine.low %v660_v8, %v664_v9  ;;  %3598 = vmatprep.subr.bf16.mxu1 %v7895_v18  ;;  %v124_v18 = vlaneseq }
  0xa6   :  { %v544_v15 = vld [vmem:[#allocation8 + $0x260] sm:$0xff] }
  0xa7   :  { %v668_v16 = vld [vmem:[#allocation8 + $0x640] sm:$0xff]  ;;  %3639 = vmatprep.subr.bf16.mxu0 %v8023_v19  ;;  %v7903_v26 = vcombine.high %v540_v14, %v544_v15  ;;  %v7902_v28 = vcombine.low %v540_v14, %v544_v15  ;;  %v473_v14 = vld [vmem:[#allocation8 + $0x28] sm:$0xff]  ;;  %v9997_v19 = vshrl.u32 %v124_v18, 7 }
  0xa8   :  { %v672_v17 = vld [vmem:[#allocation8 + $0x660] sm:$0xff]  ;;  %3599 = vmatpush1.bf16.msra.mxu1 %v7894_v20  ;;  %3640 = vmatpush1.bf16.msra.mxu0 %v8022_v21 }
  0xa9   :  { %v548_v22 = vld [vmem:[#allocation8 + $0x280] sm:$0xff]  ;;  %v8031_v27 = vcombine.high %v668_v16, %v672_v17  ;;  %v8030_v29 = vcombine.low %v668_v16, %v672_v17  ;;  %3600 = vmatprep.subr.bf16.mxu1 %v7903_v26  ;;  %v7832_v16 = vcombine.low %v469_v12, %v473_v14  ;;  %v7833_v17 = vcombine.high %v469_v12, %v473_v14  ;;  %v501_v14 = vld [vmem:[#allocation8 + $0x108] sm:$0xff] }
  0xaa   :  { %v552_v23 = vld [vmem:[#allocation8 + $0x2a0] sm:$0xff]  ;;  %v10000_v20 = vsub.s32 0, %v9997_v19  ;;  %v10003_v21 = vsub.s32 2, %v9997_v19 }
  0xab   :  { %v676_v24 = vld [vmem:[#allocation8 + $0x680] sm:$0xff]  ;;  %3641 = vmatprep.subr.bf16.mxu0 %v8031_v27  ;;  %v7911_v34 = vcombine.high %v548_v22, %v552_v23  ;;  %v7910_v36 = vcombine.low %v548_v22, %v552_v23  ;;  %v10005_v22 = vld [vmem:[#allocation7] sm:$0xff]  ;;  %v10008_v23 = vsub.s32 1, %v9997_v19 }
  0xac   :  { %v680_v25 = vld [vmem:[#allocation8 + $0x6a0] sm:$0xff]  ;;  %3601 = vmatpush1.bf16.msra.mxu1 %v7902_v28  ;;  %3642 = vmatpush1.bf16.msra.mxu0 %v8030_v29  ;;  %v135_v26 = vrot.slane %v10005_v22, %v10003_v21  ;;  %v10022_v29 = vsub.s32 5, %v9997_v19 }
  0xad   :  { %v556_v30 = vld [vmem:[#allocation8 + $0x2c0] sm:$0xff]  ;;  %v8039_v35 = vcombine.high %v676_v24, %v680_v25  ;;  %v8038_v37 = vcombine.low %v676_v24, %v680_v25  ;;  %3602 = vmatprep.subr.bf16.mxu1 %v7911_v34  ;;  %v10011_v24 = vsub.s32 3, %v9997_v19  ;;  %v127_v25 = vrot.slane %v10005_v22, %v10000_v20 }
  0xae   :  { %v560_v31 = vld [vmem:[#allocation8 + $0x2e0] sm:$0xff]  ;;  %v131_v27 = vrot.slane %v10005_v22, %v10008_v23 }
  0xaf   :  { %v684_v32 = vld [vmem:[#allocation8 + $0x6c0] sm:$0xff]  ;;  %3643 = vmatprep.subr.bf16.mxu0 %v8039_v35  ;;  %v7919_v42 = vcombine.high %v556_v30, %v560_v31  ;;  %v7918_v44 = vcombine.low %v556_v30, %v560_v31  ;;  %v139_v28 = vrot.slane %v10005_v22, %v10011_v24 }
  0xb0   :  { %v688_v33 = vld [vmem:[#allocation8 + $0x6e0] sm:$0xff]  ;;  %3603 = vmatpush1.bf16.msra.mxu1 %v7910_v36  ;;  %3644 = vmatpush1.bf16.msra.mxu0 %v8038_v37 }
  0xb1   :  { %v564_v38 = vld [vmem:[#allocation8 + $0x300] sm:$0xff]  ;;  %v8047_v43 = vcombine.high %v684_v32, %v688_v33  ;;  %v8046_v45 = vcombine.low %v684_v32, %v688_v33  ;;  %3604 = vmatprep.subr.bf16.mxu1 %v7919_v42 }
  0xb2   :  { %v568_v39 = vld [vmem:[#allocation8 + $0x320] sm:$0xff] }
  0xb3   :  { %v692_v40 = vld [vmem:[#allocation8 + $0x700] sm:$0xff]  ;;  %3645 = vmatprep.subr.bf16.mxu0 %v8047_v43  ;;  %v7927_v50 = vcombine.high %v564_v38, %v568_v39  ;;  %v7926_v52 = vcombine.low %v564_v38, %v568_v39  ;;  %v477_v43 = vld [vmem:[#allocation8 + $0x48] sm:$0xff] }
  0xb4   :  { %v696_v41 = vld [vmem:[#allocation8 + $0x720] sm:$0xff]  ;;  %3605 = vmatpush1.bf16.msra.mxu1 %v7918_v44  ;;  %3646 = vmatpush1.bf16.msra.mxu0 %v8046_v45  ;;  %v481_v44 = vld [vmem:[#allocation8 + $0x68] sm:$0xff] }
  0xb5   :  { %v572_v46 = vld [vmem:[#allocation8 + $0x340] sm:$0xff]  ;;  %v8055_v51 = vcombine.high %v692_v40, %v696_v41  ;;  %v8054_v53 = vcombine.low %v692_v40, %v696_v41  ;;  %3606 = vmatprep.subr.bf16.mxu1 %v7927_v50  ;;  %v147_v40 = vrot.slane %v10005_v22, %v10022_v29 }
  0xb6   :  { %v576_v47 = vld [vmem:[#allocation8 + $0x360] sm:$0xff] }
  0xb7   :  { %v700_v48 = vld [vmem:[#allocation8 + $0x740] sm:$0xff]  ;;  %3647 = vmatprep.subr.bf16.mxu0 %v8055_v51  ;;  %v7935_v54 = vcombine.high %v572_v46, %v576_v47  ;;  %v7934_v56 = vcombine.low %v572_v46, %v576_v47 }
  0xb8   :  { %v704_v49 = vld [vmem:[#allocation8 + $0x760] sm:$0xff]  ;;  %3607 = vmatpush1.bf16.msra.mxu1 %v7926_v52  ;;  %3648 = vmatpush1.bf16.msra.mxu0 %v8054_v53 }
  0xb9   :  { %v8063_v55 = vcombine.high %v700_v48, %v704_v49  ;;  %v8062_v57 = vcombine.low %v700_v48, %v704_v49  ;;  %3608 = vmatprep.subr.bf16.mxu1 %v7935_v54  ;;  %v580_v58 = vld [vmem:[#allocation8 + $0x380] sm:$0xff] }
  0xba   :  { %v584_v59 = vld [vmem:[#allocation8 + $0x3a0] sm:$0xff] }
  0xbb   :  { %3649 = vmatprep.subr.bf16.mxu0 %v8063_v55  ;;  %v708_v60 = vld [vmem:[#allocation8 + $0x780] sm:$0xff]  ;;  %v7943_v61 = vcombine.high %v580_v58, %v584_v59  ;;  %v7942_v63 = vcombine.low %v580_v58, %v584_v59  ;;  %v485_v59 = vld [vmem:[#allocation8 + $0x88] sm:$0xff] }
  0xbc   :  { %3609 = vmatpush1.bf16.msra.mxu1 %v7934_v56  ;;  %3650 = vmatpush1.bf16.msra.mxu0 %v8062_v57  ;;  %v712_v62 = vld [vmem:[#allocation8 + $0x7a0] sm:$0xff] }
  0xbd   :  { %v8070_v0 = vcombine.low %v708_v60, %v712_v62  ;;  %v8071_v1 = vcombine.high %v708_v60, %v712_v62  ;;  %3610 = vmatprep.subr.bf16.mxu1 %v7943_v61  ;;  %v588_v2 = vld [vmem:[#allocation8 + $0x3c0] sm:$0xff]  ;;  %v7841_v60 = vcombine.high %v477_v43, %v481_v44  ;;  %v489_v61 = vld [vmem:[#allocation8 + $0xa8] sm:$0xff] }
  0xbe   :  { %v592_v3 = vld [vmem:[#allocation8 + $0x3e0] sm:$0xff] }
  0xbf   :  { %3651 = vmatprep.subr.bf16.mxu0 %v8071_v1  ;;  %v716_v4 = vld [vmem:[#allocation8 + $0x7c0] sm:$0xff]  ;;  %v7951_v5 = vcombine.high %v588_v2, %v592_v3  ;;  %v7950_v7 = vcombine.low %v588_v2, %v592_v3  ;;  %v7849_v3 = vcombine.high %v485_v59, %v489_v61 }
  0xc0   :  { %3611 = vmatpush1.bf16.msra.mxu1 %v7942_v63  ;;  %3652 = vmatpush1.bf16.msra.mxu0 %v8070_v0  ;;  %v720_v6 = vld [vmem:[#allocation8 + $0x7e0] sm:$0xff]  ;;  %v7840_v0 = vcombine.low %v477_v43, %v481_v44 }
  0xc1   :  { %v8078_v8 = vcombine.low %v716_v4, %v720_v6  ;;  %v8079_v9 = vcombine.high %v716_v4, %v720_v6  ;;  %3612 = vmatprep.subr.bf16.mxu1 %v7951_v5  ;;  %v724_v10 = vld [vmem:[#allocation8 + $0x800] sm:$0xff]  ;;  %v493_v6 = vld [vmem:[#allocation8 + $0xc8] sm:$0xff] }
  0xc2   :  { %v728_v11 = vld [vmem:[#allocation8 + $0x820] sm:$0xff] }
  0xc3   :  { %3653 = vmatprep.subr.bf16.mxu0 %v8079_v9  ;;  %v8087_v13 = vcombine.high %v724_v10, %v728_v11  ;;  %v8086_v15 = vcombine.low %v724_v10, %v728_v11  ;;  %v732_v38 = vld [vmem:[#allocation8 + $0x840] sm:$0xff]  ;;  %v7848_v9 = vcombine.low %v485_v59, %v489_v61  ;;  %v537_v61 = vld [vmem:[#allocation8 + $0x228] sm:$0xff] }
  0xc4   :  { %3613 = vmatpush1.bf16.msra.mxu1 %v7950_v7  ;;  %3654 = vmatpush1.bf16.msra.mxu0 %v8078_v8  ;;  %v736_v39 = vld [vmem:[#allocation8 + $0x860] sm:$0xff]  ;;  %v497_v7 = vld [vmem:[#allocation8 + $0xe8] sm:$0xff] }
  0xc5   :  { %3664 = vmatprep.subr.bf16.mxu0 %v8087_v13  ;;  %3746 = vmatprep.subr.bf16.mxu1 %v7833_v17  ;;  %v8095_v56 = vcombine.high %v732_v38, %v736_v39  ;;  %v740_v57 = vld [vmem:[#allocation8 + $0x880] sm:$0xff]  ;;  %v8094_v63 = vcombine.low %v732_v38, %v736_v39  ;;  %v7857_v11 = vcombine.high %v493_v6, %v497_v7  ;;  %v521_v38 = vld [vmem:[#allocation8 + $0x1a8] sm:$0xff] }
  0xc6   :  { %v744_v58 = vld [vmem:[#allocation8 + $0x8a0] sm:$0xff]  ;;  %v7856_v17 = vcombine.low %v493_v6, %v497_v7  ;;  %v545_v6 = vld [vmem:[#allocation8 + $0x268] sm:$0xff] }
  0xc7   :  { %v8103_v2 = vcombine.high %v740_v57, %v744_v58  ;;  %v748_v4 = vld [vmem:[#allocation8 + $0x8c0] sm:$0xff]  ;;  %v8102_v8 = vcombine.low %v740_v57, %v744_v58 }
  0xc8   :  { %v752_v5 = vld [vmem:[#allocation8 + $0x8e0] sm:$0xff] }
  0xc9   :  { %v8111_v10 = vcombine.high %v748_v4, %v752_v5  ;;  %v756_v12 = vld [vmem:[#allocation8 + $0x900] sm:$0xff] }
  0xca   :  { %v760_v13 = vld [vmem:[#allocation8 + $0x920] sm:$0xff] }
  0xcb   :  { %v8119_v18 = vcombine.high %v756_v12, %v760_v13  ;;  %v780_v43 = vld [vmem:[#allocation8 + $0x9c0] sm:$0xff] }
  0xcc   :  { %v784_v44 = vld [vmem:[#allocation8 + $0x9e0] sm:$0xff] }
  0xcd   :  { %v788_v58 = vld [vmem:[#allocation8 + $0xa00] sm:$0xff] }
  0xce   :  { %v792_v59 = vld [vmem:[#allocation8 + $0xa20] sm:$0xff] }
  0xcf   :  { %v8150_v7 = vcombine.low %v788_v58, %v792_v59 }
 0x155   :  { %v234_v30 = vpop.f32.mrb[0].mxu0  ;;  %v305_v31 = vpop.f32.mrb[0].mxu1 }
 0x156   :  { %v235_v32 = vadd.f32 %v234_v30, %v127_v25  ;;  %v306_v33 = vadd.f32 %v305_v31, %v135_v26  ;;  %v236_v34 = vpop.f32.mrb[1].mxu0  ;;  %v307_v35 = vpop.f32.mrb[1].mxu1  ;;  %v764_v26 = vld [vmem:[#allocation8 + $0x940] sm:$0xff]  ;;  %v513_v30 = vld [vmem:[#allocation8 + $0x168] sm:$0xff]  ;;  %v8118_v31 = vcombine.low %v756_v12, %v760_v13 }
 0x157   :  { %v237_v36 = vadd.f32 %v236_v34, %v131_v27  ;;  %v308_v37 = vadd.f32 %v307_v35, %v139_v28  ;;  %v768_v27 = vld [vmem:[#allocation8 + $0x960] sm:$0xff]  ;;  %v509_v28 = vld [vmem:[#allocation8 + $0x148] sm:$0xff] }
 0x158   :  { %v452_v41 = vmax.f32 %v235_v32, 0.0  ;;  %v454_v42 = vmax.f32 %v306_v33, 0.0  ;;  %v8127_v33 = vcombine.high %v764_v26, %v768_v27  ;;  %v7873_v34 = vcombine.high %v509_v28, %v513_v30  ;;  %v772_v35 = vld [vmem:[#allocation8 + $0x980] sm:$0xff]  ;;  %v549_v13 = vld [vmem:[#allocation8 + $0x288] sm:$0xff] }
 0x159   :  { %v453_v45 = vmax.f32 %v237_v36, 0.0  ;;  %v455_v46 = vmax.f32 %v308_v37, 0.0  ;;  %v10026_v47 = vpop.f32.mrb[2].mxu0  ;;  %v10028_v48 = vpop.f32.mrb[2].mxu1  ;;  %v776_v36 = vld [vmem:[#allocation8 + $0x9a0] sm:$0xff]  ;;  %v517_v37 = vld [vmem:[#allocation8 + $0x188] sm:$0xff]  ;;  %v8126_v39 = vcombine.low %v764_v26, %v768_v27 }
 0x15a   :  { %v10030_v49 = vpack.c.bf16 %v454_v42, %v454_v42  ;;  %v378_v50 = vpop.f32.mrb[3].mxu0  ;;  %v10032_v51 = vpop.f32.mrb[3].mxu1  ;;  %v10038_v55 = vpack.c.bf16 %v452_v41, %v452_v41  ;;  %v8135_v41 = vcombine.high %v772_v35, %v776_v36  ;;  %v7881_v42 = vcombine.high %v517_v37, %v521_v38  ;;  %v808_v12 = vld [vmem:[#allocation8 + $0xaa0] sm:$0xff]  ;;  %v557_v27 = vld [vmem:[#allocation8 + $0x2c8] sm:$0xff] }
 0x15b   :  { %v10034_v52 = vpack.c.bf16 %v453_v45, %v453_v45  ;;  %v10036_v53 = vpack.c.bf16 %v455_v46, %v455_v46  ;;  %v379_v54 = vadd.f32 %v378_v50, %v147_v40  ;;  %v7872_v40 = vcombine.low %v509_v28, %v513_v30  ;;  %v525_v45 = vld [vmem:[#allocation8 + $0x1c8] sm:$0xff]  ;;  %v816_v26 = vld [vmem:[#allocation8 + $0xae0] sm:$0xff] }
 0x15c   :  { %v529_v46 = vld [vmem:[#allocation8 + $0x1e8] sm:$0xff]  ;;  %v8134_v50 = vcombine.low %v772_v35, %v776_v36  ;;  %v824_v35 = vld [vmem:[#allocation8 + $0xb20] sm:$0xff] }
 0x15d   :  { %3614 = vmatprep.mubr.bf16.mxu1 %v10034_v52  ;;  %3655 = vmatprep.mubr.bf16.mxu0 %v10036_v53  ;;  %v457_v62 = vmax.f32 %v379_v54, 0.0  ;;  %v7880_v54 = vcombine.low %v517_v37, %v521_v38  ;;  %v7889_v57 = vcombine.high %v525_v45, %v529_v46  ;;  %v561_v28 = vld [vmem:[#allocation8 + $0x2e8] sm:$0xff] }
 0x15e   :  { %3615 = vmatmul.mubr.bf16.vlgmr.msra.gmra.mrb[4].mxu1 %v10038_v55  ;;  %3656 = vmatmul.mubr.bf16.vlgmr.msra.gmra.mrb[4].mxu0 %v10030_v49  ;;  %v565_v36 = vld [vmem:[#allocation8 + $0x308] sm:$0xff] }
 0x15f   :  { %3665 = vmatpush1.bf16.msra.mxu0 %v8086_v15  ;;  %3747 = vmatpush1.bf16.msra.mxu1 %v7832_v16  ;;  %v10044_v1 = vpack.c.bf16 %v457_v62, %v457_v62  ;;  %v505_v15 = vld [vmem:[#allocation8 + $0x128] sm:$0xff]  ;;  %v8110_v16 = vcombine.low %v748_v4, %v752_v5  ;;  %v8142_v62 = vcombine.low %v780_v43, %v784_v44  ;;  %v800_v4 = vld [vmem:[#allocation8 + $0xa60] sm:$0xff] }
 0x160   :  { %3778 = vmatprep.mubr.bf16.mxu1 %v10034_v52  ;;  %3666 = vmatprep.subr.bf16.mxu0 %v8095_v56  ;;  %v7865_v25 = vcombine.high %v501_v14, %v505_v15  ;;  %v7864_v32 = vcombine.low %v501_v14, %v505_v15  ;;  %v8143_v56 = vcombine.high %v780_v43, %v784_v44  ;;  %v541_v5 = vld [vmem:[#allocation8 + $0x248] sm:$0xff]  ;;  %v832_v43 = vld [vmem:[#allocation8 + $0xb60] sm:$0xff] }
 0x161   :  { %3748 = vmatprep.subr.bf16.mxu1 %v7841_v60  ;;  %3696 = vmatprep.mubr.bf16.mxu0 %v10044_v1  ;;  %v533_v60 = vld [vmem:[#allocation8 + $0x208] sm:$0xff] }
 0x162   :  { %v553_v14 = vld [vmem:[#allocation8 + $0x2a8] sm:$0xff] }
 0x163   :  { %3667 = vmatpush1.bf16.msra.mxu0 %v8094_v63  ;;  %3749 = vmatpush1.bf16.msra.mxu1 %v7840_v0  ;;  %v7888_v63 = vcombine.low %v525_v45, %v529_v46  ;;  %v8151_v0 = vcombine.high %v788_v58, %v792_v59  ;;  %v569_v37 = vld [vmem:[#allocation8 + $0x328] sm:$0xff]  ;;  %v10049_v46 = vsub.s32 4, %v9997_v19  ;;  %v836_v58 = vld [vmem:[#allocation8 + $0xb80] sm:$0xff] }
 0x164   :  { %3668 = vmatprep.subr.bf16.mxu0 %v8103_v2  ;;  %3750 = vmatprep.subr.bf16.mxu1 %v7849_v3  ;;  %v7897_v2 = vcombine.high %v533_v60, %v537_v61  ;;  %v796_v3 = vld [vmem:[#allocation8 + $0xa40] sm:$0xff]  ;;  %v573_v44 = vld [vmem:[#allocation8 + $0x348] sm:$0xff] }
 0x165   :  { %v8158_v15 = vcombine.low %v796_v3, %v800_v4  ;;  %v577_v45 = vld [vmem:[#allocation8 + $0x368] sm:$0xff]  ;;  %v840_v59 = vld [vmem:[#allocation8 + $0xba0] sm:$0xff] }
 0x167   :  { %3669 = vmatpush1.bf16.msra.mxu0 %v8102_v8  ;;  %3751 = vmatpush1.bf16.msra.mxu1 %v7848_v9  ;;  %v7896_v8 = vcombine.low %v533_v60, %v537_v61  ;;  %v8159_v9 = vcombine.high %v796_v3, %v800_v4  ;;  %v581_v60 = vld [vmem:[#allocation8 + $0x388] sm:$0xff]  ;;  %v8199_v3 = vcombine.high %v836_v58, %v840_v59 }
 0x168   :  { %3670 = vmatprep.subr.bf16.mxu0 %v8111_v10  ;;  %3752 = vmatprep.subr.bf16.mxu1 %v7857_v11  ;;  %v7905_v10 = vcombine.high %v541_v5, %v545_v6  ;;  %v804_v11 = vld [vmem:[#allocation8 + $0xa80] sm:$0xff]  ;;  %v585_v61 = vld [vmem:[#allocation8 + $0x3a8] sm:$0xff] }
 0x169   :  { %v8166_v30 = vcombine.low %v804_v11, %v808_v12  ;;  %v7945_v4 = vcombine.high %v581_v60, %v585_v61 }
 0x16b   :  { %3671 = vmatpush1.bf16.msra.mxu0 %v8110_v16  ;;  %3753 = vmatpush1.bf16.msra.mxu1 %v7856_v17  ;;  %v7904_v16 = vcombine.low %v541_v5, %v545_v6  ;;  %v8167_v17 = vcombine.high %v804_v11, %v808_v12  ;;  %v844_v5 = vld [vmem:[#allocation8 + $0xbc0] sm:$0xff]  ;;  %v8198_v11 = vcombine.low %v836_v58, %v840_v59  ;;  %v621_v59 = vld [vmem:[#allocation8 + $0x4c8] sm:$0xff] }
 0x16c   :  { %3672 = vmatprep.subr.bf16.mxu0 %v8119_v18  ;;  %3754 = vmatprep.subr.bf16.mxu1 %v7865_v25  ;;  %v7913_v18 = vcombine.high %v549_v13, %v553_v14  ;;  %v812_v25 = vld [vmem:[#allocation8 + $0xac0] sm:$0xff]  ;;  %v7944_v12 = vcombine.low %v581_v60, %v585_v61  ;;  %v625_v60 = vld [vmem:[#allocation8 + $0x4e8] sm:$0xff] }
 0x16d   :  { %v8174_v38 = vcombine.low %v812_v25, %v816_v26  ;;  %v848_v6 = vld [vmem:[#allocation8 + $0xbe0] sm:$0xff] }
 0x16e   :  { %v880_v58 = vld [vmem:[#allocation8 + $0xce0] sm:$0xff] }
 0x16f   :  { %3673 = vmatpush1.bf16.msra.mxu0 %v8118_v31  ;;  %3755 = vmatpush1.bf16.msra.mxu1 %v7864_v32  ;;  %v7912_v31 = vcombine.low %v549_v13, %v553_v14  ;;  %v8175_v32 = vcombine.high %v812_v25, %v816_v26  ;;  %v8207_v13 = vcombine.high %v844_v5, %v848_v6 }
 0x170   :  { %3674 = vmatprep.subr.bf16.mxu0 %v8127_v33  ;;  %3756 = vmatprep.subr.bf16.mxu1 %v7873_v34  ;;  %v7921_v33 = vcombine.high %v557_v27, %v561_v28  ;;  %v820_v34 = vld [vmem:[#allocation8 + $0xb00] sm:$0xff] }
 0x173   :  { %3675 = vmatpush1.bf16.msra.mxu0 %v8126_v39  ;;  %3757 = vmatpush1.bf16.msra.mxu1 %v7872_v40  ;;  %v7920_v39 = vcombine.low %v557_v27, %v561_v28  ;;  %v8183_v40 = vcombine.high %v820_v34, %v824_v35  ;;  %v8206_v27 = vcombine.low %v844_v5, %v848_v6  ;;  %v629_v5 = vld [vmem:[#allocation8 + $0x508] sm:$0xff] }
 0x174   :  { %3676 = vmatprep.subr.bf16.mxu0 %v8135_v41  ;;  %3758 = vmatprep.subr.bf16.mxu1 %v7881_v42  ;;  %v7929_v41 = vcombine.high %v565_v36, %v569_v37  ;;  %v828_v42 = vld [vmem:[#allocation8 + $0xb40] sm:$0xff]  ;;  %v633_v6 = vld [vmem:[#allocation8 + $0x528] sm:$0xff] }
 0x177   :  { %3677 = vmatpush1.bf16.msra.mxu0 %v8134_v50  ;;  %3759 = vmatpush1.bf16.msra.mxu1 %v7880_v54  ;;  %v8182_v50 = vcombine.low %v820_v34, %v824_v35  ;;  %v7928_v54 = vcombine.low %v565_v36, %v569_v37  ;;  %v605_v35 = vld [vmem:[#allocation8 + $0x448] sm:$0xff] }
 0x178   :  { %3678 = vmatprep.subr.bf16.mxu0 %v8143_v56  ;;  %3760 = vmatprep.subr.bf16.mxu1 %v7889_v57  ;;  %v8191_v56 = vcombine.high %v828_v42, %v832_v43  ;;  %v7937_v57 = vcombine.high %v573_v44, %v577_v45  ;;  %v609_v36 = vld [vmem:[#allocation8 + $0x468] sm:$0xff] }
 0x17b   :  { %3679 = vmatpush1.bf16.msra.mxu0 %v8142_v62  ;;  %3761 = vmatpush1.bf16.msra.mxu1 %v7888_v63  ;;  %v154_v62 = vsub.s32 7, %v9997_v19  ;;  %v143_v63 = vrot.slane %v10005_v22, %v10049_v46 }
 0x17c   :  { %3680 = vmatprep.subr.bf16.mxu0 %v8151_v0  ;;  %3762 = vmatprep.subr.bf16.mxu1 %v7897_v2  ;;  %v8190_v0 = vcombine.low %v828_v42, %v832_v43  ;;  %v7936_v2 = vcombine.low %v573_v44, %v577_v45  ;;  %v613_v42 = vld [vmem:[#allocation8 + $0x488] sm:$0xff] }
 0x17d   :  { %v617_v43 = vld [vmem:[#allocation8 + $0x4a8] sm:$0xff] }
 0x17f   :  { %3681 = vmatpush1.bf16.msra.mxu0 %v8150_v7  ;;  %3763 = vmatpush1.bf16.msra.mxu1 %v7896_v8  ;;  %v589_v7 = vld [vmem:[#allocation8 + $0x3c8] sm:$0xff] }
 0x180   :  { %3682 = vmatprep.subr.bf16.mxu0 %v8159_v9  ;;  %3764 = vmatprep.subr.bf16.mxu1 %v7905_v10  ;;  %v593_v8 = vld [vmem:[#allocation8 + $0x3e8] sm:$0xff]  ;;  %v155_v9 = vrot.slane %v10005_v22, %v154_v62  ;;  %v377_v10 = vadd.f32 %v10026_v47, %v143_v63  ;;  %v7976_v63 = vcombine.low %v613_v42, %v617_v43 }
 0x181   :  { %v7953_v14 = vcombine.high %v589_v7, %v593_v8  ;;  %v7952_v28 = vcombine.low %v589_v7, %v593_v8  ;;  %v7984_v8 = vcombine.low %v621_v59, %v625_v60 }
 0x182   :  { %v450_v25 = vadd.f32 %v10032_v51, %v155_v9  ;;  %v456_v26 = vmax.f32 %v377_v10, 0.0  ;;  %v7993_v10 = vcombine.high %v629_v5, %v633_v6 }
 0x183   :  { %3683 = vmatpush1.bf16.msra.mxu0 %v8158_v15  ;;  %3765 = vmatpush1.bf16.msra.mxu1 %v7904_v16  ;;  %v852_v15 = vld [vmem:[#allocation8 + $0xc00] sm:$0xff] }
 0x184   :  { %3684 = vmatprep.subr.bf16.mxu0 %v8167_v17  ;;  %3766 = vmatprep.subr.bf16.mxu1 %v7913_v18  ;;  %v856_v16 = vld [vmem:[#allocation8 + $0xc20] sm:$0xff]  ;;  %v597_v17 = vld [vmem:[#allocation8 + $0x408] sm:$0xff]  ;;  %v10059_v34 = vpack.c.bf16 %v456_v26, %v456_v26 }
 0x185   :  { %v601_v18 = vld [vmem:[#allocation8 + $0x428] sm:$0xff]  ;;  %v8215_v47 = vcombine.high %v852_v15, %v856_v16  ;;  %v8214_v37 = vcombine.low %v852_v15, %v856_v16  ;;  %v7992_v16 = vcombine.low %v629_v5, %v633_v6  ;;  %v904_v26 = vld [vmem:[#allocation8 + $0xda0] sm:$0xff] }
 0x186   :  { %v7960_v51 = vcombine.low %v597_v17, %v601_v18  ;;  %v936_v5 = vld [vmem:[#allocation8 + $0xea0] sm:$0xff]  ;;  %v677_v6 = vld [vmem:[#allocation8 + $0x688] sm:$0xff] }
 0x187   :  { %3685 = vmatpush1.bf16.msra.mxu0 %v8166_v30  ;;  %3767 = vmatpush1.bf16.msra.mxu1 %v7912_v31  ;;  %v7961_v30 = vcombine.high %v597_v17, %v601_v18  ;;  %v860_v31 = vld [vmem:[#allocation8 + $0xc40] sm:$0xff] }
 0x188   :  { %3686 = vmatprep.subr.bf16.mxu0 %v8175_v32  ;;  %3768 = vmatprep.subr.bf16.mxu1 %v7921_v33  ;;  %v864_v32 = vld [vmem:[#allocation8 + $0xc60] sm:$0xff]  ;;  %v459_v33 = vmax.f32 %v450_v25, 0.0 }
 0x189   :  { %v8222_v45 = vcombine.low %v860_v31, %v864_v32  ;;  %v900_v25 = vld [vmem:[#allocation8 + $0xd80] sm:$0xff] }
 0x18a   :  { %v10061_v44 = vpack.c.bf16 %v459_v33, %v459_v33  ;;  %v908_v33 = vld [vmem:[#allocation8 + $0xdc0] sm:$0xff] }
 0x18b   :  { %3687 = vmatpush1.bf16.msra.mxu0 %v8174_v38  ;;  %3769 = vmatpush1.bf16.msra.mxu1 %v7920_v39  ;;  %v8223_v38 = vcombine.high %v860_v31, %v864_v32  ;;  %v868_v39 = vld [vmem:[#allocation8 + $0xc80] sm:$0xff]  ;;  %v8263_v31 = vcombine.high %v900_v25, %v904_v26 }
 0x18c   :  { %3688 = vmatprep.subr.bf16.mxu0 %v8183_v40  ;;  %3770 = vmatprep.subr.bf16.mxu1 %v7929_v41  ;;  %v7969_v40 = vcombine.high %v605_v35, %v609_v36  ;;  %v872_v41 = vld [vmem:[#allocation8 + $0xca0] sm:$0xff] }
 0x18d   :  { %v8230_v61 = vcombine.low %v868_v39, %v872_v41 }
 0x18f   :  { %3689 = vmatpush1.bf16.msra.mxu0 %v8182_v50  ;;  %3771 = vmatpush1.bf16.msra.mxu1 %v7928_v54  ;;  %v7968_v50 = vcombine.low %v605_v35, %v609_v36  ;;  %v8231_v54 = vcombine.high %v868_v39, %v872_v41  ;;  %v912_v35 = vld [vmem:[#allocation8 + $0xde0] sm:$0xff]  ;;  %v653_v36 = vld [vmem:[#allocation8 + $0x5c8] sm:$0xff] }
 0x190   :  { %3690 = vmatprep.subr.bf16.mxu0 %v8191_v56  ;;  %3772 = vmatprep.subr.bf16.mxu1 %v7937_v57  ;;  %v7977_v56 = vcombine.high %v613_v42, %v617_v43  ;;  %v876_v57 = vld [vmem:[#allocation8 + $0xcc0] sm:$0xff]  ;;  %v8271_v39 = vcombine.high %v908_v33, %v912_v35  ;;  %v661_v43 = vld [vmem:[#allocation8 + $0x608] sm:$0xff] }
 0x191   :  { %v8238_v7 = vcombine.low %v876_v57, %v880_v58  ;;  %v916_v41 = vld [vmem:[#allocation8 + $0xe00] sm:$0xff] }
 0x192   :  { %v920_v42 = vld [vmem:[#allocation8 + $0xe20] sm:$0xff] }
 0x193   :  { %3691 = vmatpush1.bf16.msra.mxu0 %v8190_v0  ;;  %3773 = vmatpush1.bf16.msra.mxu1 %v7936_v2  ;;  %v8239_v0 = vcombine.high %v876_v57, %v880_v58  ;;  %v7985_v2 = vcombine.high %v621_v59, %v625_v60  ;;  %v924_v58 = vld [vmem:[#allocation8 + $0xe40] sm:$0xff]  ;;  %v669_v60 = vld [vmem:[#allocation8 + $0x648] sm:$0xff] }
 0x194   :  { %3692 = vmatprep.subr.bf16.mxu0 %v8199_v3  ;;  %3774 = vmatprep.subr.bf16.mxu1 %v7945_v4  ;;  %v884_v3 = vld [vmem:[#allocation8 + $0xd00] sm:$0xff] }
 0x195   :  { %v888_v4 = vld [vmem:[#allocation8 + $0xd20] sm:$0xff] }
 0x196   :  { %v8247_v9 = vcombine.high %v884_v3, %v888_v4  ;;  %v8246_v15 = vcombine.low %v884_v3, %v888_v4  ;;  %v928_v59 = vld [vmem:[#allocation8 + $0xe60] sm:$0xff] }
 0x197   :  { %3693 = vmatpush1.bf16.msra.mxu0 %v8198_v11  ;;  %3775 = vmatpush1.bf16.msra.mxu1 %v7944_v12  ;;  %v892_v11 = vld [vmem:[#allocation8 + $0xd40] sm:$0xff] }
 0x198   :  { %3694 = vmatprep.subr.bf16.mxu0 %v8207_v13  ;;  %3776 = vmatprep.subr.bf16.mxu1 %v7953_v14  ;;  %v896_v12 = vld [vmem:[#allocation8 + $0xd60] sm:$0xff]  ;;  %v637_v13 = vld [vmem:[#allocation8 + $0x548] sm:$0xff] }
 0x199   :  { %v641_v14 = vld [vmem:[#allocation8 + $0x568] sm:$0xff]  ;;  %v8255_v17 = vcombine.high %v892_v11, %v896_v12  ;;  %v932_v4 = vld [vmem:[#allocation8 + $0xe80] sm:$0xff] }
 0x19a   :  { %v8001_v18 = vcombine.high %v637_v13, %v641_v14 }
 0x19b   :  { %3695 = vmatpush1.bf16.msra.mxu0 %v8206_v27  ;;  %3777 = vmatpush1.bf16.msra.mxu1 %v7952_v28  ;;  %v645_v27 = vld [vmem:[#allocation8 + $0x588] sm:$0xff] }
 0x19c   :  { %3705 = vmatprep.subr.bf16.mxu0 %v8215_v47  ;;  %3787 = vmatprep.subr.bf16.mxu1 %v7961_v30  ;;  %v649_v28 = vld [vmem:[#allocation8 + $0x5a8] sm:$0xff]  ;;  %v8254_v47 = vcombine.low %v892_v11, %v896_v12  ;;  %v8000_v30 = vcombine.low %v637_v13, %v641_v14  ;;  %v940_v12 = vld [vmem:[#allocation8 + $0xec0] sm:$0xff] }
 0x19d   :  { %v8009_v32 = vcombine.high %v645_v27, %v649_v28  ;;  %v944_v13 = vld [vmem:[#allocation8 + $0xee0] sm:$0xff]  ;;  %v685_v14 = vld [vmem:[#allocation8 + $0x6c8] sm:$0xff] }
 0x19e   :  { %3779 = vmatmul.mubr.bf16.vlgmr.msra.gmra.mrb[8].mxu1 %v10038_v55  ;;  %3697 = vmatmul.mubr.bf16.vlgmr.msra.gmra.mrb[4].mxu0 %v10059_v34 }
 0x19f   :  { %3706 = vmatpush1.bf16.msra.mxu0 %v8214_v37  ;;  %3788 = vmatpush1.bf16.msra.mxu1 %v7960_v51  ;;  %v657_v37 = vld [vmem:[#allocation8 + $0x5e8] sm:$0xff]  ;;  %v8262_v51 = vcombine.low %v900_v25, %v904_v26  ;;  %v948_v26 = vld [vmem:[#allocation8 + $0xf00] sm:$0xff] }
 0x1a0   :  { %3819 = vmatprep.mubr.bf16.mxu1 %v10036_v53  ;;  %3707 = vmatprep.subr.bf16.mxu0 %v8223_v38  ;;  %v8008_v38 = vcombine.low %v645_v27, %v649_v28  ;;  %v952_v27 = vld [vmem:[#allocation8 + $0xf20] sm:$0xff]  ;;  %v693_v28 = vld [vmem:[#allocation8 + $0x708] sm:$0xff] }
 0x1a1   :  { %3789 = vmatprep.subr.bf16.mxu1 %v7969_v40  ;;  %3737 = vmatprep.mubr.bf16.mxu0 %v10061_v44  ;;  %v8017_v40 = vcombine.high %v653_v36, %v657_v37 }
 0x1a3   :  { %3708 = vmatpush1.bf16.msra.mxu0 %v8222_v45  ;;  %3790 = vmatpush1.bf16.msra.mxu1 %v7968_v50  ;;  %v665_v45 = vld [vmem:[#allocation8 + $0x628] sm:$0xff]  ;;  %v8270_v50 = vcombine.low %v908_v33, %v912_v35  ;;  %v956_v35 = vld [vmem:[#allocation8 + $0xf40] sm:$0xff] }
 0x1a4   :  { %3709 = vmatprep.subr.bf16.mxu0 %v8231_v54  ;;  %3791 = vmatprep.subr.bf16.mxu1 %v7977_v56  ;;  %v8016_v54 = vcombine.low %v653_v36, %v657_v37  ;;  %v8279_v56 = vcombine.high %v916_v41, %v920_v42  ;;  %v8025_v57 = vcombine.high %v661_v43, %v665_v45  ;;  %v960_v36 = vld [vmem:[#allocation8 + $0xf60] sm:$0xff]  ;;  %v701_v37 = vld [vmem:[#allocation8 + $0x748] sm:$0xff] }
 0x1a7   :  { %3710 = vmatpush1.bf16.msra.mxu0 %v8230_v61  ;;  %3792 = vmatpush1.bf16.msra.mxu1 %v7976_v63  ;;  %v673_v61 = vld [vmem:[#allocation8 + $0x668] sm:$0xff]  ;;  %v8278_v63 = vcombine.low %v916_v41, %v920_v42  ;;  %v8319_v41 = vcombine.high %v956_v35, %v960_v36 }
 0x1a8   :  { %3711 = vmatprep.subr.bf16.mxu0 %v8239_v0  ;;  %3793 = vmatprep.subr.bf16.mxu1 %v7985_v2  ;;  %v8024_v0 = vcombine.low %v661_v43, %v665_v45  ;;  %v8287_v2 = vcombine.high %v924_v58, %v928_v59  ;;  %v8033_v3 = vcombine.high %v669_v60, %v673_v61  ;;  %v964_v43 = vld [vmem:[#allocation8 + $0xf80] sm:$0xff] }
 0x1a9   :  { %v968_v45 = vld [vmem:[#allocation8 + $0xfa0] sm:$0xff] }
 0x1ab   :  { %3712 = vmatpush1.bf16.msra.mxu0 %v8238_v7  ;;  %3794 = vmatpush1.bf16.msra.mxu1 %v7984_v8  ;;  %v681_v7 = vld [vmem:[#allocation8 + $0x6a8] sm:$0xff]  ;;  %v8286_v8 = vcombine.low %v924_v58, %v928_v59  ;;  %v8327_v59 = vcombine.high %v964_v43, %v968_v45 }
 0x1ac   :  { %3713 = vmatprep.subr.bf16.mxu0 %v8247_v9  ;;  %3795 = vmatprep.subr.bf16.mxu1 %v7993_v10  ;;  %v8032_v9 = vcombine.low %v669_v60, %v673_v61  ;;  %v8295_v10 = vcombine.high %v932_v4, %v936_v5  ;;  %v8041_v11 = vcombine.high %v677_v6, %v681_v7  ;;  %v972_v61 = vld [vmem:[#allocation8 + $0xfc0] sm:$0xff] }
 0x1af   :  { %3714 = vmatpush1.bf16.msra.mxu0 %v8246_v15  ;;  %3796 = vmatpush1.bf16.msra.mxu1 %v7992_v16  ;;  %v689_v15 = vld [vmem:[#allocation8 + $0x6e8] sm:$0xff]  ;;  %v8294_v16 = vcombine.low %v932_v4, %v936_v5  ;;  %v8326_v4 = vcombine.low %v964_v43, %v968_v45 }
 0x1b0   :  { %3715 = vmatprep.subr.bf16.mxu0 %v8255_v17  ;;  %3797 = vmatprep.subr.bf16.mxu1 %v8001_v18  ;;  %v8040_v17 = vcombine.low %v677_v6, %v681_v7  ;;  %v8303_v18 = vcombine.high %v940_v12, %v944_v13  ;;  %v8049_v25 = vcombine.high %v685_v14, %v689_v15  ;;  %v725_v7 = vld [vmem:[#allocation8 + $0x808] sm:$0xff] }
 0x1b3   :  { %3716 = vmatpush1.bf16.msra.mxu0 %v8254_v47  ;;  %3798 = vmatpush1.bf16.msra.mxu1 %v8000_v30  ;;  %v697_v47 = vld [vmem:[#allocation8 + $0x728] sm:$0xff]  ;;  %v8302_v30 = vcombine.low %v940_v12, %v944_v13 }
 0x1b4   :  { %3717 = vmatprep.subr.bf16.mxu0 %v8263_v31  ;;  %3799 = vmatprep.subr.bf16.mxu1 %v8009_v32  ;;  %v8048_v31 = vcombine.low %v685_v14, %v689_v15  ;;  %v8311_v32 = vcombine.high %v948_v26, %v952_v27  ;;  %v8057_v33 = vcombine.high %v693_v28, %v697_v47  ;;  %v733_v15 = vld [vmem:[#allocation8 + $0x848] sm:$0xff] }
 0x1b7   :  { %3718 = vmatpush1.bf16.msra.mxu0 %v8262_v51  ;;  %3800 = vmatpush1.bf16.msra.mxu1 %v8008_v38  ;;  %v705_v51 = vld [vmem:[#allocation8 + $0x768] sm:$0xff]  ;;  %v10068_v38 = vsub.s32 6, %v9997_v19  ;;  %v9351_v19 = vld [vmem:[#allocation11 + $0x10] ss:$28 sps:$4 sm:$0xff]  }
 0x1b8   :  { %3719 = vmatprep.subr.bf16.mxu0 %v8271_v39  ;;  %3801 = vmatprep.subr.bf16.mxu1 %v8017_v40  ;;  %v8310_v39 = vcombine.low %v948_v26, %v952_v27  ;;  %v8056_v40 = vcombine.low %v693_v28, %v697_v47  ;;  %v8065_v42 = vcombine.high %v701_v37, %v705_v51 }
 0x1b9   :  { %v8064_v58 = vcombine.low %v701_v37, %v705_v51 }
 0x1bb   :  { %3720 = vmatpush1.bf16.msra.mxu0 %v8270_v50  ;;  %3802 = vmatpush1.bf16.msra.mxu1 %v8016_v54  ;;  %v709_v50 = vld [vmem:[#allocation8 + $0x788] sm:$0xff] }
 0x1bc   :  { %3721 = vmatprep.subr.bf16.mxu0 %v8279_v56  ;;  %3803 = vmatprep.subr.bf16.mxu1 %v8025_v57  ;;  %v713_v54 = vld [vmem:[#allocation8 + $0x7a8] sm:$0xff]  ;;  %v151_v56 = vrot.slane %v10005_v22, %v10068_v38  ;;  %v8318_v57 = vcombine.low %v956_v35, %v960_v36 }
 0x1bd   :  { %v8073_v60 = vcombine.high %v709_v50, %v713_v54  ;;  %v8072_v5 = vcombine.low %v709_v50, %v713_v54 }
 0x1bf   :  { %3722 = vmatpush1.bf16.msra.mxu0 %v8278_v63  ;;  %3804 = vmatpush1.bf16.msra.mxu1 %v8024_v0  ;;  %v976_v63 = vld [vmem:[#allocation8 + $0xfe0] sm:$0xff]  ;;  %v717_v0 = vld [vmem:[#allocation8 + $0x7c8] sm:$0xff] }
 0x1c0   :  { %3723 = vmatprep.subr.bf16.mxu0 %v8287_v2  ;;  %3805 = vmatprep.subr.bf16.mxu1 %v8033_v3  ;;  %v721_v2 = vld [vmem:[#allocation8 + $0x7e8] sm:$0xff]  ;;  %v448_v3 = vadd.f32 %v10028_v48, %v151_v56  ;;  %v8335_v22 = vcombine.high %v972_v61, %v976_v63  ;;  %v8334_v12 = vcombine.low %v972_v61, %v976_v63 }
 0x1c1   :  { %v8081_v6 = vcombine.high %v717_v0, %v721_v2  ;;  %v8080_v13 = vcombine.low %v717_v0, %v721_v2  ;;  %v757_v56 = vld [vmem:[#allocation8 + $0x908] sm:$0xff] }
 0x1c2   :  { %v765_v2 = vld [vmem:[#allocation8 + $0x948] sm:$0xff] }
 0x1c3   :  { %3724 = vmatpush1.bf16.msra.mxu0 %v8286_v8  ;;  %3806 = vmatpush1.bf16.msra.mxu1 %v8032_v9  ;;  %v729_v8 = vld [vmem:[#allocation8 + $0x828] sm:$0xff]  ;;  %v470_v9 = vld [vmem:[#allocation8 + $0x10] sm:$0xff] }
 0x1c4   :  { %3725 = vmatprep.subr.bf16.mxu0 %v8295_v10  ;;  %3807 = vmatprep.subr.bf16.mxu1 %v8041_v11  ;;  %v474_v10 = vld [vmem:[#allocation8 + $0x30] sm:$0xff]  ;;  %v458_v11 = vmax.f32 %v448_v3, 0.0  ;;  %v8089_v48 = vcombine.high %v725_v7, %v729_v8  ;;  %v8088_v26 = vcombine.low %v725_v7, %v729_v8  ;;  %v769_v3 = vld [vmem:[#allocation8 + $0x968] sm:$0xff] }
 0x1c5   :  { %v7835_v14 = vcombine.high %v470_v9, %v474_v10  ;;  %v7834_v27 = vcombine.low %v470_v9, %v474_v10  ;;  %v8129_v7 = vcombine.high %v765_v2, %v769_v3  ;;  %v773_v9 = vld [vmem:[#allocation8 + $0x988] sm:$0xff] }
 0x1c6   :  { %v777_v10 = vld [vmem:[#allocation8 + $0x9a8] sm:$0xff] }
 0x1c7   :  { %3726 = vmatpush1.bf16.msra.mxu0 %v8294_v16  ;;  %3808 = vmatpush1.bf16.msra.mxu1 %v8040_v17  ;;  %v10073_v16 = vpack.c.bf16 %v458_v11, %v458_v11  ;;  %v737_v17 = vld [vmem:[#allocation8 + $0x868] sm:$0xff]  ;;  %v518_v11 = vld [vmem:[#allocation8 + $0x190] sm:$0xff] }
 0x1c8   :  { %3727 = vmatprep.subr.bf16.mxu0 %v8303_v18  ;;  %3809 = vmatprep.subr.bf16.mxu1 %v8049_v25  ;;  %v478_v18 = vld [vmem:[#allocation8 + $0x50] sm:$0xff]  ;;  %v8097_v28 = vcombine.high %v733_v15, %v737_v17  ;;  %v8096_v35 = vcombine.low %v733_v15, %v737_v17  ;;  %v781_v17 = vld [vmem:[#allocation8 + $0x9c8] sm:$0xff] }
 0x1c9   :  { %v482_v25 = vld [vmem:[#allocation8 + $0x70] sm:$0xff] }
 0x1ca   :  { %v7843_v47 = vcombine.high %v478_v18, %v482_v25  ;;  %v7842_v36 = vcombine.low %v478_v18, %v482_v25  ;;  %v785_v18 = vld [vmem:[#allocation8 + $0x9e8] sm:$0xff]  ;;  %v526_v25 = vld [vmem:[#allocation8 + $0x1d0] sm:$0xff] }
 0x1cb   :  { %3728 = vmatpush1.bf16.msra.mxu0 %v8302_v30  ;;  %3810 = vmatpush1.bf16.msra.mxu1 %v8048_v31  ;;  %v741_v30 = vld [vmem:[#allocation8 + $0x888] sm:$0xff] }
 0x1cc   :  { %3729 = vmatprep.subr.bf16.mxu0 %v8311_v32  ;;  %3811 = vmatprep.subr.bf16.mxu1 %v8057_v33  ;;  %v745_v31 = vld [vmem:[#allocation8 + $0x8a8] sm:$0xff]  ;;  %v486_v32 = vld [vmem:[#allocation8 + $0x90] sm:$0xff] }
 0x1cd   :  { %v490_v33 = vld [vmem:[#allocation8 + $0xb0] sm:$0xff]  ;;  %v8105_v37 = vcombine.high %v741_v30, %v745_v31  ;;  %v8104_v43 = vcombine.low %v741_v30, %v745_v31  ;;  %v789_v31 = vld [vmem:[#allocation8 + $0xa08] sm:$0xff] }
 0x1ce   :  { %v7851_v51 = vcombine.high %v486_v32, %v490_v33  ;;  %v7850_v45 = vcombine.low %v486_v32, %v490_v33  ;;  %v793_v32 = vld [vmem:[#allocation8 + $0xa28] sm:$0xff]  ;;  %v534_v33 = vld [vmem:[#allocation8 + $0x210] sm:$0xff] }
 0x1cf   :  { %3730 = vmatpush1.bf16.msra.mxu0 %v8310_v39  ;;  %3812 = vmatpush1.bf16.msra.mxu1 %v8056_v40  ;;  %v749_v39 = vld [vmem:[#allocation8 + $0x8c8] sm:$0xff] }
 0x1d0   :  { %3731 = vmatprep.subr.bf16.mxu0 %v8319_v41  ;;  %3813 = vmatprep.subr.bf16.mxu1 %v8065_v42  ;;  %v753_v40 = vld [vmem:[#allocation8 + $0x8e8] sm:$0xff]  ;;  %v494_v41 = vld [vmem:[#allocation8 + $0xd0] sm:$0xff] }
 0x1d1   :  { %v498_v42 = vld [vmem:[#allocation8 + $0xf0] sm:$0xff]  ;;  %v8113_v50 = vcombine.high %v749_v39, %v753_v40 }
 0x1d2   :  { %v7859_v54 = vcombine.high %v494_v41, %v498_v42  ;;  %v7858_v61 = vcombine.low %v494_v41, %v498_v42  ;;  %v801_v41 = vld [vmem:[#allocation8 + $0xa68] sm:$0xff]  ;;  %v542_v42 = vld [vmem:[#allocation8 + $0x250] sm:$0xff] }
 0x1d3   :  { %3732 = vmatpush1.bf16.msra.mxu0 %v8318_v57  ;;  %3814 = vmatpush1.bf16.msra.mxu1 %v8064_v58  ;;  %v761_v57 = vld [vmem:[#allocation8 + $0x928] sm:$0xff]  ;;  %v502_v58 = vld [vmem:[#allocation8 + $0x110] sm:$0xff] }
 0x1d4   :  { %3733 = vmatprep.subr.bf16.mxu0 %v8327_v59  ;;  %3815 = vmatprep.subr.bf16.mxu1 %v8073_v60  ;;  %v506_v59 = vld [vmem:[#allocation8 + $0x130] sm:$0xff]  ;;  %v8112_v60 = vcombine.low %v749_v39, %v753_v40  ;;  %v8121_v63 = vcombine.high %v757_v56, %v761_v57  ;;  %v797_v40 = vld [vmem:[#allocation8 + $0xa48] sm:$0xff] }
 0x1d5   :  { %v7867_v0 = vcombine.high %v502_v58, %v506_v59 }
 0x1d7   :  { %3734 = vmatpush1.bf16.msra.mxu0 %v8326_v4  ;;  %3816 = vmatpush1.bf16.msra.mxu1 %v8072_v5  ;;  %v510_v4 = vld [vmem:[#allocation8 + $0x150] sm:$0xff] }
 0x1d8   :  { %3735 = vmatprep.subr.bf16.mxu0 %v8335_v22  ;;  %3817 = vmatprep.subr.bf16.mxu1 %v8081_v6  ;;  %v514_v5 = vld [vmem:[#allocation8 + $0x170] sm:$0xff]  ;;  %v8120_v22 = vcombine.low %v757_v56, %v761_v57  ;;  %v7866_v6 = vcombine.low %v502_v58, %v506_v59  ;;  %v805_v57 = vld [vmem:[#allocation8 + $0xa88] sm:$0xff] }
 0x1d9   :  { %v7875_v8 = vcombine.high %v510_v4, %v514_v5  ;;  %v809_v58 = vld [vmem:[#allocation8 + $0xaa8] sm:$0xff]  ;;  %v550_v59 = vld [vmem:[#allocation8 + $0x290] sm:$0xff] }
 0x1db   :  { %3736 = vmatpush1.bf16.msra.mxu0 %v8334_v12  ;;  %3818 = vmatpush1.bf16.msra.mxu1 %v8080_v13  ;;  %v522_v12 = vld [vmem:[#allocation8 + $0x1b0] sm:$0xff]  ;;  %v8128_v13 = vcombine.low %v765_v2, %v769_v3  ;;  %v813_v3 = vld [vmem:[#allocation8 + $0xac8] sm:$0xff] }
 0x1dc   :  { %3828 = vmatprep.subr.bf16.mxu1 %v8089_v48  ;;  %3910 = vmatprep.subr.bf16.mxu0 %v7835_v14  ;;  %v7874_v48 = vcombine.low %v510_v4, %v514_v5  ;;  %v8137_v14 = vcombine.high %v773_v9, %v777_v10  ;;  %v7883_v15 = vcombine.high %v518_v11, %v522_v12  ;;  %v817_v4 = vld [vmem:[#allocation8 + $0xae8] sm:$0xff]  ;;  %v558_v5 = vld [vmem:[#allocation8 + $0x2d0] sm:$0xff] }
 0x1de   :  { %3738 = vmatmul.mubr.bf16.vlgmr.msra.gmra.mrb[4].mxu0 %v10073_v16  ;;  %3820 = vmatmul.mubr.bf16.vlgmr.msra.gmra.mrb[8].mxu1 %v10030_v49 }
 0x1df   :  { %3829 = vmatpush1.bf16.msra.mxu1 %v8088_v26  ;;  %3860 = vmatprep.mubr.bf16.mxu1 %v10044_v1  ;;  %v530_v26 = vld [vmem:[#allocation8 + $0x1f0] sm:$0xff] }
 0x1e0   :  { %3911 = vmatpush1.bf16.msra.mxu0 %v7834_v27  ;;  %3942 = vmatprep.mubr.bf16.mxu0 %v10034_v52  ;;  %v8136_v27 = vcombine.low %v773_v9, %v777_v10  ;;  %v7891_v30 = vcombine.high %v526_v25, %v530_v26  ;;  %v821_v10 = vld [vmem:[#allocation8 + $0xb08] sm:$0xff] }
 0x1e1   :  { %3830 = vmatprep.subr.bf16.mxu1 %v8097_v28  ;;  %3912 = vmatprep.subr.bf16.mxu0 %v7843_v47  ;;  %v7882_v28 = vcombine.low %v518_v11, %v522_v12  ;;  %v8145_v47 = vcombine.high %v781_v17, %v785_v18  ;;  %v825_v11 = vld [vmem:[#allocation8 + $0xb28] sm:$0xff]  ;;  %v566_v12 = vld [vmem:[#allocation8 + $0x310] sm:$0xff] }
 0x1e3   :  { %3831 = vmatpush1.bf16.msra.mxu1 %v8096_v35  ;;  %v538_v35 = vld [vmem:[#allocation8 + $0x230] sm:$0xff] }
 0x1e4   :  { %3913 = vmatpush1.bf16.msra.mxu0 %v7842_v36  ;;  %3832 = vmatprep.subr.bf16.mxu1 %v8105_v37  ;;  %v8144_v36 = vcombine.low %v781_v17, %v785_v18  ;;  %v7890_v37 = vcombine.low %v526_v25, %v530_v26  ;;  %v7899_v39 = vcombine.high %v534_v33, %v538_v35  ;;  %v829_v18 = vld [vmem:[#allocation8 + $0xb48] sm:$0xff]  ;;  %v574_v26 = vld [vmem:[#allocation8 + $0x350] sm:$0xff] }
 0x1e5   :  { %3914 = vmatprep.subr.bf16.mxu0 %v7851_v51  ;;  %v8153_v51 = vcombine.high %v789_v31, %v793_v32  ;;  %v833_v25 = vld [vmem:[#allocation8 + $0xb68] sm:$0xff] }
 0x1e7   :  { %3833 = vmatpush1.bf16.msra.mxu1 %v8104_v43  ;;  %v546_v43 = vld [vmem:[#allocation8 + $0x270] sm:$0xff] }
 0x1e8   :  { %3915 = vmatpush1.bf16.msra.mxu0 %v7850_v45  ;;  %3834 = vmatprep.subr.bf16.mxu1 %v8113_v50  ;;  %v8152_v45 = vcombine.low %v789_v31, %v793_v32  ;;  %v7898_v50 = vcombine.low %v534_v33, %v538_v35  ;;  %v7907_v56 = vcombine.high %v542_v42, %v546_v43  ;;  %v837_v32 = vld [vmem:[#allocation8 + $0xb88] sm:$0xff]  ;;  %v582_v35 = vld [vmem:[#allocation8 + $0x390] sm:$0xff] }
 0x1e9   :  { %3916 = vmatprep.subr.bf16.mxu0 %v7859_v54  ;;  %v8161_v54 = vcombine.high %v797_v40, %v801_v41  ;;  %v841_v33 = vld [vmem:[#allocation8 + $0xba8] sm:$0xff] }
 0x1eb   :  { %3835 = vmatpush1.bf16.msra.mxu1 %v8112_v60  ;;  %v554_v60 = vld [vmem:[#allocation8 + $0x2b0] sm:$0xff] }
 0x1ec   :  { %3917 = vmatpush1.bf16.msra.mxu0 %v7858_v61  ;;  %3836 = vmatprep.subr.bf16.mxu1 %v8121_v63  ;;  %v8160_v61 = vcombine.low %v797_v40, %v801_v41  ;;  %v7906_v63 = vcombine.low %v542_v42, %v546_v43  ;;  %v7915_v2 = vcombine.high %v550_v59, %v554_v60  ;;  %v845_v41 = vld [vmem:[#allocation8 + $0xbc8] sm:$0xff]  ;;  %v590_v43 = vld [vmem:[#allocation8 + $0x3d0] sm:$0xff] }
 0x1ed   :  { %3918 = vmatprep.subr.bf16.mxu0 %v7867_v0  ;;  %v8169_v0 = vcombine.high %v805_v57, %v809_v58  ;;  %v849_v42 = vld [vmem:[#allocation8 + $0xbe8] sm:$0xff] }
 0x1ef   :  { %3837 = vmatpush1.bf16.msra.mxu1 %v8120_v22  ;;  %v562_v22 = vld [vmem:[#allocation8 + $0x2f0] sm:$0xff] }
 0x1f0   :  { %3919 = vmatpush1.bf16.msra.mxu0 %v7866_v6  ;;  %3838 = vmatprep.subr.bf16.mxu1 %v8129_v7  ;;  %v8168_v6 = vcombine.low %v805_v57, %v809_v58  ;;  %v7914_v7 = vcombine.low %v550_v59, %v554_v60  ;;  %v7923_v9 = vcombine.high %v558_v5, %v562_v22  ;;  %v853_v58 = vld [vmem:[#allocation8 + $0xc08] sm:$0xff]  ;;  %v598_v60 = vld [vmem:[#allocation8 + $0x410] sm:$0xff] }
 0x1f1   :  { %3920 = vmatprep.subr.bf16.mxu0 %v7875_v8  ;;  %v8177_v8 = vcombine.high %v813_v3, %v817_v4  ;;  %v857_v59 = vld [vmem:[#allocation8 + $0xc28] sm:$0xff] }
 0x1f3   :  { %3839 = vmatpush1.bf16.msra.mxu1 %v8128_v13  ;;  %v570_v13 = vld [vmem:[#allocation8 + $0x330] sm:$0xff] }
 0x1f4   :  { %3921 = vmatpush1.bf16.msra.mxu0 %v7874_v48  ;;  %3840 = vmatprep.subr.bf16.mxu1 %v8137_v14  ;;  %v8176_v48 = vcombine.low %v813_v3, %v817_v4  ;;  %v7922_v14 = vcombine.low %v558_v5, %v562_v22  ;;  %v7931_v17 = vcombine.high %v566_v12, %v570_v13  ;;  %v861_v4 = vld [vmem:[#allocation8 + $0xc48] sm:$0xff] }
 0x1f5   :  { %3922 = vmatprep.subr.bf16.mxu0 %v7883_v15  ;;  %v8185_v15 = vcombine.high %v821_v10, %v825_v11  ;;  %v865_v5 = vld [vmem:[#allocation8 + $0xc68] sm:$0xff]  ;;  %v8216_v22 = vcombine.low %v853_v58, %v857_v59 }
 0x1f7   :  { %3841 = vmatpush1.bf16.msra.mxu1 %v8136_v27  ;;  %v578_v27 = vld [vmem:[#allocation8 + $0x370] sm:$0xff] }
 0x1f8   :  { %3923 = vmatpush1.bf16.msra.mxu0 %v7882_v28  ;;  %3842 = vmatprep.subr.bf16.mxu1 %v8145_v47  ;;  %v8184_v28 = vcombine.low %v821_v10, %v825_v11  ;;  %v7930_v47 = vcombine.low %v566_v12, %v570_v13  ;;  %v7939_v31 = vcombine.high %v574_v26, %v578_v27  ;;  %v869_v10 = vld [vmem:[#allocation8 + $0xc88] sm:$0xff]  ;;  %v614_v13 = vld [vmem:[#allocation8 + $0x490] sm:$0xff] }
 0x1f9   :  { %3924 = vmatprep.subr.bf16.mxu0 %v7891_v30  ;;  %v8193_v30 = vcombine.high %v829_v18, %v833_v25  ;;  %v873_v11 = vld [vmem:[#allocation8 + $0xca8] sm:$0xff] }
 0x1fb   :  { %3843 = vmatpush1.bf16.msra.mxu1 %v8144_v36  ;;  %v586_v36 = vld [vmem:[#allocation8 + $0x3b0] sm:$0xff] }
 0x1fc   :  { %3925 = vmatpush1.bf16.msra.mxu0 %v7890_v37  ;;  %3844 = vmatprep.subr.bf16.mxu1 %v8153_v51  ;;  %v8192_v37 = vcombine.low %v829_v18, %v833_v25  ;;  %v7938_v51 = vcombine.low %v574_v26, %v578_v27  ;;  %v7947_v40 = vcombine.high %v582_v35, %v586_v36  ;;  %v877_v25 = vld [vmem:[#allocation8 + $0xcc8] sm:$0xff]  ;;  %v622_v27 = vld [vmem:[#allocation8 + $0x4d0] sm:$0xff] }
 0x1fd   :  { %3926 = vmatprep.subr.bf16.mxu0 %v7899_v39  ;;  %v8201_v39 = vcombine.high %v837_v32, %v841_v33  ;;  %v881_v26 = vld [vmem:[#allocation8 + $0xce8] sm:$0xff] }
 0x1ff   :  { %3845 = vmatpush1.bf16.msra.mxu1 %v8152_v45  ;;  %v594_v45 = vld [vmem:[#allocation8 + $0x3f0] sm:$0xff] }
 0x200   :  { %3927 = vmatpush1.bf16.msra.mxu0 %v7898_v50  ;;  %3846 = vmatprep.subr.bf16.mxu1 %v8161_v54  ;;  %v8200_v50 = vcombine.low %v837_v32, %v841_v33  ;;  %v7946_v54 = vcombine.low %v582_v35, %v586_v36  ;;  %v7955_v57 = vcombine.high %v590_v43, %v594_v45  ;;  %v885_v33 = vld [vmem:[#allocation8 + $0xd08] sm:$0xff]  ;;  %v630_v36 = vld [vmem:[#allocation8 + $0x510] sm:$0xff] }
 0x201   :  { %3928 = vmatprep.subr.bf16.mxu0 %v7907_v56  ;;  %v8209_v56 = vcombine.high %v845_v41, %v849_v42  ;;  %v889_v35 = vld [vmem:[#allocation8 + $0xd28] sm:$0xff] }
 0x203   :  { %3847 = vmatpush1.bf16.msra.mxu1 %v8160_v61  ;;  %v602_v61 = vld [vmem:[#allocation8 + $0x430] sm:$0xff] }
 0x204   :  { %3929 = vmatpush1.bf16.msra.mxu0 %v7906_v63  ;;  %3848 = vmatprep.subr.bf16.mxu1 %v8169_v0  ;;  %v8208_v63 = vcombine.low %v845_v41, %v849_v42  ;;  %v7954_v0 = vcombine.low %v590_v43, %v594_v45  ;;  %v7963_v3 = vcombine.high %v598_v60, %v602_v61  ;;  %v893_v42 = vld [vmem:[#allocation8 + $0xd48] sm:$0xff]  ;;  %v638_v45 = vld [vmem:[#allocation8 + $0x550] sm:$0xff] }
 0x205   :  { %3930 = vmatprep.subr.bf16.mxu0 %v7915_v2  ;;  %v8217_v2 = vcombine.high %v853_v58, %v857_v59  ;;  %v897_v43 = vld [vmem:[#allocation8 + $0xd68] sm:$0xff] }
 0x206   :  { %v901_v59 = vld [vmem:[#allocation8 + $0xd88] sm:$0xff] }
 0x207   :  { %3849 = vmatpush1.bf16.msra.mxu1 %v8168_v6  ;;  %v606_v6 = vld [vmem:[#allocation8 + $0x450] sm:$0xff] }
 0x208   :  { %3931 = vmatpush1.bf16.msra.mxu0 %v7914_v7  ;;  %3850 = vmatprep.subr.bf16.mxu1 %v8177_v8  ;;  %v610_v7 = vld [vmem:[#allocation8 + $0x470] sm:$0xff]  ;;  %v7962_v8 = vcombine.low %v598_v60, %v602_v61  ;;  %v905_v60 = vld [vmem:[#allocation8 + $0xda8] sm:$0xff] }
 0x209   :  { %3932 = vmatprep.subr.bf16.mxu0 %v7923_v9  ;;  %v8225_v9 = vcombine.high %v861_v4, %v865_v5  ;;  %v7971_v12 = vcombine.high %v606_v6, %v610_v7  ;;  %v646_v61 = vld [vmem:[#allocation8 + $0x590] sm:$0xff] }
 0x20b   :  { %3851 = vmatpush1.bf16.msra.mxu1 %v8176_v48  ;;  %v618_v48 = vld [vmem:[#allocation8 + $0x4b0] sm:$0xff] }
 0x20c   :  { %3933 = vmatpush1.bf16.msra.mxu0 %v7922_v14  ;;  %3852 = vmatprep.subr.bf16.mxu1 %v8185_v15  ;;  %v8224_v14 = vcombine.low %v861_v4, %v865_v5  ;;  %v7970_v15 = vcombine.low %v606_v6, %v610_v7  ;;  %v7979_v18 = vcombine.high %v614_v13, %v618_v48  ;;  %v913_v6 = vld [vmem:[#allocation8 + $0xde8] sm:$0xff] }
 0x20d   :  { %3934 = vmatprep.subr.bf16.mxu0 %v7931_v17  ;;  %v8233_v17 = vcombine.high %v869_v10, %v873_v11 }
 0x20f   :  { %3853 = vmatpush1.bf16.msra.mxu1 %v8184_v28  ;;  %v626_v28 = vld [vmem:[#allocation8 + $0x4f0] sm:$0xff] }
 0x210   :  { %3935 = vmatpush1.bf16.msra.mxu0 %v7930_v47  ;;  %3854 = vmatprep.subr.bf16.mxu1 %v8193_v30  ;;  %v8232_v47 = vcombine.low %v869_v10, %v873_v11  ;;  %v7978_v30 = vcombine.low %v614_v13, %v618_v48  ;;  %v7987_v32 = vcombine.high %v622_v27, %v626_v28 }
 0x211   :  { %3936 = vmatprep.subr.bf16.mxu0 %v7939_v31  ;;  %v8241_v31 = vcombine.high %v877_v25, %v881_v26  ;;  %v8264_v11 = vcombine.low %v901_v59, %v905_v60 }
 0x213   :  { %3855 = vmatpush1.bf16.msra.mxu1 %v8192_v37  ;;  %v634_v37 = vld [vmem:[#allocation8 + $0x530] sm:$0xff] }
 0x214   :  { %3937 = vmatpush1.bf16.msra.mxu0 %v7938_v51  ;;  %3856 = vmatprep.subr.bf16.mxu1 %v8201_v39  ;;  %v8240_v51 = vcombine.low %v877_v25, %v881_v26  ;;  %v7986_v39 = vcombine.low %v622_v27, %v626_v28  ;;  %v7995_v41 = vcombine.high %v630_v36, %v634_v37  ;;  %v666_v25 = vld [vmem:[#allocation8 + $0x630] sm:$0xff] }
 0x215   :  { %3938 = vmatprep.subr.bf16.mxu0 %v7947_v40  ;;  %v8249_v40 = vcombine.high %v885_v33, %v889_v35 }
 0x217   :  { %3857 = vmatpush1.bf16.msra.mxu1 %v8200_v50  ;;  %v642_v50 = vld [vmem:[#allocation8 + $0x570] sm:$0xff] }
 0x218   :  { %3939 = vmatpush1.bf16.msra.mxu0 %v7946_v54  ;;  %3858 = vmatprep.subr.bf16.mxu1 %v8209_v56  ;;  %v8248_v54 = vcombine.low %v885_v33, %v889_v35  ;;  %v7994_v56 = vcombine.low %v630_v36, %v634_v37  ;;  %v8003_v58 = vcombine.high %v638_v45, %v642_v50  ;;  %v674_v33 = vld [vmem:[#allocation8 + $0x670] sm:$0xff] }
 0x219   :  { %3940 = vmatprep.subr.bf16.mxu0 %v7955_v57  ;;  %v8257_v57 = vcombine.high %v893_v42, %v897_v43 }
 0x21b   :  { %3859 = vmatpush1.bf16.msra.mxu1 %v8208_v63  ;;  %v650_v63 = vld [vmem:[#allocation8 + $0x5b0] sm:$0xff] }
 0x21c   :  { %3941 = vmatpush1.bf16.msra.mxu0 %v7954_v0  ;;  %3869 = vmatprep.subr.bf16.mxu1 %v8217_v2  ;;  %v8256_v0 = vcombine.low %v893_v42, %v897_v43  ;;  %v8002_v2 = vcombine.low %v638_v45, %v642_v50  ;;  %v8011_v5 = vcombine.high %v646_v61, %v650_v63  ;;  %v682_v42 = vld [vmem:[#allocation8 + $0x6b0] sm:$0xff] }
 0x21d   :  { %3951 = vmatprep.subr.bf16.mxu0 %v7963_v3  ;;  %v8265_v3 = vcombine.high %v901_v59, %v905_v60  ;;  %v8010_v13 = vcombine.low %v646_v61, %v650_v63  ;;  %v690_v59 = vld [vmem:[#allocation8 + $0x6f0] sm:$0xff] }
 0x21e   :  { %3861 = vmatmul.mubr.bf16.vlgmr.msra.gmra.mrb[8].mxu1 %v10059_v34 }
 0x21f   :  { %3943 = vmatmul.mubr.bf16.vlgmr.msra.gmra.mrb[8].mxu0 %v10038_v55  ;;  %3870 = vmatpush1.bf16.msra.mxu1 %v8216_v22  ;;  %v909_v22 = vld [vmem:[#allocation8 + $0xdc8] sm:$0xff] }
 0x220   :  { %3901 = vmatprep.mubr.bf16.mxu1 %v10061_v44  ;;  %3952 = vmatpush1.bf16.msra.mxu0 %v7962_v8  ;;  %v654_v8 = vld [vmem:[#allocation8 + $0x5d0] sm:$0xff]  ;;  %v8273_v48 = vcombine.high %v909_v22, %v913_v6  ;;  %v8272_v26 = vcombine.low %v909_v22, %v913_v6 }
 0x221   :  { %3983 = vmatprep.mubr.bf16.mxu0 %v10036_v53  ;;  %3871 = vmatprep.subr.bf16.mxu1 %v8225_v9  ;;  %v658_v9 = vld [vmem:[#allocation8 + $0x5f0] sm:$0xff] }
 0x222   :  { %3953 = vmatprep.subr.bf16.mxu0 %v7971_v12  ;;  %v8018_v27 = vcombine.low %v654_v8, %v658_v9  ;;  %v698_v22 = vld [vmem:[#allocation8 + $0x730] sm:$0xff] }
 0x223   :  { %3872 = vmatpush1.bf16.msra.mxu1 %v8224_v14  ;;  %v8019_v14 = vcombine.high %v654_v8, %v658_v9 }
 0x224   :  { %3954 = vmatpush1.bf16.msra.mxu0 %v7970_v15  ;;  %3873 = vmatprep.subr.bf16.mxu1 %v8233_v17  ;;  %v917_v15 = vld [vmem:[#allocation8 + $0xe08] sm:$0xff] }
 0x225   :  { %3955 = vmatprep.subr.bf16.mxu0 %v7979_v18  ;;  %v921_v17 = vld [vmem:[#allocation8 + $0xe28] sm:$0xff]  ;;  %v662_v18 = vld [vmem:[#allocation8 + $0x610] sm:$0xff] }
 0x226   :  { %v8281_v28 = vcombine.high %v917_v15, %v921_v17  ;;  %v8280_v35 = vcombine.low %v917_v15, %v921_v17  ;;  %v8026_v36 = vcombine.low %v662_v18, %v666_v25 }
 0x227   :  { %3874 = vmatpush1.bf16.msra.mxu1 %v8232_v47  ;;  %v8027_v47 = vcombine.high %v662_v18, %v666_v25  ;;  %v965_v25 = vld [vmem:[#allocation8 + $0xf88] sm:$0xff] }
 0x228   :  { %3956 = vmatpush1.bf16.msra.mxu0 %v7978_v30  ;;  %3875 = vmatprep.subr.bf16.mxu1 %v8241_v31  ;;  %v925_v30 = vld [vmem:[#allocation8 + $0xe48] sm:$0xff] }
 0x229   :  { %3957 = vmatprep.subr.bf16.mxu0 %v7987_v32  ;;  %v929_v31 = vld [vmem:[#allocation8 + $0xe68] sm:$0xff]  ;;  %v670_v32 = vld [vmem:[#allocation8 + $0x650] sm:$0xff] }
 0x22a   :  { %v8289_v37 = vcombine.high %v925_v30, %v929_v31  ;;  %v8288_v43 = vcombine.low %v925_v30, %v929_v31  ;;  %v8034_v45 = vcombine.low %v670_v32, %v674_v33 }
 0x22b   :  { %3876 = vmatpush1.bf16.msra.mxu1 %v8240_v51  ;;  %v8035_v51 = vcombine.high %v670_v32, %v674_v33  ;;  %v973_v33 = vld [vmem:[#allocation8 + $0xfc8] sm:$0xff] }
 0x22c   :  { %3958 = vmatpush1.bf16.msra.mxu0 %v7986_v39  ;;  %3877 = vmatprep.subr.bf16.mxu1 %v8249_v40  ;;  %v933_v39 = vld [vmem:[#allocation8 + $0xe88] sm:$0xff] }
 0x22d   :  { %3959 = vmatprep.subr.bf16.mxu0 %v7995_v41  ;;  %v937_v40 = vld [vmem:[#allocation8 + $0xea8] sm:$0xff]  ;;  %v678_v41 = vld [vmem:[#allocation8 + $0x690] sm:$0xff] }
 0x22e   :  { %v8297_v50 = vcombine.high %v933_v39, %v937_v40  ;;  %v8296_v60 = vcombine.low %v933_v39, %v937_v40  ;;  %v8042_v61 = vcombine.low %v678_v41, %v682_v42 }
 0x22f   :  { %3878 = vmatpush1.bf16.msra.mxu1 %v8248_v54  ;;  %v8043_v54 = vcombine.high %v678_v41, %v682_v42  ;;  %v471_v42 = vld [vmem:[#allocation8 + $0x18] sm:$0xff] }
 0x230   :  { %3960 = vmatpush1.bf16.msra.mxu0 %v7994_v56  ;;  %3879 = vmatprep.subr.bf16.mxu1 %v8257_v57  ;;  %v941_v56 = vld [vmem:[#allocation8 + $0xec8] sm:$0xff] }
 0x231   :  { %v10083_v4 = vpop.f32.mrb[4].mxu1  ;;  %3961 = vmatprep.subr.bf16.mxu0 %v8003_v58  ;;  %v945_v57 = vld [vmem:[#allocation8 + $0xee8] sm:$0xff]  ;;  %v686_v58 = vld [vmem:[#allocation8 + $0x6d0] sm:$0xff] }
 0x232   :  { %v10085_v7 = vpop.f32.mrb[5].mxu1  ;;  %v8305_v63 = vcombine.high %v941_v56, %v945_v57  ;;  %v8304_v6 = vcombine.low %v941_v56, %v945_v57  ;;  %v8050_v8 = vcombine.low %v686_v58, %v690_v59 }
 0x233   :  { %3880 = vmatpush1.bf16.msra.mxu1 %v8256_v0  ;;  %v3620_v10 = vpop.f32.mrb[6].mxu1  ;;  %v8051_v0 = vcombine.high %v686_v58, %v690_v59  ;;  %v734_v59 = vld [vmem:[#allocation8 + $0x850] sm:$0xff] }
 0x234   :  { %3962 = vmatpush1.bf16.msra.mxu0 %v8002_v2  ;;  %v3621_v12 = vpop.f32.mrb[7].mxu1  ;;  %3881 = vmatprep.subr.bf16.mxu1 %v8265_v3  ;;  %v949_v2 = vld [vmem:[#allocation8 + $0xf08] sm:$0xff] }
 0x235   :  { %3963 = vmatprep.subr.bf16.mxu0 %v8011_v5  ;;  %v953_v3 = vld [vmem:[#allocation8 + $0xf28] sm:$0xff]  ;;  %v694_v5 = vld [vmem:[#allocation8 + $0x710] sm:$0xff] }
 0x236   :  { %v8313_v9 = vcombine.high %v949_v2, %v953_v3  ;;  %v8059_v10 = vcombine.high %v694_v5, %v698_v22  ;;  %v961_v12 = vld [vmem:[#allocation8 + $0xf68] sm:$0xff]  ;;  %v8058_v15 = vcombine.low %v694_v5, %v698_v22  ;;  %v487_v5 = vld [vmem:[#allocation8 + $0x98] sm:$0xff] }
 0x237   :  { %3882 = vmatpush1.bf16.msra.mxu1 %v8264_v11  ;;  %v957_v11 = vld [vmem:[#allocation8 + $0xf48] sm:$0xff]  ;;  %v491_v22 = vld [vmem:[#allocation8 + $0xb8] sm:$0xff] }
 0x238   :  { %3964 = vmatpush1.bf16.msra.mxu0 %v8010_v13  ;;  %3883 = vmatprep.subr.bf16.mxu1 %v8273_v48  ;;  %v702_v13 = vld [vmem:[#allocation8 + $0x750] sm:$0xff]  ;;  %v8321_v17 = vcombine.high %v957_v11, %v961_v12 }
 0x239   :  { %3965 = vmatprep.subr.bf16.mxu0 %v8019_v14  ;;  %v706_v48 = vld [vmem:[#allocation8 + $0x770] sm:$0xff]  ;;  %v8312_v14 = vcombine.low %v949_v2, %v953_v3 }
 0x23a   :  { %v8067_v18 = vcombine.high %v702_v13, %v706_v48  ;;  %v8066_v30 = vcombine.low %v702_v13, %v706_v48  ;;  %v495_v48 = vld [vmem:[#allocation8 + $0xd8] sm:$0xff] }
 0x23b   :  { %3884 = vmatpush1.bf16.msra.mxu1 %v8272_v26  ;;  %v969_v26 = vld [vmem:[#allocation8 + $0xfa8] sm:$0xff] }
 0x23c   :  { %3966 = vmatpush1.bf16.msra.mxu0 %v8018_v27  ;;  %3885 = vmatprep.subr.bf16.mxu1 %v8281_v28  ;;  %v710_v27 = vld [vmem:[#allocation8 + $0x790] sm:$0xff]  ;;  %v8329_v31 = vcombine.high %v965_v25, %v969_v26 }
 0x23d   :  { %3967 = vmatprep.subr.bf16.mxu0 %v8027_v47  ;;  %v714_v28 = vld [vmem:[#allocation8 + $0x7b0] sm:$0xff]  ;;  %v8320_v47 = vcombine.low %v957_v11, %v961_v12  ;;  %v7853_v12 = vcombine.high %v487_v5, %v491_v22 }
 0x23e   :  { %v8075_v32 = vcombine.high %v710_v27, %v714_v28  ;;  %v8074_v39 = vcombine.low %v710_v27, %v714_v28  ;;  %v503_v28 = vld [vmem:[#allocation8 + $0x118] sm:$0xff] }
 0x23f   :  { %3886 = vmatpush1.bf16.msra.mxu1 %v8280_v35  ;;  %v977_v35 = vld [vmem:[#allocation8 + $0xfe8] sm:$0xff] }
 0x240   :  { %3968 = vmatpush1.bf16.msra.mxu0 %v8026_v36  ;;  %3887 = vmatprep.subr.bf16.mxu1 %v8289_v37  ;;  %v718_v36 = vld [vmem:[#allocation8 + $0x7d0] sm:$0xff]  ;;  %v8337_v40 = vcombine.high %v973_v33, %v977_v35 }
 0x241   :  { %3969 = vmatprep.subr.bf16.mxu0 %v8035_v51  ;;  %v722_v37 = vld [vmem:[#allocation8 + $0x7f0] sm:$0xff]  ;;  %v8328_v51 = vcombine.low %v965_v25, %v969_v26 }
 0x242   :  { %v8083_v41 = vcombine.high %v718_v36, %v722_v37  ;;  %v8082_v56 = vcombine.low %v718_v36, %v722_v37  ;;  %v511_v36 = vld [vmem:[#allocation8 + $0x158] sm:$0xff] }
 0x243   :  { %3888 = vmatpush1.bf16.msra.mxu1 %v8288_v43  ;;  %v475_v43 = vld [vmem:[#allocation8 + $0x38] sm:$0xff] }
 0x244   :  { %3970 = vmatpush1.bf16.msra.mxu0 %v8034_v45  ;;  %3889 = vmatprep.subr.bf16.mxu1 %v8297_v50  ;;  %v726_v45 = vld [vmem:[#allocation8 + $0x810] sm:$0xff]  ;;  %v7837_v57 = vcombine.high %v471_v42, %v475_v43  ;;  %v515_v37 = vld [vmem:[#allocation8 + $0x178] sm:$0xff] }
 0x245   :  { %3971 = vmatprep.subr.bf16.mxu0 %v8043_v54  ;;  %v730_v50 = vld [vmem:[#allocation8 + $0x830] sm:$0xff]  ;;  %v8336_v54 = vcombine.low %v973_v33, %v977_v35 }
 0x246   :  { %v8091_v58 = vcombine.high %v726_v45, %v730_v50  ;;  %v8090_v2 = vcombine.low %v726_v45, %v730_v50  ;;  %v519_v45 = vld [vmem:[#allocation8 + $0x198] sm:$0xff] }
 0x247   :  { %3890 = vmatpush1.bf16.msra.mxu1 %v8296_v60  ;;  %v738_v60 = vld [vmem:[#allocation8 + $0x870] sm:$0xff]  ;;  %v523_v50 = vld [vmem:[#allocation8 + $0x1b8] sm:$0xff] }
 0x248   :  { %3972 = vmatpush1.bf16.msra.mxu0 %v8042_v61  ;;  %3891 = vmatprep.subr.bf16.mxu1 %v8305_v63  ;;  %v7836_v61 = vcombine.low %v471_v42, %v475_v43  ;;  %v479_v63 = vld [vmem:[#allocation8 + $0x58] sm:$0xff]  ;;  %v8099_v3 = vcombine.high %v734_v59, %v738_v60  ;;  %v8098_v11 = vcombine.low %v734_v59, %v738_v60 }
 0x249   :  { %3973 = vmatprep.subr.bf16.mxu0 %v8051_v0  ;;  %v483_v0 = vld [vmem:[#allocation8 + $0x78] sm:$0xff]  ;;  %v7877_v42 = vcombine.high %v511_v36, %v515_v37  ;;  %v7885_v59 = vcombine.high %v519_v45, %v523_v50 }
 0x24b   :  { %3892 = vmatpush1.bf16.msra.mxu1 %v8304_v6  ;;  %v7845_v6 = vcombine.high %v479_v63, %v483_v0 }
 0x24c   :  { %3974 = vmatpush1.bf16.msra.mxu0 %v8050_v8  ;;  %3893 = vmatprep.subr.bf16.mxu1 %v8313_v9  ;;  %v742_v8 = vld [vmem:[#allocation8 + $0x890] sm:$0xff] }
 0x24d   :  { %3975 = vmatprep.subr.bf16.mxu0 %v8059_v10  ;;  %v746_v9 = vld [vmem:[#allocation8 + $0x8b0] sm:$0xff]  ;;  %v7844_v10 = vcombine.low %v479_v63, %v483_v0  ;;  %v531_v63 = vld [vmem:[#allocation8 + $0x1f8] sm:$0xff] }
 0x24e   :  { %v8107_v13 = vcombine.high %v742_v8, %v746_v9  ;;  %v8106_v25 = vcombine.low %v742_v8, %v746_v9  ;;  %v782_v0 = vld [vmem:[#allocation8 + $0x9d0] sm:$0xff]  ;;  %v535_v8 = vld [vmem:[#allocation8 + $0x218] sm:$0xff] }
 0x24f   :  { %3894 = vmatpush1.bf16.msra.mxu1 %v8312_v14  ;;  %v499_v14 = vld [vmem:[#allocation8 + $0xf8] sm:$0xff] }
 0x250   :  { %3976 = vmatpush1.bf16.msra.mxu0 %v8058_v15  ;;  %3895 = vmatprep.subr.bf16.mxu1 %v8321_v17  ;;  %v750_v15 = vld [vmem:[#allocation8 + $0x8d0] sm:$0xff]  ;;  %v7861_v26 = vcombine.high %v495_v48, %v499_v14  ;;  %v539_v9 = vld [vmem:[#allocation8 + $0x238] sm:$0xff] }
 0x251   :  { %3977 = vmatprep.subr.bf16.mxu0 %v8067_v18  ;;  %v754_v17 = vld [vmem:[#allocation8 + $0x8f0] sm:$0xff]  ;;  %v7852_v18 = vcombine.low %v487_v5, %v491_v22 }
 0x252   :  { %v8115_v27 = vcombine.high %v750_v15, %v754_v17 }
 0x253   :  { %3896 = vmatpush1.bf16.msra.mxu1 %v8320_v47  ;;  %v507_v47 = vld [vmem:[#allocation8 + $0x138] sm:$0xff] }
 0x254   :  { %3978 = vmatpush1.bf16.msra.mxu0 %v8066_v30  ;;  %3897 = vmatprep.subr.bf16.mxu1 %v8329_v31  ;;  %v758_v30 = vld [vmem:[#allocation8 + $0x910] sm:$0xff]  ;;  %v7869_v33 = vcombine.high %v503_v28, %v507_v47 }
 0x255   :  { %3979 = vmatprep.subr.bf16.mxu0 %v8075_v32  ;;  %v762_v31 = vld [vmem:[#allocation8 + $0x930] sm:$0xff]  ;;  %v8114_v32 = vcombine.low %v750_v15, %v754_v17  ;;  %v543_v15 = vld [vmem:[#allocation8 + $0x258] sm:$0xff] }
 0x256   :  { %v8123_v35 = vcombine.high %v758_v30, %v762_v31  ;;  %v547_v17 = vld [vmem:[#allocation8 + $0x278] sm:$0xff] }
 0x257   :  { %3898 = vmatpush1.bf16.msra.mxu1 %v8328_v51  ;;  %v766_v51 = vld [vmem:[#allocation8 + $0x950] sm:$0xff] }
 0x258   :  { %3980 = vmatpush1.bf16.msra.mxu0 %v8074_v39  ;;  %3899 = vmatprep.subr.bf16.mxu1 %v8337_v40  ;;  %v770_v39 = vld [vmem:[#allocation8 + $0x970] sm:$0xff]  ;;  %v7868_v40 = vcombine.low %v503_v28, %v507_v47  ;;  %v7909_v28 = vcombine.high %v543_v15, %v547_v17 }
 0x259   :  { %3981 = vmatprep.subr.bf16.mxu0 %v8083_v41  ;;  %v8122_v41 = vcombine.low %v758_v30, %v762_v31  ;;  %v8131_v43 = vcombine.high %v766_v51, %v770_v39  ;;  %v551_v30 = vld [vmem:[#allocation8 + $0x298] sm:$0xff] }
 0x25a   :  { %v555_v31 = vld [vmem:[#allocation8 + $0x2b8] sm:$0xff] }
 0x25b   :  { %3900 = vmatpush1.bf16.msra.mxu1 %v8336_v54  ;;  %v774_v54 = vld [vmem:[#allocation8 + $0x990] sm:$0xff] }
 0x25c   :  { %3982 = vmatpush1.bf16.msra.mxu0 %v8082_v56  ;;  %4074 = vmatprep.subr.bf16.mxu1 %v7837_v57  ;;  %v778_v56 = vld [vmem:[#allocation8 + $0x9b0] sm:$0xff]  ;;  %v7876_v57 = vcombine.low %v511_v36, %v515_v37  ;;  %v7917_v36 = vcombine.high %v551_v30, %v555_v31 }
 0x25d   :  { %3992 = vmatprep.subr.bf16.mxu0 %v8091_v58  ;;  %v8130_v58 = vcombine.low %v766_v51, %v770_v39  ;;  %v8139_v60 = vcombine.high %v774_v54, %v778_v56  ;;  %v8138_v5 = vcombine.low %v774_v54, %v778_v56  ;;  %v559_v51 = vld [vmem:[#allocation8 + $0x2d8] sm:$0xff] }
 0x25e   :  { %3902 = vmatmul.mubr.bf16.vlgmr.msra.gmra.mrb[8].mxu1 %v10073_v16  ;;  %v563_v39 = vld [vmem:[#allocation8 + $0x2f8] sm:$0xff] }
 0x25f   :  { %3984 = vmatmul.mubr.bf16.vlgmr.msra.gmra.mrb[8].mxu0 %v10030_v49  ;;  %4075 = vmatpush1.bf16.msra.mxu1 %v7836_v61  ;;  %v527_v61 = vld [vmem:[#allocation8 + $0x1d8] sm:$0xff] }
 0x260   :  { %3993 = vmatpush1.bf16.msra.mxu0 %v8090_v2  ;;  %4024 = vmatprep.mubr.bf16.mxu0 %v10044_v1  ;;  %v786_v2 = vld [vmem:[#allocation8 + $0x9f0] sm:$0xff]  ;;  %v7893_v22 = vcombine.high %v527_v61, %v531_v63  ;;  %v567_v54 = vld [vmem:[#allocation8 + $0x318] sm:$0xff] }
 0x261   :  { %4106 = vmatprep.mubr.bf16.mxu1 %v10034_v52  ;;  %3994 = vmatprep.subr.bf16.mxu0 %v8099_v3  ;;  %v7860_v52 = vcombine.low %v495_v48, %v499_v14  ;;  %v7884_v3 = vcombine.low %v519_v45, %v523_v50  ;;  %v7901_v48 = vcombine.high %v535_v8, %v539_v9  ;;  %v571_v56 = vld [vmem:[#allocation8 + $0x338] sm:$0xff] }
 0x262   :  { %4076 = vmatprep.subr.bf16.mxu1 %v7845_v6  ;;  %v8147_v6 = vcombine.high %v782_v0, %v786_v2  ;;  %v7925_v45 = vcombine.high %v559_v51, %v563_v39 }
 0x263   :  { %4077 = vmatpush1.bf16.msra.mxu1 %v7844_v10  ;;  %v790_v10 = vld [vmem:[#allocation8 + $0xa10] sm:$0xff] }
 0x264   :  { %3995 = vmatpush1.bf16.msra.mxu0 %v8098_v11  ;;  %4078 = vmatprep.subr.bf16.mxu1 %v7853_v12  ;;  %v794_v11 = vld [vmem:[#allocation8 + $0xa30] sm:$0xff]  ;;  %v7892_v12 = vcombine.low %v527_v61, %v531_v63  ;;  %v7933_v61 = vcombine.high %v567_v54, %v571_v56 }
 0x265   :  { %3996 = vmatprep.subr.bf16.mxu0 %v8107_v13  ;;  %v8146_v13 = vcombine.low %v782_v0, %v786_v2  ;;  %v8155_v14 = vcombine.high %v790_v10, %v794_v11  ;;  %v575_v0 = vld [vmem:[#allocation8 + $0x358] sm:$0xff] }
 0x266   :  { %v579_v2 = vld [vmem:[#allocation8 + $0x378] sm:$0xff] }
 0x267   :  { %4079 = vmatpush1.bf16.msra.mxu1 %v7852_v18  ;;  %v798_v18 = vld [vmem:[#allocation8 + $0xa50] sm:$0xff] }
 0x268   :  { %3997 = vmatpush1.bf16.msra.mxu0 %v8106_v25  ;;  %4080 = vmatprep.subr.bf16.mxu1 %v7861_v26  ;;  %v802_v25 = vld [vmem:[#allocation8 + $0xa70] sm:$0xff]  ;;  %v7900_v26 = vcombine.low %v535_v8, %v539_v9  ;;  %v7941_v8 = vcombine.high %v575_v0, %v579_v2 }
 0x269   :  { %3998 = vmatprep.subr.bf16.mxu0 %v8115_v27  ;;  %v8154_v27 = vcombine.low %v790_v10, %v794_v11  ;;  %v8163_v47 = vcombine.high %v798_v18, %v802_v25  ;;  %v583_v10 = vld [vmem:[#allocation8 + $0x398] sm:$0xff] }
 0x26a   :  { %v587_v11 = vld [vmem:[#allocation8 + $0x3b8] sm:$0xff] }
 0x26b   :  { %4081 = vmatpush1.bf16.msra.mxu1 %v7860_v52  ;;  %v806_v52 = vld [vmem:[#allocation8 + $0xa90] sm:$0xff] }
 0x26c   :  { %3999 = vmatpush1.bf16.msra.mxu0 %v8114_v32  ;;  %4082 = vmatprep.subr.bf16.mxu1 %v7869_v33  ;;  %v810_v32 = vld [vmem:[#allocation8 + $0xab0] sm:$0xff]  ;;  %v7908_v33 = vcombine.low %v543_v15, %v547_v17  ;;  %v7949_v15 = vcombine.high %v583_v10, %v587_v11 }
 0x26d   :  { %4000 = vmatprep.subr.bf16.mxu0 %v8123_v35  ;;  %v8162_v35 = vcombine.low %v798_v18, %v802_v25  ;;  %v8171_v37 = vcombine.high %v806_v52, %v810_v32  ;;  %v591_v18 = vld [vmem:[#allocation8 + $0x3d8] sm:$0xff] }
 0x26e   :  { %v595_v25 = vld [vmem:[#allocation8 + $0x3f8] sm:$0xff] }
 0x26f   :  { %4083 = vmatpush1.bf16.msra.mxu1 %v7868_v40  ;;  %v814_v40 = vld [vmem:[#allocation8 + $0xad0] sm:$0xff] }
 0x270   :  { %4001 = vmatpush1.bf16.msra.mxu0 %v8122_v41  ;;  %4084 = vmatprep.subr.bf16.mxu1 %v7877_v42  ;;  %v818_v41 = vld [vmem:[#allocation8 + $0xaf0] sm:$0xff]  ;;  %v7916_v42 = vcombine.low %v551_v30, %v555_v31  ;;  %v7957_v30 = vcombine.high %v591_v18, %v595_v25 }
 0x271   :  { %4002 = vmatprep.subr.bf16.mxu0 %v8131_v43  ;;  %v8170_v43 = vcombine.low %v806_v52, %v810_v32  ;;  %v8179_v50 = vcombine.high %v814_v40, %v818_v41  ;;  %v599_v52 = vld [vmem:[#allocation8 + $0x418] sm:$0xff] }
 0x272   :  { %v603_v32 = vld [vmem:[#allocation8 + $0x438] sm:$0xff] }
 0x273   :  { %4085 = vmatpush1.bf16.msra.mxu1 %v7876_v57  ;;  %v822_v57 = vld [vmem:[#allocation8 + $0xb10] sm:$0xff] }
 0x274   :  { %4003 = vmatpush1.bf16.msra.mxu0 %v8130_v58  ;;  %4086 = vmatprep.subr.bf16.mxu1 %v7885_v59  ;;  %v826_v58 = vld [vmem:[#allocation8 + $0xb30] sm:$0xff]  ;;  %v7924_v59 = vcombine.low %v559_v51, %v563_v39  ;;  %v7965_v51 = vcombine.high %v599_v52, %v603_v32 }
 0x275   :  { %4004 = vmatprep.subr.bf16.mxu0 %v8139_v60  ;;  %v8178_v60 = vcombine.low %v814_v40, %v818_v41  ;;  %v8187_v63 = vcombine.high %v822_v57, %v826_v58  ;;  %v862_v40 = vld [vmem:[#allocation8 + $0xc50] sm:$0xff] }
 0x276   :  { %v866_v41 = vld [vmem:[#allocation8 + $0xc70] sm:$0xff] }
 0x277   :  { %4087 = vmatpush1.bf16.msra.mxu1 %v7884_v3  ;;  %v830_v3 = vld [vmem:[#allocation8 + $0xb50] sm:$0xff] }
 0x278   :  { %4005 = vmatpush1.bf16.msra.mxu0 %v8138_v5  ;;  %4088 = vmatprep.subr.bf16.mxu1 %v7893_v22  ;;  %v834_v5 = vld [vmem:[#allocation8 + $0xb70] sm:$0xff]  ;;  %v7932_v22 = vcombine.low %v567_v54, %v571_v56  ;;  %v8227_v54 = vcombine.high %v862_v40, %v866_v41  ;;  %v615_v56 = vld [vmem:[#allocation8 + $0x498] sm:$0xff] }
 0x279   :  { %4006 = vmatprep.subr.bf16.mxu0 %v8147_v6  ;;  %v8186_v6 = vcombine.low %v822_v57, %v826_v58  ;;  %v8195_v9 = vcombine.high %v830_v3, %v834_v5  ;;  %v619_v57 = vld [vmem:[#allocation8 + $0x4b8] sm:$0xff] }
 0x27b   :  { %4089 = vmatpush1.bf16.msra.mxu1 %v7892_v12  ;;  %v838_v12 = vld [vmem:[#allocation8 + $0xb90] sm:$0xff] }
 0x27c   :  { %4007 = vmatpush1.bf16.msra.mxu0 %v8146_v13  ;;  %4090 = vmatprep.subr.bf16.mxu1 %v7901_v48  ;;  %v842_v13 = vld [vmem:[#allocation8 + $0xbb0] sm:$0xff]  ;;  %v7940_v48 = vcombine.low %v575_v0, %v579_v2  ;;  %v7981_v0 = vcombine.high %v615_v56, %v619_v57 }
 0x27d   :  { %4008 = vmatprep.subr.bf16.mxu0 %v8155_v14  ;;  %v8194_v14 = vcombine.low %v830_v3, %v834_v5  ;;  %v8203_v17 = vcombine.high %v838_v12, %v842_v13  ;;  %v623_v3 = vld [vmem:[#allocation8 + $0x4d8] sm:$0xff] }
 0x27e   :  { %v627_v5 = vld [vmem:[#allocation8 + $0x4f8] sm:$0xff] }
 0x27f   :  { %4091 = vmatpush1.bf16.msra.mxu1 %v7900_v26  ;;  %v846_v26 = vld [vmem:[#allocation8 + $0xbd0] sm:$0xff] }
 0x280   :  { %4009 = vmatpush1.bf16.msra.mxu0 %v8154_v27  ;;  %4092 = vmatprep.subr.bf16.mxu1 %v7909_v28  ;;  %v850_v27 = vld [vmem:[#allocation8 + $0xbf0] sm:$0xff]  ;;  %v7948_v28 = vcombine.low %v583_v10, %v587_v11  ;;  %v631_v11 = vld [vmem:[#allocation8 + $0x518] sm:$0xff] }
 0x281   :  { %4010 = vmatprep.subr.bf16.mxu0 %v8163_v47  ;;  %v8202_v47 = vcombine.low %v838_v12, %v842_v13  ;;  %v8211_v31 = vcombine.high %v846_v26, %v850_v27  ;;  %v635_v12 = vld [vmem:[#allocation8 + $0x538] sm:$0xff]  ;;  %v886_v13 = vld [vmem:[#allocation8 + $0xd10] sm:$0xff] }
 0x283   :  { %4093 = vmatpush1.bf16.msra.mxu1 %v7908_v33  ;;  %v854_v33 = vld [vmem:[#allocation8 + $0xc10] sm:$0xff] }
 0x284   :  { %4011 = vmatpush1.bf16.msra.mxu0 %v8162_v35  ;;  %4094 = vmatprep.subr.bf16.mxu1 %v7917_v36  ;;  %v858_v35 = vld [vmem:[#allocation8 + $0xc30] sm:$0xff]  ;;  %v7956_v36 = vcombine.low %v591_v18, %v595_v25  ;;  %v639_v25 = vld [vmem:[#allocation8 + $0x558] sm:$0xff] }
 0x285   :  { %4012 = vmatprep.subr.bf16.mxu0 %v8171_v37  ;;  %v8210_v37 = vcombine.low %v846_v26, %v850_v27  ;;  %v8219_v39 = vcombine.high %v854_v33, %v858_v35  ;;  %v643_v26 = vld [vmem:[#allocation8 + $0x578] sm:$0xff]  ;;  %v894_v27 = vld [vmem:[#allocation8 + $0xd50] sm:$0xff] }
 0x287   :  { %4095 = vmatpush1.bf16.msra.mxu1 %v7916_v42  ;;  %v7964_v42 = vcombine.low %v599_v52, %v603_v32  ;;  %v8005_v52 = vcombine.high %v639_v25, %v643_v26 }
 0x288   :  { %4013 = vmatpush1.bf16.msra.mxu0 %v8170_v43  ;;  %4096 = vmatprep.subr.bf16.mxu1 %v7925_v45  ;;  %v607_v43 = vld [vmem:[#allocation8 + $0x458] sm:$0xff] }
 0x289   :  { %4014 = vmatprep.subr.bf16.mxu0 %v8179_v50  ;;  %v611_v45 = vld [vmem:[#allocation8 + $0x478] sm:$0xff]  ;;  %v8218_v50 = vcombine.low %v854_v33, %v858_v35 }
 0x28a   :  { %v7973_v58 = vcombine.high %v607_v43, %v611_v45  ;;  %v647_v35 = vld [vmem:[#allocation8 + $0x598] sm:$0xff] }
 0x28b   :  { %4097 = vmatpush1.bf16.msra.mxu1 %v7924_v59  ;;  %v870_v59 = vld [vmem:[#allocation8 + $0xc90] sm:$0xff] }
 0x28c   :  { %4015 = vmatpush1.bf16.msra.mxu0 %v8178_v60  ;;  %4098 = vmatprep.subr.bf16.mxu1 %v7933_v61  ;;  %v874_v60 = vld [vmem:[#allocation8 + $0xcb0] sm:$0xff]  ;;  %v7972_v61 = vcombine.low %v607_v43, %v611_v45 }
 0x28d   :  { %4016 = vmatprep.subr.bf16.mxu0 %v8187_v63  ;;  %v8226_v63 = vcombine.low %v862_v40, %v866_v41  ;;  %v8235_v2 = vcombine.high %v870_v59, %v874_v60 }
 0x28f   :  { %4099 = vmatpush1.bf16.msra.mxu1 %v7932_v22  ;;  %v882_v22 = vld [vmem:[#allocation8 + $0xcf0] sm:$0xff] }
 0x290   :  { %4017 = vmatpush1.bf16.msra.mxu0 %v8186_v6  ;;  %4100 = vmatprep.subr.bf16.mxu1 %v7941_v8  ;;  %v7980_v6 = vcombine.low %v615_v56, %v619_v57  ;;  %v8234_v8 = vcombine.low %v870_v59, %v874_v60  ;;  %v659_v56 = vld [vmem:[#allocation8 + $0x5f8] sm:$0xff]  ;;  %v910_v59 = vld [vmem:[#allocation8 + $0xdd0] sm:$0xff] }
 0x291   :  { %4018 = vmatprep.subr.bf16.mxu0 %v8195_v9  ;;  %v7989_v9 = vcombine.high %v623_v3, %v627_v5  ;;  %v914_v60 = vld [vmem:[#allocation8 + $0xdf0] sm:$0xff] }
 0x293   :  { %4101 = vmatpush1.bf16.msra.mxu1 %v7940_v48  ;;  %v890_v48 = vld [vmem:[#allocation8 + $0xd30] sm:$0xff] }
 0x294   :  { %4019 = vmatpush1.bf16.msra.mxu0 %v8194_v14  ;;  %4102 = vmatprep.subr.bf16.mxu1 %v7949_v15  ;;  %v7997_v15 = vcombine.high %v631_v11, %v635_v12  ;;  %v8251_v18 = vcombine.high %v886_v13, %v890_v48 }
 0x295   :  { %4020 = vmatprep.subr.bf16.mxu0 %v8203_v17  ;;  %v10095_v17 = vld [vmem:[#allocation10] sm:$0xff] }
 0x296   :  { %v989_v32 = vrot.slane %v10095_v17, %v10008_v23 }
 0x297   :  { %4103 = vmatpush1.bf16.msra.mxu1 %v7948_v28  ;;  %v898_v28 = vld [vmem:[#allocation8 + $0xd70] sm:$0xff] }
 0x298   :  { %4021 = vmatpush1.bf16.msra.mxu0 %v8202_v47  ;;  %4104 = vmatprep.subr.bf16.mxu1 %v7957_v30  ;;  %v7996_v47 = vcombine.low %v631_v11, %v635_v12  ;;  %v985_v30 = vrot.slane %v10095_v17, %v10000_v20  ;;  %v8259_v33 = vcombine.high %v894_v27, %v898_v28  ;;  %v671_v12 = vld [vmem:[#allocation8 + $0x658] sm:$0xff] }
 0x299   :  { %4022 = vmatprep.subr.bf16.mxu0 %v8211_v31  ;;  %v8250_v31 = vcombine.low %v886_v13, %v890_v48  ;;  %v8258_v41 = vcombine.low %v894_v27, %v898_v28  ;;  %v3619_v43 = vadd.f32 %v10085_v7, %v989_v32  ;;  %v675_v13 = vld [vmem:[#allocation8 + $0x678] sm:$0xff]  ;;  %v926_v48 = vld [vmem:[#allocation8 + $0xe50] sm:$0xff] }
 0x29a   :  { %v3617_v40 = vadd.f32 %v10083_v4, %v985_v30  ;;  %v683_v27 = vld [vmem:[#allocation8 + $0x6b8] sm:$0xff]  ;;  %v934_v28 = vld [vmem:[#allocation8 + $0xe90] sm:$0xff]  ;;  %v8036_v30 = vcombine.low %v671_v12, %v675_v13 }
 0x29b   :  { %4105 = vmatpush1.bf16.msra.mxu1 %v7956_v36  ;;  %v651_v36 = vld [vmem:[#allocation8 + $0x5b8] sm:$0xff] }
 0x29c   :  { %4023 = vmatpush1.bf16.msra.mxu0 %v8210_v37  ;;  %4115 = vmatprep.subr.bf16.mxu1 %v7965_v51  ;;  %v902_v37 = vld [vmem:[#allocation8 + $0xd90] sm:$0xff]  ;;  %v8012_v4 = vcombine.low %v647_v35, %v651_v36 }
 0x29d   :  { %4033 = vmatprep.subr.bf16.mxu0 %v8219_v39  ;;  %v906_v51 = vld [vmem:[#allocation8 + $0xdb0] sm:$0xff]  ;;  %v8004_v39 = vcombine.low %v639_v25, %v643_v26  ;;  %v679_v26 = vld [vmem:[#allocation8 + $0x698] sm:$0xff] }
 0x29e   :  { %4107 = vmatmul.mubr.bf16.vlgmr.msra.gmra.mrb[12].mxu1 %v10038_v55  ;;  %v878_v55 = vld [vmem:[#allocation8 + $0xcd0] sm:$0xff] }
 0x29f   :  { %4025 = vmatmul.mubr.bf16.vlgmr.msra.gmra.mrb[8].mxu0 %v10059_v34  ;;  %4116 = vmatpush1.bf16.msra.mxu1 %v7964_v42  ;;  %v8243_v10 = vcombine.high %v878_v55, %v882_v22  ;;  %v8242_v14 = vcombine.low %v878_v55, %v882_v22  ;;  %v8013_v42 = vcombine.high %v647_v35, %v651_v36  ;;  %v667_v55 = vld [vmem:[#allocation8 + $0x638] sm:$0xff]  ;;  %v918_v22 = vld [vmem:[#allocation8 + $0xe10] sm:$0xff] }
 0x2a0   :  { %4034 = vmatpush1.bf16.msra.mxu0 %v8218_v50  ;;  %4065 = vmatprep.mubr.bf16.mxu0 %v10061_v44  ;;  %v8267_v50 = vcombine.high %v902_v37, %v906_v51  ;;  %v691_v35 = vld [vmem:[#allocation8 + $0x6f8] sm:$0xff]  ;;  %v942_v36 = vld [vmem:[#allocation8 + $0xed0] sm:$0xff] }
 0x2a1   :  { %4147 = vmatprep.mubr.bf16.mxu1 %v10036_v53  ;;  %4035 = vmatprep.subr.bf16.mxu0 %v8227_v54  ;;  %v7988_v53 = vcombine.low %v623_v3, %v627_v5  ;;  %v655_v54 = vld [vmem:[#allocation8 + $0x5d8] sm:$0xff]  ;;  %v8275_v3 = vcombine.high %v910_v59, %v914_v60 }
 0x2a2   :  { %4117 = vmatprep.subr.bf16.mxu1 %v7973_v58  ;;  %v8021_v7 = vcombine.high %v655_v54, %v659_v56  ;;  %v663_v5 = vld [vmem:[#allocation8 + $0x618] sm:$0xff] }
 0x2a3   :  { %4118 = vmatpush1.bf16.msra.mxu1 %v7972_v61 }
 0x2a4   :  { %4036 = vmatpush1.bf16.msra.mxu0 %v8226_v63  ;;  %4119 = vmatprep.subr.bf16.mxu1 %v7981_v0 }
 0x2a5   :  { %4037 = vmatprep.subr.bf16.mxu0 %v8235_v2  ;;  %v8266_v2 = vcombine.low %v902_v37, %v906_v51  ;;  %v946_v37 = vld [vmem:[#allocation8 + $0xef0] sm:$0xff]  ;;  %v8044_v51 = vcombine.low %v679_v26, %v683_v27 }
 0x2a7   :  { %4120 = vmatpush1.bf16.msra.mxu1 %v7980_v6  ;;  %v922_v6 = vld [vmem:[#allocation8 + $0xe30] sm:$0xff] }
 0x2a8   :  { %4038 = vmatpush1.bf16.msra.mxu0 %v8234_v8  ;;  %4121 = vmatprep.subr.bf16.mxu1 %v7989_v9  ;;  %v8020_v8 = vcombine.low %v655_v54, %v659_v56  ;;  %v8274_v9 = vcombine.low %v910_v59, %v914_v60  ;;  %v8283_v11 = vcombine.high %v918_v22, %v922_v6  ;;  %v703_v60 = vld [vmem:[#allocation8 + $0x758] sm:$0xff] }
 0x2a9   :  { %4039 = vmatprep.subr.bf16.mxu0 %v8243_v10  ;;  %v8029_v10 = vcombine.high %v663_v5, %v667_v55  ;;  %v8306_v56 = vcombine.low %v942_v36, %v946_v37 }
 0x2ab   :  { %4122 = vmatpush1.bf16.msra.mxu1 %v7988_v53  ;;  %v930_v53 = vld [vmem:[#allocation8 + $0xe70] sm:$0xff] }
 0x2ac   :  { %4040 = vmatpush1.bf16.msra.mxu0 %v8242_v14  ;;  %4123 = vmatprep.subr.bf16.mxu1 %v7997_v15  ;;  %v8028_v14 = vcombine.low %v663_v5, %v667_v55  ;;  %v8282_v15 = vcombine.low %v918_v22, %v922_v6  ;;  %v8291_v25 = vcombine.high %v926_v48, %v930_v53  ;;  %v711_v55 = vld [vmem:[#allocation8 + $0x798] sm:$0xff]  ;;  %v966_v6 = vld [vmem:[#allocation8 + $0xf90] sm:$0xff] }
 0x2ad   :  { %4041 = vmatprep.subr.bf16.mxu0 %v8251_v18  ;;  %v8037_v18 = vcombine.high %v671_v12, %v675_v13  ;;  %v715_v22 = vld [vmem:[#allocation8 + $0x7b8] sm:$0xff] }
 0x2ae   :  { %v719_v13 = vld [vmem:[#allocation8 + $0x7d8] sm:$0xff] }
 0x2af   :  { %4124 = vmatpush1.bf16.msra.mxu1 %v7996_v47  ;;  %v938_v47 = vld [vmem:[#allocation8 + $0xeb0] sm:$0xff] }
 0x2b0   :  { %4042 = vmatpush1.bf16.msra.mxu0 %v8250_v31  ;;  %4125 = vmatprep.subr.bf16.mxu1 %v8005_v52  ;;  %v8290_v31 = vcombine.low %v926_v48, %v930_v53  ;;  %v8045_v52 = vcombine.high %v679_v26, %v683_v27  ;;  %v8299_v32 = vcombine.high %v934_v28, %v938_v47  ;;  %v723_v48 = vld [vmem:[#allocation8 + $0x7f8] sm:$0xff]  ;;  %v974_v53 = vld [vmem:[#allocation8 + $0xfd0] sm:$0xff] }
 0x2b1   :  { %v3739_v45 = vpop.f32.mrb[4].mxu0  ;;  %4043 = vmatprep.subr.bf16.mxu0 %v8259_v33  ;;  %v687_v33 = vld [vmem:[#allocation8 + $0x6d8] sm:$0xff] }
 0x2b2   :  { %v10103_v57 = vadd.f32 %v3739_v45, %v3617_v40  ;;  %v3741_v58 = vpop.f32.mrb[5].mxu0  ;;  %v8053_v40 = vcombine.high %v687_v33, %v691_v35  ;;  %v950_v45 = vld [vmem:[#allocation8 + $0xf10] sm:$0xff]  ;;  %v8052_v54 = vcombine.low %v687_v33, %v691_v35  ;;  %v727_v27 = vld [vmem:[#allocation8 + $0x818] sm:$0xff] }
 0x2b3   :  { %v10105_v61 = vadd.f32 %v3741_v58, %v3619_v43  ;;  %v3743_v63 = vpop.f32.mrb[6].mxu0  ;;  %4126 = vmatpush1.bf16.msra.mxu1 %v8004_v39  ;;  %v8298_v39 = vcombine.low %v934_v28, %v938_v47  ;;  %v699_v43 = vld [vmem:[#allocation8 + $0x738] sm:$0xff]  ;;  %v8084_v47 = vcombine.low %v719_v13, %v723_v48 }
 0x2b4   :  { %4044 = vmatpush1.bf16.msra.mxu0 %v8258_v41  ;;  %v3744_v0 = vpop.f32.mrb[7].mxu0  ;;  %4127 = vmatprep.subr.bf16.mxu1 %v8013_v42  ;;  %v8307_v41 = vcombine.high %v942_v36, %v946_v37  ;;  %v695_v42 = vld [vmem:[#allocation8 + $0x718] sm:$0xff]  ;;  %v8994_v37 = vld [vmem:[#allocation11] ss:$28 sps:$4 sm:$0xff]  }
 0x2b5   :  { %4045 = vmatprep.subr.bf16.mxu0 %v8267_v50  ;;  %v954_v50 = vld [vmem:[#allocation8 + $0xf30] sm:$0xff]  ;;  %v8061_v58 = vcombine.high %v695_v42, %v699_v43  ;;  %v707_v63 = vld [vmem:[#allocation8 + $0x778] sm:$0xff]  ;;  %v4239_v35 = vmax.f32 %v10105_v61, 0.0 }
 0x2b6   :  { %v8315_v59 = vcombine.high %v950_v45, %v954_v50  ;;  %v962_v0 = vld [vmem:[#allocation8 + $0xf70] sm:$0xff]  ;;  %v731_v28 = vld [vmem:[#allocation8 + $0x838] sm:$0xff] }
 0x2b7   :  { %4128 = vmatpush1.bf16.msra.mxu1 %v8012_v4  ;;  %v958_v4 = vld [vmem:[#allocation8 + $0xf50] sm:$0xff]  ;;  %v739_v33 = vld [vmem:[#allocation8 + $0x878] sm:$0xff]  ;;  %v8092_v36 = vcombine.low %v727_v27, %v731_v28 }
 0x2b8   :  { %4046 = vmatpush1.bf16.msra.mxu0 %v8266_v2  ;;  %4129 = vmatprep.subr.bf16.mxu1 %v8021_v7  ;;  %v8060_v2 = vcombine.low %v695_v42, %v699_v43  ;;  %v8314_v7 = vcombine.low %v950_v45, %v954_v50  ;;  %v8323_v5 = vcombine.high %v958_v4, %v962_v0  ;;  %v8997_v61 = vld [vmem:[#allocation11 + $0x38] ss:$28 sps:$4 sm:$0xff]  }
 0x2b9   :  { %4047 = vmatprep.subr.bf16.mxu0 %v8275_v3  ;;  %v8069_v3 = vcombine.high %v703_v60, %v707_v63  ;;  %v10109_v42 = vpack.c.bf16 %v4239_v35, %v4239_v35  ;;  %v9002_v50 = vld [vmem:[#allocation11 + $0x74] ss:$28 sps:$4 sm:$0xff]  }
 0x2bb   :  { %4130 = vmatpush1.bf16.msra.mxu1 %v8020_v8  ;;  %v970_v8 = vld [vmem:[#allocation8 + $0xfb0] sm:$0xff] }
 0x2bc   :  { %4048 = vmatpush1.bf16.msra.mxu0 %v8274_v9  ;;  %4131 = vmatprep.subr.bf16.mxu1 %v8029_v10  ;;  %v8068_v9 = vcombine.low %v703_v60, %v707_v63  ;;  %v8322_v10 = vcombine.low %v958_v4, %v962_v0  ;;  %v8331_v12 = vcombine.high %v966_v6, %v970_v8  ;;  %v9005_v60 = vld [vmem:[#allocation11 + $0xac] ss:$28 sps:$4 sm:$0xff]   ;;  %v759_v63 = vld [vmem:[#allocation8 + $0x918] sm:$0xff] }
 0x2bd   :  { %4049 = vmatprep.subr.bf16.mxu0 %v8283_v11  ;;  %v8077_v11 = vcombine.high %v711_v55, %v715_v22  ;;  %v9003_v0 = vld [vmem:[#allocation11 + $0xa8] ss:$28 sps:$4 sm:$0xff]  }
 0x2bf   :  { %4132 = vmatpush1.bf16.msra.mxu1 %v8028_v14  ;;  %v978_v14 = vld [vmem:[#allocation8 + $0xff0] sm:$0xff] }
 0x2c0   :  { %4050 = vmatpush1.bf16.msra.mxu0 %v8282_v15  ;;  %4133 = vmatprep.subr.bf16.mxu1 %v8037_v18  ;;  %v8076_v15 = vcombine.low %v711_v55, %v715_v22  ;;  %v8330_v18 = vcombine.low %v966_v6, %v970_v8  ;;  %v8339_v26 = vcombine.high %v974_v53, %v978_v14  ;;  %v9006_v22 = vld [vmem:[#allocation11 + $0xe0] ss:$28 sps:$4 sm:$0xff]  }
 0x2c1   :  { %4051 = vmatprep.subr.bf16.mxu0 %v8291_v25  ;;  %v8085_v25 = vcombine.high %v719_v13, %v723_v48  ;;  %v9011_v8 = vld [vmem:[#allocation11 + $0x11c] ss:$28 sps:$4 sm:$0xff]   ;;  %v9014_v48 = vld [vmem:[#allocation11 + $0x154] ss:$28 sps:$4 sm:$0xff]  }
 0x2c3   :  { %4134 = vmatpush1.bf16.msra.mxu1 %v8036_v30  ;;  %v8338_v30 = vcombine.low %v974_v53, %v978_v14  ;;  %v783_v53 = vld [vmem:[#allocation8 + $0x9d8] sm:$0xff] }
 0x2c4   :  { %4052 = vmatpush1.bf16.msra.mxu0 %v8290_v31  ;;  %4135 = vmatprep.subr.bf16.mxu1 %v8045_v52  ;;  %v8093_v31 = vcombine.high %v727_v27, %v731_v28  ;;  %v8996_v52 = vld [vmem:[#allocation11 + $0x4] ss:$28 sps:$4 sm:$0xff]   ;;  %v787_v14 = vld [vmem:[#allocation8 + $0x9f8] sm:$0xff] }
 0x2c5   :  { %4053 = vmatprep.subr.bf16.mxu0 %v8299_v32  ;;  %v735_v32 = vld [vmem:[#allocation8 + $0x858] sm:$0xff] }
 0x2c6   :  { %v8100_v43 = vcombine.low %v735_v32, %v739_v33  ;;  %v791_v27 = vld [vmem:[#allocation8 + $0xa18] sm:$0xff] }
 0x2c7   :  { %4136 = vmatpush1.bf16.msra.mxu1 %v8044_v51  ;;  %v8101_v51 = vcombine.high %v735_v32, %v739_v33  ;;  %v795_v28 = vld [vmem:[#allocation8 + $0xa38] sm:$0xff] }
 0x2c8   :  { %4054 = vmatpush1.bf16.msra.mxu0 %v8298_v39  ;;  %4137 = vmatprep.subr.bf16.mxu1 %v8053_v40  ;;  %v743_v39 = vld [vmem:[#allocation8 + $0x898] sm:$0xff]  ;;  %v8156_v35 = vcombine.low %v791_v27, %v795_v28 }
 0x2c9   :  { %4055 = vmatprep.subr.bf16.mxu0 %v8307_v41  ;;  %v747_v40 = vld [vmem:[#allocation8 + $0x8b8] sm:$0xff]  ;;  %v8999_v41 = vld [vmem:[#allocation11 + $0x3c] ss:$28 sps:$4 sm:$0xff]  }
 0x2ca   :  { %v8109_v45 = vcombine.high %v743_v39, %v747_v40  ;;  %v799_v32 = vld [vmem:[#allocation8 + $0xa58] sm:$0xff] }
 0x2cb   :  { %4138 = vmatpush1.bf16.msra.mxu1 %v8052_v54  ;;  %v751_v54 = vld [vmem:[#allocation8 + $0x8d8] sm:$0xff] }
 0x2cc   :  { %4056 = vmatpush1.bf16.msra.mxu0 %v8306_v56  ;;  %4139 = vmatprep.subr.bf16.mxu1 %v8061_v58  ;;  %v755_v56 = vld [vmem:[#allocation8 + $0x8f8] sm:$0xff] }
 0x2cd   :  { %4057 = vmatprep.subr.bf16.mxu0 %v8315_v59  ;;  %v9000_v58 = vld [vmem:[#allocation11 + $0x70] ss:$28 sps:$4 sm:$0xff]   ;;  %v8117_v59 = vcombine.high %v751_v54, %v755_v56  ;;  %v8116_v4 = vcombine.low %v751_v54, %v755_v56 }
 0x2ce   :  { %v803_v33 = vld [vmem:[#allocation8 + $0xa78] sm:$0xff] }
 0x2cf   :  { %4140 = vmatpush1.bf16.msra.mxu1 %v8060_v2  ;;  %v819_v54 = vld [vmem:[#allocation8 + $0xaf8] sm:$0xff] }
 0x2d0   :  { %4058 = vmatpush1.bf16.msra.mxu0 %v8314_v7  ;;  %4141 = vmatprep.subr.bf16.mxu1 %v8069_v3  ;;  %v9008_v7 = vld [vmem:[#allocation11 + $0xe4] ss:$28 sps:$4 sm:$0xff]   ;;  %v767_v3 = vld [vmem:[#allocation8 + $0x958] sm:$0xff] }
 0x2d1   :  { %4059 = vmatprep.subr.bf16.mxu0 %v8323_v5  ;;  %v771_v5 = vld [vmem:[#allocation8 + $0x978] sm:$0xff] }
 0x2d2   :  { %v8133_v6 = vcombine.high %v767_v3, %v771_v5 }
 0x2d3   :  { %4142 = vmatpush1.bf16.msra.mxu1 %v8068_v9  ;;  %v775_v9 = vld [vmem:[#allocation8 + $0x998] sm:$0xff] }
 0x2d4   :  { %4060 = vmatpush1.bf16.msra.mxu0 %v8322_v10  ;;  %4143 = vmatprep.subr.bf16.mxu1 %v8077_v11  ;;  %v779_v10 = vld [vmem:[#allocation8 + $0x9b8] sm:$0xff]  ;;  %v8132_v11 = vcombine.low %v767_v3, %v771_v5 }
 0x2d5   :  { %4061 = vmatprep.subr.bf16.mxu0 %v8331_v12  ;;  %v9009_v12 = vld [vmem:[#allocation11 + $0x118] ss:$28 sps:$4 sm:$0xff]   ;;  %v8141_v13 = vcombine.high %v775_v9, %v779_v10 }
 0x2d6   :  { %v835_v3 = vld [vmem:[#allocation8 + $0xb78] sm:$0xff] }
 0x2d7   :  { %4144 = vmatpush1.bf16.msra.mxu1 %v8076_v15  ;;  %v8140_v15 = vcombine.low %v775_v9, %v779_v10  ;;  %v843_v9 = vld [vmem:[#allocation8 + $0xbb8] sm:$0xff] }
 0x2d8   :  { %4062 = vmatpush1.bf16.msra.mxu0 %v8330_v18  ;;  %4145 = vmatprep.subr.bf16.mxu1 %v8085_v25  ;;  %v9012_v18 = vld [vmem:[#allocation11 + $0x150] ss:$28 sps:$4 sm:$0xff]   ;;  %v8149_v25 = vcombine.high %v783_v53, %v787_v14 }
 0x2d9   :  { %4063 = vmatprep.subr.bf16.mxu0 %v8339_v26  ;;  %v9017_v26 = vld [vmem:[#allocation11 + $0x18c] ss:$28 sps:$4 sm:$0xff]  }
 0x2db   :  { %4146 = vmatpush1.bf16.msra.mxu1 %v8084_v47  ;;  %v8148_v47 = vcombine.low %v783_v53, %v787_v14  ;;  %v851_v53 = vld [vmem:[#allocation8 + $0xbf8] sm:$0xff] }
 0x2dc   :  { %4064 = vmatpush1.bf16.msra.mxu0 %v8338_v30  ;;  %4156 = vmatprep.subr.bf16.mxu1 %v8093_v31  ;;  %v9015_v30 = vld [vmem:[#allocation11 + $0x188] ss:$28 sps:$4 sm:$0xff]   ;;  %v8157_v31 = vcombine.high %v791_v27, %v795_v28  ;;  %v859_v27 = vld [vmem:[#allocation8 + $0xc38] sm:$0xff] }
 0x2dd   :  { %7107 = vmatprep.subr.bf16.mxu0 %v8996_v52  ;;  %v9020_v52 = vld [vmem:[#allocation11 + $0x1c4] ss:$28 sps:$4 sm:$0xff]  }
 0x2de   :  { %4148 = vmatmul.mubr.bf16.vlgmr.msra.gmra.mrb[12].mxu1 %v10030_v49  ;;  %v8108_v49 = vcombine.low %v743_v39, %v747_v40  ;;  %v807_v39 = vld [vmem:[#allocation8 + $0xa98] sm:$0xff] }
 0x2df   :  { %4066 = vmatmul.mubr.bf16.vlgmr.msra.gmra.mrb[8].mxu0 %v10073_v16  ;;  %4157 = vmatpush1.bf16.msra.mxu1 %v8092_v36  ;;  %v9018_v36 = vld [vmem:[#allocation11 + $0x1c0] ss:$28 sps:$4 sm:$0xff]   ;;  %v811_v40 = vld [vmem:[#allocation8 + $0xab8] sm:$0xff] }
 0x2e0   :  { %4188 = vmatprep.mubr.bf16.mxu1 %v10044_v1  ;;  %7108 = vmatpush1.bf16.msra.mxu0 %v8994_v37  ;;  %v763_v1 = vld [vmem:[#allocation8 + $0x938] sm:$0xff]  ;;  %v8165_v37 = vcombine.high %v799_v32, %v803_v33  ;;  %v8172_v56 = vcombine.low %v807_v39, %v811_v40 }
 0x2e1   :  { %7139 = vmatprep.mubr.bf16.mxu0 %v10109_v42  ;;  %4158 = vmatprep.subr.bf16.mxu1 %v8101_v51  ;;  %v8125_v2 = vcombine.high %v759_v63, %v763_v1  ;;  %v8124_v55 = vcombine.low %v759_v63, %v763_v1  ;;  %v9023_v51 = vld [vmem:[#allocation11 + $0x1fc] ss:$28 sps:$4 sm:$0xff]   ;;  %v827_v63 = vld [vmem:[#allocation8 + $0xb38] sm:$0xff] }
 0x2e2   :  { %7109 = vmatprep.subr.bf16.mxu0 %v8999_v41  ;;  %v8164_v41 = vcombine.low %v799_v32, %v803_v33  ;;  %v863_v32 = vld [vmem:[#allocation8 + $0xc58] sm:$0xff] }
 0x2e3   :  { %4159 = vmatpush1.bf16.msra.mxu1 %v8100_v43  ;;  %v9021_v43 = vld [vmem:[#allocation11 + $0x1f8] ss:$28 sps:$4 sm:$0xff]  }
 0x2e4   :  { %7110 = vmatpush1.bf16.msra.mxu0 %v8997_v61  ;;  %4160 = vmatprep.subr.bf16.mxu1 %v8109_v45  ;;  %v8173_v61 = vcombine.high %v807_v39, %v811_v40  ;;  %v9026_v45 = vld [vmem:[#allocation11 + $0x234] ss:$28 sps:$4 sm:$0xff]   ;;  %v9047_v39 = vld [vmem:[#allocation11 + $0x3bc] ss:$28 sps:$4 sm:$0xff]  }
 0x2e5   :  { %7111 = vmatprep.subr.bf16.mxu0 %v9002_v50  ;;  %v815_v50 = vld [vmem:[#allocation8 + $0xad8] sm:$0xff] }
 0x2e6   :  { %v8180_v1 = vcombine.low %v815_v50, %v819_v54  ;;  %v867_v33 = vld [vmem:[#allocation8 + $0xc78] sm:$0xff] }
 0x2e7   :  { %4161 = vmatpush1.bf16.msra.mxu1 %v8108_v49  ;;  %v9024_v49 = vld [vmem:[#allocation11 + $0x230] ss:$28 sps:$4 sm:$0xff]  }
 0x2e8   :  { %7112 = vmatpush1.bf16.msra.mxu0 %v9000_v58  ;;  %4162 = vmatprep.subr.bf16.mxu1 %v8117_v59  ;;  %v8181_v58 = vcombine.high %v815_v50, %v819_v54  ;;  %v9029_v59 = vld [vmem:[#allocation11 + $0x26c] ss:$28 sps:$4 sm:$0xff]   ;;  %v871_v40 = vld [vmem:[#allocation8 + $0xc98] sm:$0xff] }
 0x2e9   :  { %7113 = vmatprep.subr.bf16.mxu0 %v9005_v60  ;;  %v823_v60 = vld [vmem:[#allocation8 + $0xb18] sm:$0xff] }
 0x2ea   :  { %v8188_v5 = vcombine.low %v823_v60, %v827_v63  ;;  %v879_v50 = vld [vmem:[#allocation8 + $0xcd8] sm:$0xff] }
 0x2eb   :  { %4163 = vmatpush1.bf16.msra.mxu1 %v8116_v4  ;;  %v9027_v4 = vld [vmem:[#allocation11 + $0x268] ss:$28 sps:$4 sm:$0xff]   ;;  %v883_v54 = vld [vmem:[#allocation8 + $0xcf8] sm:$0xff] }
 0x2ec   :  { %7114 = vmatpush1.bf16.msra.mxu0 %v9003_v0  ;;  %4164 = vmatprep.subr.bf16.mxu1 %v8125_v2  ;;  %v8189_v0 = vcombine.high %v823_v60, %v827_v63  ;;  %v9032_v2 = vld [vmem:[#allocation11 + $0x2a4] ss:$28 sps:$4 sm:$0xff]   ;;  %v891_v60 = vld [vmem:[#allocation8 + $0xd38] sm:$0xff] }
 0x2ed   :  { %7115 = vmatprep.subr.bf16.mxu0 %v9008_v7  ;;  %v831_v7 = vld [vmem:[#allocation8 + $0xb58] sm:$0xff]  ;;  %v9051_v63 = vld [vmem:[#allocation11 + $0x428] ss:$28 sps:$4 sm:$0xff]  }
 0x2ee   :  { %v8196_v10 = vcombine.low %v831_v7, %v835_v3 }
 0x2ef   :  { %4165 = vmatpush1.bf16.msra.mxu1 %v8124_v55  ;;  %v9030_v55 = vld [vmem:[#allocation11 + $0x2a0] ss:$28 sps:$4 sm:$0xff]  }
 0x2f0   :  { %7116 = vmatpush1.bf16.msra.mxu0 %v9006_v22  ;;  %4166 = vmatprep.subr.bf16.mxu1 %v8133_v6  ;;  %v8197_v22 = vcombine.high %v831_v7, %v835_v3  ;;  %v9035_v6 = vld [vmem:[#allocation11 + $0x2dc] ss:$28 sps:$4 sm:$0xff]  }
 0x2f1   :  { %7117 = vmatprep.subr.bf16.mxu0 %v9011_v8  ;;  %v839_v8 = vld [vmem:[#allocation8 + $0xb98] sm:$0xff]  ;;  %v9054_v3 = vld [vmem:[#allocation11 + $0x460] ss:$28 sps:$4 sm:$0xff]  }
 0x2f2   :  { %v8204_v14 = vcombine.low %v839_v8, %v843_v9 }
 0x2f3   :  { %4167 = vmatpush1.bf16.msra.mxu1 %v8132_v11  ;;  %v9033_v11 = vld [vmem:[#allocation11 + $0x2d8] ss:$28 sps:$4 sm:$0xff]  }
 0x2f4   :  { %7118 = vmatpush1.bf16.msra.mxu0 %v9009_v12  ;;  %4168 = vmatprep.subr.bf16.mxu1 %v8141_v13  ;;  %v8205_v12 = vcombine.high %v839_v8, %v843_v9  ;;  %v9038_v13 = vld [vmem:[#allocation11 + $0x314] ss:$28 sps:$4 sm:$0xff]   ;;  %v997_v8 = vrot.slane %v10095_v17, %v10011_v24 }
 0x2f5   :  { %7119 = vmatprep.subr.bf16.mxu0 %v9014_v48  ;;  %v847_v48 = vld [vmem:[#allocation8 + $0xbd8] sm:$0xff] }
 0x2f6   :  { %v8212_v28 = vcombine.low %v847_v48, %v851_v53 }
 0x2f7   :  { %4169 = vmatpush1.bf16.msra.mxu1 %v8140_v15  ;;  %v9036_v15 = vld [vmem:[#allocation11 + $0x310] ss:$28 sps:$4 sm:$0xff]  }
 0x2f8   :  { %7120 = vmatpush1.bf16.msra.mxu0 %v9012_v18  ;;  %4170 = vmatprep.subr.bf16.mxu1 %v8149_v25  ;;  %v8213_v18 = vcombine.high %v847_v48, %v851_v53  ;;  %v9041_v25 = vld [vmem:[#allocation11 + $0x34c] ss:$28 sps:$4 sm:$0xff]   ;;  %v911_v48 = vld [vmem:[#allocation8 + $0xdd8] sm:$0xff] }
 0x2f9   :  { %7121 = vmatprep.subr.bf16.mxu0 %v9017_v26  ;;  %v855_v26 = vld [vmem:[#allocation8 + $0xc18] sm:$0xff] }
 0x2fa   :  { %v915_v53 = vld [vmem:[#allocation8 + $0xdf8] sm:$0xff] }
 0x2fb   :  { %4171 = vmatpush1.bf16.msra.mxu1 %v8148_v47  ;;  %v9039_v47 = vld [vmem:[#allocation11 + $0x348] ss:$28 sps:$4 sm:$0xff]  }
 0x2fc   :  { %7122 = vmatpush1.bf16.msra.mxu0 %v9015_v30  ;;  %4172 = vmatprep.subr.bf16.mxu1 %v8157_v31  ;;  %v8221_v30 = vcombine.high %v855_v26, %v859_v27  ;;  %v4238_v31 = vmax.f32 %v10103_v57, 0.0  ;;  %v8228_v57 = vcombine.low %v863_v32, %v867_v33 }
 0x2fd   :  { %7123 = vmatprep.subr.bf16.mxu0 %v9020_v52  ;;  %v9044_v52 = vld [vmem:[#allocation11 + $0x384] ss:$28 sps:$4 sm:$0xff]  }
 0x2ff   :  { %4173 = vmatpush1.bf16.msra.mxu1 %v8156_v35  ;;  %v8220_v35 = vcombine.low %v855_v26, %v859_v27  ;;  %v9060_v27 = vld [vmem:[#allocation11 + $0x4d0] ss:$28 sps:$4 sm:$0xff]  }
 0x300   :  { %7124 = vmatpush1.bf16.msra.mxu0 %v9018_v36  ;;  %4174 = vmatprep.subr.bf16.mxu1 %v8165_v37  ;;  %v9042_v36 = vld [vmem:[#allocation11 + $0x380] ss:$28 sps:$4 sm:$0xff]   ;;  %v10115_v37 = vpack.c.bf16 %v4238_v31, %v4238_v31  ;;  %v919_v31 = vld [vmem:[#allocation8 + $0xe18] sm:$0xff] }
 0x301   :  { %7125 = vmatprep.subr.bf16.mxu0 %v9023_v51  ;;  %v8229_v51 = vcombine.high %v863_v32, %v867_v33  ;;  %v8276_v33 = vcombine.low %v911_v48, %v915_v53 }
 0x303   :  { %4175 = vmatpush1.bf16.msra.mxu1 %v8164_v41  ;;  %v875_v41 = vld [vmem:[#allocation8 + $0xcb8] sm:$0xff] }
 0x304   :  { %7126 = vmatpush1.bf16.msra.mxu0 %v9021_v43  ;;  %4176 = vmatprep.subr.bf16.mxu1 %v8173_v61  ;;  %v9045_v43 = vld [vmem:[#allocation11 + $0x3b8] ss:$28 sps:$4 sm:$0xff]   ;;  %v8237_v61 = vcombine.high %v871_v40, %v875_v41 }
 0x305   :  { %7127 = vmatprep.subr.bf16.mxu0 %v9026_v45  ;;  %v9050_v45 = vld [vmem:[#allocation11 + $0x3f4] ss:$28 sps:$4 sm:$0xff]  }
 0x307   :  { %4177 = vmatpush1.bf16.msra.mxu1 %v8172_v56  ;;  %v8236_v56 = vcombine.low %v871_v40, %v875_v41  ;;  %v931_v40 = vld [vmem:[#allocation8 + $0xe78] sm:$0xff] }
 0x308   :  { %7128 = vmatpush1.bf16.msra.mxu0 %v9024_v49  ;;  %4178 = vmatprep.subr.bf16.mxu1 %v8181_v58  ;;  %v9048_v49 = vld [vmem:[#allocation11 + $0x3f0] ss:$28 sps:$4 sm:$0xff]  }
 0x309   :  { %7129 = vmatprep.subr.bf16.mxu0 %v9029_v59  ;;  %v9053_v58 = vld [vmem:[#allocation11 + $0x42c] ss:$28 sps:$4 sm:$0xff]   ;;  %v887_v59 = vld [vmem:[#allocation8 + $0xd18] sm:$0xff] }
 0x30a   :  { %v8252_v7 = vcombine.low %v887_v59, %v891_v60 }
 0x30b   :  { %4179 = vmatpush1.bf16.msra.mxu1 %v8180_v1  ;;  %v8253_v1 = vcombine.high %v887_v59, %v891_v60  ;;  %v947_v59 = vld [vmem:[#allocation8 + $0xef8] sm:$0xff] }
 0x30c   :  { %7130 = vmatpush1.bf16.msra.mxu0 %v9027_v4  ;;  %4180 = vmatprep.subr.bf16.mxu1 %v8189_v0  ;;  %v9056_v4 = vld [vmem:[#allocation11 + $0x464] ss:$28 sps:$4 sm:$0xff]   ;;  %v895_v0 = vld [vmem:[#allocation8 + $0xd58] sm:$0xff] }
 0x30d   :  { %7131 = vmatprep.subr.bf16.mxu0 %v9032_v2  ;;  %v899_v2 = vld [vmem:[#allocation8 + $0xd78] sm:$0xff] }
 0x30e   :  { %v8260_v9 = vcombine.low %v895_v0, %v899_v2 }
 0x30f   :  { %4181 = vmatpush1.bf16.msra.mxu1 %v8188_v5  ;;  %v8261_v5 = vcombine.high %v895_v0, %v899_v2  ;;  %v955_v0 = vld [vmem:[#allocation8 + $0xf38] sm:$0xff] }
 0x310   :  { %7132 = vmatpush1.bf16.msra.mxu0 %v9030_v55  ;;  %4182 = vmatprep.subr.bf16.mxu1 %v8197_v22  ;;  %v9059_v55 = vld [vmem:[#allocation11 + $0x49c] ss:$28 sps:$4 sm:$0xff]   ;;  %v903_v22 = vld [vmem:[#allocation8 + $0xd98] sm:$0xff] }
 0x311   :  { %7133 = vmatprep.subr.bf16.mxu0 %v9035_v6  ;;  %v907_v6 = vld [vmem:[#allocation8 + $0xdb8] sm:$0xff] }
 0x313   :  { %4183 = vmatpush1.bf16.msra.mxu1 %v8196_v10  ;;  %v9057_v10 = vld [vmem:[#allocation11 + $0x498] ss:$28 sps:$4 sm:$0xff]  }
 0x314   :  { %7134 = vmatpush1.bf16.msra.mxu0 %v9033_v11  ;;  %4184 = vmatprep.subr.bf16.mxu1 %v8205_v12  ;;  %v8269_v11 = vcombine.high %v903_v22, %v907_v6 }
 0x315   :  { %7135 = vmatprep.subr.bf16.mxu0 %v9038_v13  ;;  %v9062_v13 = vld [vmem:[#allocation11 + $0x4d4] ss:$28 sps:$4 sm:$0xff]  }
 0x317   :  { %4185 = vmatpush1.bf16.msra.mxu1 %v8204_v14 }
 0x318   :  { %7136 = vmatpush1.bf16.msra.mxu0 %v9036_v15  ;;  %4186 = vmatprep.subr.bf16.mxu1 %v8213_v18 }
 0x319   :  { %7137 = vmatprep.subr.bf16.mxu0 %v9041_v25  ;;  %v8268_v25 = vcombine.low %v903_v22, %v907_v6  ;;  %v963_v22 = vld [vmem:[#allocation8 + $0xf78] sm:$0xff] }
 0x31b   :  { %4187 = vmatpush1.bf16.msra.mxu1 %v8212_v28  ;;  %v8277_v28 = vcombine.high %v911_v48, %v915_v53  ;;  %v9081_v53 = vld [vmem:[#allocation11 + $0x658] ss:$28 sps:$4 sm:$0xff]  }
 0x31c   :  { %7138 = vmatpush1.bf16.msra.mxu0 %v9039_v47  ;;  %4197 = vmatprep.subr.bf16.mxu1 %v8221_v30  ;;  %v9065_v30 = vld [vmem:[#allocation11 + $0x50c] ss:$28 sps:$4 sm:$0xff]  }
 0x31d   :  { %7148 = vmatprep.subr.bf16.mxu0 %v9044_v52  ;;  %v923_v52 = vld [vmem:[#allocation8 + $0xe38] sm:$0xff] }
 0x31e   :  { %4189 = vmatmul.mubr.bf16.vlgmr.msra.gmra.mrb[12].mxu1 %v10059_v34  ;;  %v8245_v34 = vcombine.high %v879_v50, %v883_v54  ;;  %v8284_v41 = vcombine.low %v919_v31, %v923_v52 }
 0x31f   :  { %7140 = vmatmul.mubr.bf16.vlgmr.msra.gmra.mrb[12].mxu0 %v10115_v37  ;;  %4198 = vmatpush1.bf16.msra.mxu1 %v8220_v35  ;;  %v9063_v35 = vld [vmem:[#allocation11 + $0x508] ss:$28 sps:$4 sm:$0xff]  }
 0x320   :  { %4229 = vmatprep.mubr.bf16.mxu1 %v10061_v44  ;;  %7149 = vmatpush1.bf16.msra.mxu0 %v9042_v36  ;;  %v8244_v44 = vcombine.low %v879_v50, %v883_v54  ;;  %v8285_v36 = vcombine.high %v919_v31, %v923_v52  ;;  %v939_v50 = vld [vmem:[#allocation8 + $0xeb8] sm:$0xff]  ;;  %v9089_v31 = vld [vmem:[#allocation11 + $0x6cc] ss:$28 sps:$4 sm:$0xff]  }
 0x321   :  { %4199 = vmatprep.subr.bf16.mxu1 %v8229_v51  ;;  %7150 = vmatprep.subr.bf16.mxu0 %v9047_v39  ;;  %v9068_v51 = vld [vmem:[#allocation11 + $0x544] ss:$28 sps:$4 sm:$0xff]   ;;  %v927_v39 = vld [vmem:[#allocation8 + $0xe58] sm:$0xff] }
 0x322   :  { %v8292_v54 = vcombine.low %v927_v39, %v931_v40 }
 0x323   :  { %4200 = vmatpush1.bf16.msra.mxu1 %v8228_v57  ;;  %v9066_v57 = vld [vmem:[#allocation11 + $0x540] ss:$28 sps:$4 sm:$0xff]  }
 0x324   :  { %7151 = vmatpush1.bf16.msra.mxu0 %v9045_v43  ;;  %4201 = vmatprep.subr.bf16.mxu1 %v8237_v61  ;;  %v8293_v43 = vcombine.high %v927_v39, %v931_v40  ;;  %v9071_v61 = vld [vmem:[#allocation11 + $0x57c] ss:$28 sps:$4 sm:$0xff]   ;;  %v9095_v39 = vld [vmem:[#allocation11 + $0x44] ss:$28 sps:$4 sm:$0xff]  }
 0x325   :  { %7152 = vmatprep.subr.bf16.mxu0 %v9050_v45  ;;  %v935_v45 = vld [vmem:[#allocation8 + $0xe98] sm:$0xff] }
 0x326   :  { %v8300_v60 = vcombine.low %v935_v45, %v939_v50 }
 0x327   :  { %4202 = vmatpush1.bf16.msra.mxu1 %v8236_v56  ;;  %v9069_v56 = vld [vmem:[#allocation11 + $0x578] ss:$28 sps:$4 sm:$0xff]  }
 0x328   :  { %7153 = vmatpush1.bf16.msra.mxu0 %v9048_v49  ;;  %4203 = vmatprep.subr.bf16.mxu1 %v8245_v34  ;;  %v8301_v49 = vcombine.high %v935_v45, %v939_v50  ;;  %v9074_v34 = vld [vmem:[#allocation11 + $0x5b4] ss:$28 sps:$4 sm:$0xff]  }
 0x329   :  { %7154 = vmatprep.subr.bf16.mxu0 %v9053_v58  ;;  %v943_v58 = vld [vmem:[#allocation8 + $0xed8] sm:$0xff] }
 0x32a   :  { %v8308_v2 = vcombine.low %v943_v58, %v947_v59  ;;  %v9125_v45 = vld [vmem:[#allocation11 + $0x774] ss:$28 sps:$4 sm:$0xff]  }
 0x32b   :  { %4204 = vmatpush1.bf16.msra.mxu1 %v8244_v44  ;;  %v9072_v44 = vld [vmem:[#allocation11 + $0x5b0] ss:$28 sps:$4 sm:$0xff]   ;;  %v9096_v50 = vld [vmem:[#allocation11 + $0x78] ss:$28 sps:$4 sm:$0xff]  }
 0x32c   :  { %7155 = vmatpush1.bf16.msra.mxu0 %v9051_v63  ;;  %4205 = vmatprep.subr.bf16.mxu1 %v8253_v1  ;;  %v8309_v63 = vcombine.high %v943_v58, %v947_v59  ;;  %v9077_v1 = vld [vmem:[#allocation11 + $0x5ec] ss:$28 sps:$4 sm:$0xff]   ;;  %v9137_v59 = vld [vmem:[#allocation11 + $0x7e4] ss:$28 sps:$4 sm:$0xff]  }
 0x32d   :  { %7156 = vmatprep.subr.bf16.mxu0 %v9056_v4  ;;  %v951_v4 = vld [vmem:[#allocation8 + $0xf18] sm:$0xff]  ;;  %v9129_v58 = vld [vmem:[#allocation11 + $0x7a8] ss:$28 sps:$4 sm:$0xff]  }
 0x32e   :  { %v8316_v6 = vcombine.low %v951_v4, %v955_v0 }
 0x32f   :  { %4206 = vmatpush1.bf16.msra.mxu1 %v8252_v7  ;;  %v9075_v7 = vld [vmem:[#allocation11 + $0x5e8] ss:$28 sps:$4 sm:$0xff]  }
 0x330   :  { %7157 = vmatpush1.bf16.msra.mxu0 %v9054_v3  ;;  %4207 = vmatprep.subr.bf16.mxu1 %v8261_v5  ;;  %v8317_v3 = vcombine.high %v951_v4, %v955_v0  ;;  %v9080_v5 = vld [vmem:[#allocation11 + $0x624] ss:$28 sps:$4 sm:$0xff]   ;;  %v9110_v0 = vld [vmem:[#allocation11 + $0x15c] ss:$28 sps:$4 sm:$0xff]  }
 0x331   :  { %v10122_v12 = vpop.f32.mrb[8].mxu1  ;;  %7158 = vmatprep.subr.bf16.mxu0 %v9059_v55  ;;  %v959_v55 = vld [vmem:[#allocation8 + $0xf58] sm:$0xff]  ;;  %v9105_v4 = vld [vmem:[#allocation11 + $0x120] ss:$28 sps:$4 sm:$0xff]  }
 0x332   :  { %v3905_v14 = vpop.f32.mrb[9].mxu1  ;;  %v8324_v48 = vcombine.low %v959_v55, %v963_v22 }
 0x333   :  { %v8890_v15 = vadd.f32 %v3905_v14, %v997_v8  ;;  %v3907_v18 = vpop.f32.mrb[10].mxu1  ;;  %4208 = vmatpush1.bf16.msra.mxu1 %v8260_v9  ;;  %v9078_v8 = vld [vmem:[#allocation11 + $0x620] ss:$28 sps:$4 sm:$0xff]   ;;  %v8325_v9 = vcombine.high %v959_v55, %v963_v22  ;;  %v9147_v55 = vld [vmem:[#allocation11 + $0x850] ss:$28 sps:$4 sm:$0xff]  }
 0x334   :  { %7159 = vmatpush1.bf16.msra.mxu0 %v9057_v10  ;;  %v3908_v26 = vpop.f32.mrb[11].mxu1  ;;  %4209 = vmatprep.subr.bf16.mxu1 %v8269_v11  ;;  %v9083_v10 = vld [vmem:[#allocation11 + $0x65c] ss:$28 sps:$4 sm:$0xff]   ;;  %v967_v11 = vld [vmem:[#allocation8 + $0xf98] sm:$0xff]  ;;  %v9155_v22 = vld [vmem:[#allocation11 + $0x88c] ss:$28 sps:$4 sm:$0xff]  }
 0x335   :  { %v4241_v47 = vmax.f32 %v8890_v15, 0.0  ;;  %7160 = vmatprep.subr.bf16.mxu0 %v9062_v13  ;;  %v971_v13 = vld [vmem:[#allocation8 + $0xfb8] sm:$0xff]  ;;  %v993_v15 = vrot.slane %v10095_v17, %v10003_v21  ;;  %v9092_v17 = vld [vmem:[#allocation11 + $0xc] ss:$28 sps:$4 sm:$0xff]  }
 0x336   :  { %v8333_v14 = vcombine.high %v967_v11, %v971_v13  ;;  %v9086_v18 = vld [vmem:[#allocation11 + $0x694] ss:$28 sps:$4 sm:$0xff]  }
 0x337   :  { %v10124_v32 = vpack.c.bf16 %v4241_v47, %v4241_v47  ;;  %4210 = vmatpush1.bf16.msra.mxu1 %v8268_v25  ;;  %v975_v25 = vld [vmem:[#allocation8 + $0xfd8] sm:$0xff] }
 0x338   :  { %7161 = vmatpush1.bf16.msra.mxu0 %v9060_v27  ;;  %4211 = vmatprep.subr.bf16.mxu1 %v8277_v28  ;;  %v979_v26 = vld [vmem:[#allocation8 + $0xff8] sm:$0xff]  ;;  %v8332_v27 = vcombine.low %v967_v11, %v971_v13  ;;  %v9120_v11 = vld [vmem:[#allocation11 + $0x1c8] ss:$28 sps:$4 sm:$0xff]  }
 0x339   :  { %7180 = vmatprep.mubr.bf16.mxu0 %v10124_v32  ;;  %7162 = vmatprep.subr.bf16.mxu0 %v9065_v30  ;;  %v9084_v28 = vld [vmem:[#allocation11 + $0x690] ss:$28 sps:$4 sm:$0xff]   ;;  %v8341_v47 = vcombine.high %v975_v25, %v979_v26  ;;  %v8889_v30 = vadd.f32 %v10122_v12, %v993_v15  ;;  %v8340_v52 = vcombine.low %v975_v25, %v979_v26  ;;  %v9119_v12 = vld [vmem:[#allocation11 + $0x73c] ss:$28 sps:$4 sm:$0xff]   ;;  %v9128_v13 = vld [vmem:[#allocation11 + $0x204] ss:$28 sps:$4 sm:$0xff]  }
 0x33a   :  { %v9134_v15 = vld [vmem:[#allocation11 + $0x23c] ss:$28 sps:$4 sm:$0xff]   ;;  %v9173_v25 = vld [vmem:[#allocation11 + $0x934] ss:$28 sps:$4 sm:$0xff]  }
 0x33b   :  { %4212 = vmatpush1.bf16.msra.mxu1 %v8276_v33  ;;  %v9087_v33 = vld [vmem:[#allocation11 + $0x6c8] ss:$28 sps:$4 sm:$0xff]   ;;  %v9132_v26 = vld [vmem:[#allocation11 + $0x238] ss:$28 sps:$4 sm:$0xff]  }
 0x33c   :  { %7163 = vmatpush1.bf16.msra.mxu0 %v9063_v35  ;;  %4213 = vmatprep.subr.bf16.mxu1 %v8285_v36  ;;  %v4240_v35 = vmax.f32 %v8889_v30, 0.0  ;;  %v9113_v36 = vld [vmem:[#allocation11 + $0x704] ss:$28 sps:$4 sm:$0xff]   ;;  %v9138_v30 = vld [vmem:[#allocation11 + $0x270] ss:$28 sps:$4 sm:$0xff]  }
 0x33d   :  { %7164 = vmatprep.subr.bf16.mxu0 %v9068_v51  ;;  %v9090_v51 = vld [vmem:[#allocation11 + $0x8] ss:$28 sps:$4 sm:$0xff]  }
 0x33e   :  { %v10130_v40 = vpack.c.bf16 %v4240_v35, %v4240_v35  ;;  %v9152_v35 = vld [vmem:[#allocation11 + $0x2e4] ss:$28 sps:$4 sm:$0xff]  }
 0x33f   :  { %4214 = vmatpush1.bf16.msra.mxu1 %v8284_v41  ;;  %v9111_v41 = vld [vmem:[#allocation11 + $0x700] ss:$28 sps:$4 sm:$0xff]  }
 0x340   :  { %7165 = vmatpush1.bf16.msra.mxu0 %v9066_v57  ;;  %4215 = vmatprep.subr.bf16.mxu1 %v8293_v43  ;;  %v9093_v57 = vld [vmem:[#allocation11 + $0x40] ss:$28 sps:$4 sm:$0xff]  }
 0x341   :  { %7166 = vmatprep.subr.bf16.mxu0 %v9071_v61  ;;  %v9098_v43 = vld [vmem:[#allocation11 + $0x7c] ss:$28 sps:$4 sm:$0xff]  }
 0x342   :  { %v9117_v61 = vld [vmem:[#allocation11 + $0x738] ss:$28 sps:$4 sm:$0xff]  }
 0x343   :  { %4216 = vmatpush1.bf16.msra.mxu1 %v8292_v54  ;;  %v9101_v54 = vld [vmem:[#allocation11 + $0xb4] ss:$28 sps:$4 sm:$0xff]  }
 0x344   :  { %7167 = vmatpush1.bf16.msra.mxu0 %v9069_v56  ;;  %4217 = vmatprep.subr.bf16.mxu1 %v8301_v49  ;;  %v9123_v56 = vld [vmem:[#allocation11 + $0x770] ss:$28 sps:$4 sm:$0xff]  }
 0x345   :  { %7168 = vmatprep.subr.bf16.mxu0 %v9074_v34  ;;  %v9099_v49 = vld [vmem:[#allocation11 + $0xb0] ss:$28 sps:$4 sm:$0xff]  }
 0x346   :  { %v9104_v34 = vld [vmem:[#allocation11 + $0xec] ss:$28 sps:$4 sm:$0xff]  }
 0x347   :  { %4218 = vmatpush1.bf16.msra.mxu1 %v8300_v60  ;;  %v9102_v60 = vld [vmem:[#allocation11 + $0xe8] ss:$28 sps:$4 sm:$0xff]  }
 0x348   :  { %7169 = vmatpush1.bf16.msra.mxu0 %v9072_v44  ;;  %4219 = vmatprep.subr.bf16.mxu1 %v8309_v63  ;;  %v9107_v44 = vld [vmem:[#allocation11 + $0x124] ss:$28 sps:$4 sm:$0xff]  }
 0x349   :  { %7170 = vmatprep.subr.bf16.mxu0 %v9077_v1  ;;  %v9135_v63 = vld [vmem:[#allocation11 + $0x7e0] ss:$28 sps:$4 sm:$0xff]  }
 0x34a   :  { %v9143_v1 = vld [vmem:[#allocation11 + $0x81c] ss:$28 sps:$4 sm:$0xff]  }
 0x34b   :  { %4220 = vmatpush1.bf16.msra.mxu1 %v8308_v2  ;;  %v9141_v2 = vld [vmem:[#allocation11 + $0x818] ss:$28 sps:$4 sm:$0xff]  }
 0x34c   :  { %7171 = vmatpush1.bf16.msra.mxu0 %v9075_v7  ;;  %4221 = vmatprep.subr.bf16.mxu1 %v8317_v3  ;;  %v9149_v7 = vld [vmem:[#allocation11 + $0x854] ss:$28 sps:$4 sm:$0xff]  }
 0x34d   :  { %7172 = vmatprep.subr.bf16.mxu0 %v9080_v5  ;;  %v9108_v3 = vld [vmem:[#allocation11 + $0x158] ss:$28 sps:$4 sm:$0xff]  }
 0x34e   :  { %v9116_v5 = vld [vmem:[#allocation11 + $0x194] ss:$28 sps:$4 sm:$0xff]  }
 0x34f   :  { %4222 = vmatpush1.bf16.msra.mxu1 %v8316_v6  ;;  %v9114_v6 = vld [vmem:[#allocation11 + $0x190] ss:$28 sps:$4 sm:$0xff]  }
 0x350   :  { %7173 = vmatpush1.bf16.msra.mxu0 %v9078_v8  ;;  %4223 = vmatprep.subr.bf16.mxu1 %v8325_v9  ;;  %v9122_v8 = vld [vmem:[#allocation11 + $0x1cc] ss:$28 sps:$4 sm:$0xff]  }
 0x351   :  { %7174 = vmatprep.subr.bf16.mxu0 %v9083_v10  ;;  %v9153_v9 = vld [vmem:[#allocation11 + $0x888] ss:$28 sps:$4 sm:$0xff]  }
 0x352   :  { %v9161_v10 = vld [vmem:[#allocation11 + $0x8c4] ss:$28 sps:$4 sm:$0xff]  }
 0x353   :  { %4224 = vmatpush1.bf16.msra.mxu1 %v8324_v48  ;;  %v9159_v48 = vld [vmem:[#allocation11 + $0x8c0] ss:$28 sps:$4 sm:$0xff]  }
 0x354   :  { %7175 = vmatpush1.bf16.msra.mxu0 %v9081_v53  ;;  %4225 = vmatprep.subr.bf16.mxu1 %v8333_v14  ;;  %v9167_v53 = vld [vmem:[#allocation11 + $0x8fc] ss:$28 sps:$4 sm:$0xff]  }
 0x355   :  { %7176 = vmatprep.subr.bf16.mxu0 %v9086_v18  ;;  %v9126_v14 = vld [vmem:[#allocation11 + $0x200] ss:$28 sps:$4 sm:$0xff]   ;;  %v9165_v18 = vld [vmem:[#allocation11 + $0x8f8] ss:$28 sps:$4 sm:$0xff]  }
 0x357   :  { %4226 = vmatpush1.bf16.msra.mxu1 %v8332_v27  ;;  %v9140_v27 = vld [vmem:[#allocation11 + $0x274] ss:$28 sps:$4 sm:$0xff]  }
 0x358   :  { %7177 = vmatpush1.bf16.msra.mxu0 %v9084_v28  ;;  %4227 = vmatprep.subr.bf16.mxu1 %v8341_v47  ;;  %v9171_v28 = vld [vmem:[#allocation11 + $0x930] ss:$28 sps:$4 sm:$0xff]  }
 0x359   :  { %7178 = vmatprep.subr.bf16.mxu0 %v9089_v31  ;;  %v9179_v47 = vld [vmem:[#allocation11 + $0x96c] ss:$28 sps:$4 sm:$0xff]  }
 0x35a   :  { %v9146_v31 = vld [vmem:[#allocation11 + $0x2ac] ss:$28 sps:$4 sm:$0xff]  }
 0x35b   :  { %4228 = vmatpush1.bf16.msra.mxu1 %v8340_v52  ;;  %v9177_v52 = vld [vmem:[#allocation11 + $0x968] ss:$28 sps:$4 sm:$0xff]  }
 0x35c   :  { %7179 = vmatpush1.bf16.msra.mxu0 %v9087_v33  ;;  %7271 = vmatprep.subr.bf16.mxu1 %v9092_v17  ;;  %v9185_v33 = vld [vmem:[#allocation11 + $0x9a4] ss:$28 sps:$4 sm:$0xff]  }
 0x35d   :  { %7189 = vmatprep.subr.bf16.mxu0 %v9113_v36  ;;  %v9144_v17 = vld [vmem:[#allocation11 + $0x2a8] ss:$28 sps:$4 sm:$0xff]   ;;  %v9183_v36 = vld [vmem:[#allocation11 + $0x9a0] ss:$28 sps:$4 sm:$0xff]  }
 0x35e   :  { %4230 = vmatmul.mubr.bf16.vlgmr.msra.gmra.mrb[12].mxu1 %v10073_v16  ;;  %v9131_v16 = vld [vmem:[#allocation11 + $0x7ac] ss:$28 sps:$4 sm:$0xff]  }
 0x35f   :  { %7181 = vmatmul.mubr.bf16.vlgmr.msra.gmra.mrb[12].mxu0 %v10130_v40  ;;  %7272 = vmatpush1.bf16.msra.mxu1 %v9090_v51  ;;  %v9191_v51 = vld [vmem:[#allocation11 + $0x9dc] ss:$28 sps:$4 sm:$0xff]  }
 0x360   :  { %7303 = vmatprep.mubr.bf16.mxu1 %v10109_v42  ;;  %7273 = vmatprep.subr.bf16.mxu1 %v9095_v39  ;;  %v9150_v39 = vld [vmem:[#allocation11 + $0x2e0] ss:$28 sps:$4 sm:$0xff]  }
 0x361   :  { %7190 = vmatpush1.bf16.msra.mxu0 %v9111_v41  ;;  %v9158_v41 = vld [vmem:[#allocation11 + $0x31c] ss:$28 sps:$4 sm:$0xff]  }
 0x362   :  { %7191 = vmatprep.subr.bf16.mxu0 %v9119_v12  ;;  %v9189_v12 = vld [vmem:[#allocation11 + $0x9d8] ss:$28 sps:$4 sm:$0xff]  }
 0x363   :  { %7274 = vmatpush1.bf16.msra.mxu1 %v9093_v57  ;;  %v9197_v57 = vld [vmem:[#allocation11 + $0xa14] ss:$28 sps:$4 sm:$0xff]  }
 0x364   :  { %7275 = vmatprep.subr.bf16.mxu1 %v9098_v43  ;;  %v9156_v43 = vld [vmem:[#allocation11 + $0x318] ss:$28 sps:$4 sm:$0xff]  }
 0x365   :  { %7192 = vmatpush1.bf16.msra.mxu0 %v9117_v61  ;;  %v9164_v61 = vld [vmem:[#allocation11 + $0x354] ss:$28 sps:$4 sm:$0xff]  }
 0x366   :  { %7193 = vmatprep.subr.bf16.mxu0 %v9125_v45  ;;  %v9195_v45 = vld [vmem:[#allocation11 + $0xa10] ss:$28 sps:$4 sm:$0xff]  }
 0x367   :  { %7276 = vmatpush1.bf16.msra.mxu1 %v9096_v50  ;;  %v9203_v50 = vld [vmem:[#allocation11 + $0xa4c] ss:$28 sps:$4 sm:$0xff]  }
 0x368   :  { %7277 = vmatprep.subr.bf16.mxu1 %v9101_v54  ;;  %v9162_v54 = vld [vmem:[#allocation11 + $0x350] ss:$28 sps:$4 sm:$0xff]  }
 0x369   :  { %7194 = vmatpush1.bf16.msra.mxu0 %v9123_v56  ;;  %v9170_v56 = vld [vmem:[#allocation11 + $0x38c] ss:$28 sps:$4 sm:$0xff]  }
 0x36a   :  { %7195 = vmatprep.subr.bf16.mxu0 %v9131_v16  ;;  %v9201_v16 = vld [vmem:[#allocation11 + $0xa48] ss:$28 sps:$4 sm:$0xff]  }
 0x36b   :  { %7278 = vmatpush1.bf16.msra.mxu1 %v9099_v49  ;;  %v9257_v49 = vld [vmem:[#allocation11 + $0xa84] ss:$28 sps:$4 sm:$0xff]  }
 0x36c   :  { %7279 = vmatprep.subr.bf16.mxu1 %v9104_v34  ;;  %v9168_v34 = vld [vmem:[#allocation11 + $0x388] ss:$28 sps:$4 sm:$0xff]  }
 0x36d   :  { %7196 = vmatpush1.bf16.msra.mxu0 %v9129_v58  ;;  %v9176_v58 = vld [vmem:[#allocation11 + $0x3c4] ss:$28 sps:$4 sm:$0xff]  }
 0x36e   :  { %7197 = vmatprep.subr.bf16.mxu0 %v9137_v59  ;;  %v9174_v59 = vld [vmem:[#allocation11 + $0x3c0] ss:$28 sps:$4 sm:$0xff]  }
 0x36f   :  { %7280 = vmatpush1.bf16.msra.mxu1 %v9102_v60  ;;  %v9182_v60 = vld [vmem:[#allocation11 + $0x3fc] ss:$28 sps:$4 sm:$0xff]  }
 0x370   :  { %7281 = vmatprep.subr.bf16.mxu1 %v9107_v44  ;;  %v9180_v44 = vld [vmem:[#allocation11 + $0x3f8] ss:$28 sps:$4 sm:$0xff]  }
 0x371   :  { %7198 = vmatpush1.bf16.msra.mxu0 %v9135_v63  ;;  %v9188_v63 = vld [vmem:[#allocation11 + $0x434] ss:$28 sps:$4 sm:$0xff]  }
 0x372   :  { %7199 = vmatprep.subr.bf16.mxu0 %v9143_v1  ;;  %v9186_v1 = vld [vmem:[#allocation11 + $0x430] ss:$28 sps:$4 sm:$0xff]  }
 0x373   :  { %7282 = vmatpush1.bf16.msra.mxu1 %v9105_v4  ;;  %v9194_v4 = vld [vmem:[#allocation11 + $0x46c] ss:$28 sps:$4 sm:$0xff]  }
 0x374   :  { %7283 = vmatprep.subr.bf16.mxu1 %v9110_v0  ;;  %v9192_v0 = vld [vmem:[#allocation11 + $0x468] ss:$28 sps:$4 sm:$0xff]  }
 0x375   :  { %7200 = vmatpush1.bf16.msra.mxu0 %v9141_v2  ;;  %v9200_v2 = vld [vmem:[#allocation11 + $0x4a4] ss:$28 sps:$4 sm:$0xff]  }
 0x376   :  { %7201 = vmatprep.subr.bf16.mxu0 %v9149_v7  ;;  %v10137_v7 = vld [vmem:[#allocation10] sm:$0xff] }
 0x377   :  { %7284 = vmatpush1.bf16.msra.mxu1 %v9108_v3  ;;  %v1001_v3 = vrot.slane %v10137_v7, %v10049_v46 }
 0x378   :  { %7285 = vmatprep.subr.bf16.mxu1 %v9116_v5  ;;  %v9198_v5 = vld [vmem:[#allocation11 + $0x4a0] ss:$28 sps:$4 sm:$0xff]  }
 0x379   :  { %7202 = vmatpush1.bf16.msra.mxu0 %v9147_v55  ;;  %v1005_v55 = vrot.slane %v10137_v7, %v10022_v29 }
 0x37a   :  { %7203 = vmatprep.subr.bf16.mxu0 %v9155_v22  ;;  %v9206_v22 = vld [vmem:[#allocation11 + $0x4dc] ss:$28 sps:$4 sm:$0xff]  }
 0x37b   :  { %7286 = vmatpush1.bf16.msra.mxu1 %v9114_v6 }
 0x37c   :  { %7287 = vmatprep.subr.bf16.mxu1 %v9122_v8 }
 0x37d   :  { %7204 = vmatpush1.bf16.msra.mxu0 %v9153_v9 }
 0x37e   :  { %7205 = vmatprep.subr.bf16.mxu0 %v9161_v10  ;;  %v9204_v10 = vld [vmem:[#allocation11 + $0x4d8] ss:$28 sps:$4 sm:$0xff]  }
 0x37f   :  { %7288 = vmatpush1.bf16.msra.mxu1 %v9120_v11 }
 0x380   :  { %7289 = vmatprep.subr.bf16.mxu1 %v9128_v13 }
 0x381   :  { %7206 = vmatpush1.bf16.msra.mxu0 %v9159_v48  ;;  %v9209_v48 = vld [vmem:[#allocation11 + $0x514] ss:$28 sps:$4 sm:$0xff]  }
 0x382   :  { %7207 = vmatprep.subr.bf16.mxu0 %v9167_v53 }
 0x383   :  { %7290 = vmatpush1.bf16.msra.mxu1 %v9126_v14 }
 0x384   :  { %7291 = vmatprep.subr.bf16.mxu1 %v9134_v15 }
 0x385   :  { %7208 = vmatpush1.bf16.msra.mxu0 %v9165_v18  ;;  %v9207_v18 = vld [vmem:[#allocation11 + $0x510] ss:$28 sps:$4 sm:$0xff]  }
 0x386   :  { %7209 = vmatprep.subr.bf16.mxu0 %v9173_v25 }
 0x387   :  { %7292 = vmatpush1.bf16.msra.mxu1 %v9132_v26  ;;  %v9212_v26 = vld [vmem:[#allocation11 + $0x54c] ss:$28 sps:$4 sm:$0xff]  }
 0x388   :  { %7293 = vmatprep.subr.bf16.mxu1 %v9140_v27  ;;  %v9255_v27 = vld [vmem:[#allocation11 + $0xa80] ss:$28 sps:$4 sm:$0xff]  }
 0x389   :  { %7210 = vmatpush1.bf16.msra.mxu0 %v9171_v28 }
 0x38a   :  { %7211 = vmatprep.subr.bf16.mxu0 %v9179_v47  ;;  %v9263_v47 = vld [vmem:[#allocation11 + $0xabc] ss:$28 sps:$4 sm:$0xff]  }
 0x38b   :  { %7294 = vmatpush1.bf16.msra.mxu1 %v9138_v30  ;;  %v9210_v30 = vld [vmem:[#allocation11 + $0x548] ss:$28 sps:$4 sm:$0xff]  }
 0x38c   :  { %7295 = vmatprep.subr.bf16.mxu1 %v9146_v31  ;;  %v9215_v31 = vld [vmem:[#allocation11 + $0x584] ss:$28 sps:$4 sm:$0xff]  }
 0x38d   :  { %7212 = vmatpush1.bf16.msra.mxu0 %v9177_v52  ;;  %v9261_v52 = vld [vmem:[#allocation11 + $0xab8] ss:$28 sps:$4 sm:$0xff]  }
 0x38e   :  { %7213 = vmatprep.subr.bf16.mxu0 %v9185_v33  ;;  %v9269_v33 = vld [vmem:[#allocation11 + $0xaf4] ss:$28 sps:$4 sm:$0xff]  }
 0x38f   :  { %7296 = vmatpush1.bf16.msra.mxu1 %v9144_v17  ;;  %v9213_v17 = vld [vmem:[#allocation11 + $0x580] ss:$28 sps:$4 sm:$0xff]  }
 0x390   :  { %7297 = vmatprep.subr.bf16.mxu1 %v9152_v35  ;;  %v9218_v35 = vld [vmem:[#allocation11 + $0x5bc] ss:$28 sps:$4 sm:$0xff]  }
 0x391   :  { %7214 = vmatpush1.bf16.msra.mxu0 %v9183_v36  ;;  %v9267_v36 = vld [vmem:[#allocation11 + $0xaf0] ss:$28 sps:$4 sm:$0xff]  }
 0x392   :  { %7215 = vmatprep.subr.bf16.mxu0 %v9191_v51  ;;  %v9275_v51 = vld [vmem:[#allocation11 + $0xb2c] ss:$28 sps:$4 sm:$0xff]  }
 0x393   :  { %7298 = vmatpush1.bf16.msra.mxu1 %v9150_v39  ;;  %v9216_v39 = vld [vmem:[#allocation11 + $0x5b8] ss:$28 sps:$4 sm:$0xff]  }
 0x394   :  { %7299 = vmatprep.subr.bf16.mxu1 %v9158_v41  ;;  %v9221_v41 = vld [vmem:[#allocation11 + $0x5f4] ss:$28 sps:$4 sm:$0xff]  }
 0x395   :  { %7216 = vmatpush1.bf16.msra.mxu0 %v9189_v12  ;;  %v9273_v12 = vld [vmem:[#allocation11 + $0xb28] ss:$28 sps:$4 sm:$0xff]  }
 0x396   :  { %7217 = vmatprep.subr.bf16.mxu0 %v9197_v57  ;;  %v9281_v57 = vld [vmem:[#allocation11 + $0xb64] ss:$28 sps:$4 sm:$0xff]  }
 0x397   :  { %7300 = vmatpush1.bf16.msra.mxu1 %v9156_v43  ;;  %v9219_v43 = vld [vmem:[#allocation11 + $0x5f0] ss:$28 sps:$4 sm:$0xff]  }
 0x398   :  { %7301 = vmatprep.subr.bf16.mxu1 %v9164_v61  ;;  %v9224_v61 = vld [vmem:[#allocation11 + $0x62c] ss:$28 sps:$4 sm:$0xff]  }
 0x399   :  { %7218 = vmatpush1.bf16.msra.mxu0 %v9195_v45  ;;  %v9279_v45 = vld [vmem:[#allocation11 + $0xb60] ss:$28 sps:$4 sm:$0xff]  }
 0x39a   :  { %7219 = vmatprep.subr.bf16.mxu0 %v9203_v50  ;;  %v9287_v50 = vld [vmem:[#allocation11 + $0xb9c] ss:$28 sps:$4 sm:$0xff]  }
 0x39b   :  { %7302 = vmatpush1.bf16.msra.mxu1 %v9162_v54  ;;  %v9222_v54 = vld [vmem:[#allocation11 + $0x628] ss:$28 sps:$4 sm:$0xff]  }
 0x39c   :  { %7312 = vmatprep.subr.bf16.mxu1 %v9170_v56  ;;  %v9227_v56 = vld [vmem:[#allocation11 + $0x664] ss:$28 sps:$4 sm:$0xff]  }
 0x39d   :  { %7220 = vmatpush1.bf16.msra.mxu0 %v9201_v16  ;;  %v9285_v16 = vld [vmem:[#allocation11 + $0xb98] ss:$28 sps:$4 sm:$0xff]  }
 0x39e   :  { %7304 = vmatmul.mubr.bf16.vlgmr.msra.gmra.mrb[16].mxu1 %v10115_v37  ;;  %7230 = vmatprep.subr.bf16.mxu0 %v9257_v49  ;;  %v9293_v49 = vld [vmem:[#allocation11 + $0xbd4] ss:$28 sps:$4 sm:$0xff]  }
 0x39f   :  { %7313 = vmatpush1.bf16.msra.mxu1 %v9168_v34  ;;  %7344 = vmatprep.mubr.bf16.mxu1 %v10124_v32  ;;  %v9225_v34 = vld [vmem:[#allocation11 + $0x660] ss:$28 sps:$4 sm:$0xff]  }
 0x3a0   :  { %7314 = vmatprep.subr.bf16.mxu1 %v9176_v58  ;;  %v9230_v58 = vld [vmem:[#allocation11 + $0x69c] ss:$28 sps:$4 sm:$0xff]  }
 0x3a3   :  { %7315 = vmatpush1.bf16.msra.mxu1 %v9174_v59  ;;  %v9291_v59 = vld [vmem:[#allocation11 + $0xbd0] ss:$28 sps:$4 sm:$0xff]  }
 0x3a4   :  { %7316 = vmatprep.subr.bf16.mxu1 %v9182_v60  ;;  %v9299_v60 = vld [vmem:[#allocation11 + $0xc0c] ss:$28 sps:$4 sm:$0xff]  }
 0x3a7   :  { %7317 = vmatpush1.bf16.msra.mxu1 %v9180_v44  ;;  %v9228_v44 = vld [vmem:[#allocation11 + $0x698] ss:$28 sps:$4 sm:$0xff]  }
 0x3a8   :  { %7318 = vmatprep.subr.bf16.mxu1 %v9188_v63  ;;  %v9233_v63 = vld [vmem:[#allocation11 + $0x6d4] ss:$28 sps:$4 sm:$0xff]  }
 0x3ab   :  { %7319 = vmatpush1.bf16.msra.mxu1 %v9186_v1  ;;  %v9297_v1 = vld [vmem:[#allocation11 + $0xc08] ss:$28 sps:$4 sm:$0xff]  }
 0x3ac   :  { %7320 = vmatprep.subr.bf16.mxu1 %v9194_v4  ;;  %v9305_v4 = vld [vmem:[#allocation11 + $0xc44] ss:$28 sps:$4 sm:$0xff]  }
 0x3af   :  { %7321 = vmatpush1.bf16.msra.mxu1 %v9192_v0  ;;  %v9231_v0 = vld [vmem:[#allocation11 + $0x6d0] ss:$28 sps:$4 sm:$0xff]  }
 0x3b0   :  { %7322 = vmatprep.subr.bf16.mxu1 %v9200_v2  ;;  %v9236_v2 = vld [vmem:[#allocation11 + $0x70c] ss:$28 sps:$4 sm:$0xff]  }
 0x3b2   :  { %v4067_v6 = vpop.f32.mrb[8].mxu0 }
 0x3b3   :  { %v8891_v8 = vadd.f32 %v4067_v6, %v1001_v3  ;;  %v4069_v9 = vpop.f32.mrb[9].mxu0  ;;  %7323 = vmatpush1.bf16.msra.mxu1 %v9198_v5  ;;  %v9303_v3 = vld [vmem:[#allocation11 + $0xc40] ss:$28 sps:$4 sm:$0xff]   ;;  %v9309_v6 = vld [vmem:[#allocation11 + $0xc78] ss:$28 sps:$4 sm:$0xff]  }
 0x3b4   :  { %v8892_v11 = vadd.f32 %v4069_v9, %v1005_v55  ;;  %v4071_v13 = vpop.f32.mrb[10].mxu0  ;;  %7324 = vmatprep.subr.bf16.mxu1 %v9206_v22  ;;  %v9311_v5 = vld [vmem:[#allocation11 + $0xc7c] ss:$28 sps:$4 sm:$0xff]   ;;  %v9234_v55 = vld [vmem:[#allocation11 + $0x708] ss:$28 sps:$4 sm:$0xff]  }
 0x3b5   :  { %v4242_v53 = vmax.f32 %v8891_v8, 0.0  ;;  %v4072_v14 = vpop.f32.mrb[11].mxu0  ;;  %v9239_v22 = vld [vmem:[#allocation11 + $0x744] ss:$28 sps:$4 sm:$0xff]   ;;  %v9317_v8 = vld [vmem:[#allocation11 + $0xcb4] ss:$28 sps:$4 sm:$0xff]  }
 0x3b6   :  { %v4243_v15 = vmax.f32 %v8892_v11, 0.0  ;;  %v9237_v9 = vld [vmem:[#allocation11 + $0x740] ss:$28 sps:$4 sm:$0xff]   ;;  %v9315_v11 = vld [vmem:[#allocation11 + $0xcb0] ss:$28 sps:$4 sm:$0xff]  }
 0x3b7   :  { %7325 = vmatpush1.bf16.msra.mxu1 %v9204_v10  ;;  %v10145_v28 = vpack.c.bf16 %v4242_v53, %v4242_v53  ;;  %v9242_v10 = vld [vmem:[#allocation11 + $0x77c] ss:$28 sps:$4 sm:$0xff]   ;;  %v9323_v13 = vld [vmem:[#allocation11 + $0xcec] ss:$28 sps:$4 sm:$0xff]   ;;  %v9245_v53 = vld [vmem:[#allocation11 + $0x7b4] ss:$28 sps:$4 sm:$0xff]  }
 0x3b8   :  { %v10143_v25 = vpack.c.bf16 %v4243_v15, %v4243_v15  ;;  %7326 = vmatprep.subr.bf16.mxu1 %v9209_v48  ;;  %v9240_v48 = vld [vmem:[#allocation11 + $0x778] ss:$28 sps:$4 sm:$0xff]   ;;  %v9321_v14 = vld [vmem:[#allocation11 + $0xce8] ss:$28 sps:$4 sm:$0xff]  }
 0x3b9   :  { %v9329_v15 = vld [vmem:[#allocation11 + $0xd24] ss:$28 sps:$4 sm:$0xff]  }
 0x3ba   :  { %7221 = vmatprep.mubr.bf16.mxu0 %v10143_v25 }
 0x3bb   :  { %7222 = vmatmul.mubr.bf16.vlgmr.msra.gmra.mrb[12].mxu0 %v10145_v28  ;;  %7327 = vmatpush1.bf16.msra.mxu1 %v9207_v18  ;;  %v9243_v18 = vld [vmem:[#allocation11 + $0x7b0] ss:$28 sps:$4 sm:$0xff]  }
 0x3bc   :  { %7328 = vmatprep.subr.bf16.mxu1 %v9212_v26  ;;  %7231 = vmatpush1.bf16.msra.mxu0 %v9255_v27  ;;  %v9248_v26 = vld [vmem:[#allocation11 + $0x7ec] ss:$28 sps:$4 sm:$0xff]   ;;  %v9327_v27 = vld [vmem:[#allocation11 + $0xd20] ss:$28 sps:$4 sm:$0xff]  }
 0x3bd   :  { %7232 = vmatprep.subr.bf16.mxu0 %v9263_v47  ;;  %v9335_v47 = vld [vmem:[#allocation11 + $0xd5c] ss:$28 sps:$4 sm:$0xff]  }
 0x3bf   :  { %7329 = vmatpush1.bf16.msra.mxu1 %v9210_v30  ;;  %v9246_v30 = vld [vmem:[#allocation11 + $0x7e8] ss:$28 sps:$4 sm:$0xff]  }
 0x3c0   :  { %7330 = vmatprep.subr.bf16.mxu1 %v9215_v31  ;;  %7233 = vmatpush1.bf16.msra.mxu0 %v9261_v52  ;;  %v9251_v31 = vld [vmem:[#allocation11 + $0x824] ss:$28 sps:$4 sm:$0xff]   ;;  %v9333_v52 = vld [vmem:[#allocation11 + $0xd58] ss:$28 sps:$4 sm:$0xff]  }
 0x3c1   :  { %7234 = vmatprep.subr.bf16.mxu0 %v9269_v33  ;;  %v9341_v33 = vld [vmem:[#allocation11 + $0xd94] ss:$28 sps:$4 sm:$0xff]  }
 0x3c3   :  { %7331 = vmatpush1.bf16.msra.mxu1 %v9213_v17  ;;  %v9249_v17 = vld [vmem:[#allocation11 + $0x820] ss:$28 sps:$4 sm:$0xff]  }
 0x3c4   :  { %7332 = vmatprep.subr.bf16.mxu1 %v9218_v35  ;;  %7235 = vmatpush1.bf16.msra.mxu0 %v9267_v36  ;;  %v9254_v35 = vld [vmem:[#allocation11 + $0x85c] ss:$28 sps:$4 sm:$0xff]   ;;  %v9339_v36 = vld [vmem:[#allocation11 + $0xd90] ss:$28 sps:$4 sm:$0xff]  }
 0x3c5   :  { %7236 = vmatprep.subr.bf16.mxu0 %v9275_v51  ;;  %v9347_v51 = vld [vmem:[#allocation11 + $0xdcc] ss:$28 sps:$4 sm:$0xff]  }
 0x3c7   :  { %7333 = vmatpush1.bf16.msra.mxu1 %v9216_v39  ;;  %v9252_v39 = vld [vmem:[#allocation11 + $0x858] ss:$28 sps:$4 sm:$0xff]  }
 0x3c8   :  { %7334 = vmatprep.subr.bf16.mxu1 %v9221_v41  ;;  %7237 = vmatpush1.bf16.msra.mxu0 %v9273_v12  ;;  %v9260_v41 = vld [vmem:[#allocation11 + $0x894] ss:$28 sps:$4 sm:$0xff]   ;;  %v9345_v12 = vld [vmem:[#allocation11 + $0xdc8] ss:$28 sps:$4 sm:$0xff]  }
 0x3c9   :  { %7238 = vmatprep.subr.bf16.mxu0 %v9281_v57  ;;  %v9353_v57 = vld [vmem:[#allocation11 + $0x14] ss:$28 sps:$4 sm:$0xff]  }
 0x3cb   :  { %7335 = vmatpush1.bf16.msra.mxu1 %v9219_v43  ;;  %v9258_v43 = vld [vmem:[#allocation11 + $0x890] ss:$28 sps:$4 sm:$0xff]  }
 0x3cc   :  { %7336 = vmatprep.subr.bf16.mxu1 %v9224_v61  ;;  %7239 = vmatpush1.bf16.msra.mxu0 %v9279_v45  ;;  %v9266_v61 = vld [vmem:[#allocation11 + $0x8cc] ss:$28 sps:$4 sm:$0xff]  }
 0x3cd   :  { %7240 = vmatprep.subr.bf16.mxu0 %v9287_v50  ;;  %v9264_v45 = vld [vmem:[#allocation11 + $0x8c8] ss:$28 sps:$4 sm:$0xff]  }
 0x3ce   :  { %v9272_v50 = vld [vmem:[#allocation11 + $0x904] ss:$28 sps:$4 sm:$0xff]  }
 0x3cf   :  { %7337 = vmatpush1.bf16.msra.mxu1 %v9222_v54  ;;  %v9270_v54 = vld [vmem:[#allocation11 + $0x900] ss:$28 sps:$4 sm:$0xff]  }
 0x3d0   :  { %7338 = vmatprep.subr.bf16.mxu1 %v9227_v56  ;;  %7241 = vmatpush1.bf16.msra.mxu0 %v9285_v16  ;;  %v9278_v56 = vld [vmem:[#allocation11 + $0x93c] ss:$28 sps:$4 sm:$0xff]  }
 0x3d1   :  { %7242 = vmatprep.subr.bf16.mxu0 %v9293_v49  ;;  %v9276_v16 = vld [vmem:[#allocation11 + $0x938] ss:$28 sps:$4 sm:$0xff]  }
 0x3d2   :  { %v9284_v49 = vld [vmem:[#allocation11 + $0x974] ss:$28 sps:$4 sm:$0xff]  }
 0x3d3   :  { %7339 = vmatpush1.bf16.msra.mxu1 %v9225_v34  ;;  %v9282_v34 = vld [vmem:[#allocation11 + $0x970] ss:$28 sps:$4 sm:$0xff]  }
 0x3d4   :  { %7340 = vmatprep.subr.bf16.mxu1 %v9230_v58  ;;  %7243 = vmatpush1.bf16.msra.mxu0 %v9291_v59  ;;  %v9290_v58 = vld [vmem:[#allocation11 + $0x9ac] ss:$28 sps:$4 sm:$0xff]  }
 0x3d5   :  { %7244 = vmatprep.subr.bf16.mxu0 %v9299_v60  ;;  %v9288_v59 = vld [vmem:[#allocation11 + $0x9a8] ss:$28 sps:$4 sm:$0xff]  }
 0x3d6   :  { %v9296_v60 = vld [vmem:[#allocation11 + $0x9e4] ss:$28 sps:$4 sm:$0xff]  }
 0x3d7   :  { %7341 = vmatpush1.bf16.msra.mxu1 %v9228_v44  ;;  %v9294_v44 = vld [vmem:[#allocation11 + $0x9e0] ss:$28 sps:$4 sm:$0xff]  }
 0x3d8   :  { %7342 = vmatprep.subr.bf16.mxu1 %v9233_v63  ;;  %7245 = vmatpush1.bf16.msra.mxu0 %v9297_v1  ;;  %v9302_v63 = vld [vmem:[#allocation11 + $0xa1c] ss:$28 sps:$4 sm:$0xff]  }
 0x3d9   :  { %7246 = vmatprep.subr.bf16.mxu0 %v9305_v4  ;;  %v9300_v1 = vld [vmem:[#allocation11 + $0xa18] ss:$28 sps:$4 sm:$0xff]  }
 0x3da   :  { %v9308_v4 = vld [vmem:[#allocation11 + $0xa54] ss:$28 sps:$4 sm:$0xff]  }
 0x3db   :  { %7343 = vmatpush1.bf16.msra.mxu1 %v9231_v0  ;;  %v9306_v0 = vld [vmem:[#allocation11 + $0xa50] ss:$28 sps:$4 sm:$0xff]  }
 0x3dc   :  { %7353 = vmatprep.subr.bf16.mxu1 %v9236_v2  ;;  %7247 = vmatpush1.bf16.msra.mxu0 %v9303_v3  ;;  %v9314_v2 = vld [vmem:[#allocation11 + $0xa8c] ss:$28 sps:$4 sm:$0xff]  }
 0x3dd   :  { %7248 = vmatprep.subr.bf16.mxu0 %v9311_v5  ;;  %v9312_v3 = vld [vmem:[#allocation11 + $0xa88] ss:$28 sps:$4 sm:$0xff]  }
 0x3de   :  { %7345 = vmatmul.mubr.bf16.vlgmr.msra.gmra.mrb[16].mxu1 %v10130_v40  ;;  %v9320_v5 = vld [vmem:[#allocation11 + $0xac4] ss:$28 sps:$4 sm:$0xff]  }
 0x3df   :  { %7354 = vmatpush1.bf16.msra.mxu1 %v9234_v55  ;;  %7385 = vmatprep.mubr.bf16.mxu1 %v10143_v25  ;;  %v9318_v55 = vld [vmem:[#allocation11 + $0xac0] ss:$28 sps:$4 sm:$0xff]  }
 0x3e0   :  { %7355 = vmatprep.subr.bf16.mxu1 %v9239_v22  ;;  %7249 = vmatpush1.bf16.msra.mxu0 %v9309_v6  ;;  %v9326_v22 = vld [vmem:[#allocation11 + $0xafc] ss:$28 sps:$4 sm:$0xff]  }
 0x3e1   :  { %7250 = vmatprep.subr.bf16.mxu0 %v9317_v8  ;;  %v9324_v6 = vld [vmem:[#allocation11 + $0xaf8] ss:$28 sps:$4 sm:$0xff]  }
 0x3e2   :  { %v9332_v8 = vld [vmem:[#allocation11 + $0xb34] ss:$28 sps:$4 sm:$0xff]  }
 0x3e3   :  { %7356 = vmatpush1.bf16.msra.mxu1 %v9237_v9  ;;  %v9330_v9 = vld [vmem:[#allocation11 + $0xb30] ss:$28 sps:$4 sm:$0xff]  }
 0x3e4   :  { %7357 = vmatprep.subr.bf16.mxu1 %v9242_v10  ;;  %7251 = vmatpush1.bf16.msra.mxu0 %v9315_v11  ;;  %v9338_v10 = vld [vmem:[#allocation11 + $0xb6c] ss:$28 sps:$4 sm:$0xff]  }
 0x3e5   :  { %7252 = vmatprep.subr.bf16.mxu0 %v9323_v13  ;;  %v9336_v11 = vld [vmem:[#allocation11 + $0xb68] ss:$28 sps:$4 sm:$0xff]  }
 0x3e6   :  { %v9344_v13 = vld [vmem:[#allocation11 + $0xba4] ss:$28 sps:$4 sm:$0xff]  }
 0x3e7   :  { %7358 = vmatpush1.bf16.msra.mxu1 %v9240_v48  ;;  %v1009_v48 = vrot.slane %v10137_v7, %v10068_v38 }
 0x3e8   :  { %7359 = vmatprep.subr.bf16.mxu1 %v9245_v53  ;;  %7253 = vmatpush1.bf16.msra.mxu0 %v9321_v14  ;;  %v1013_v53 = vrot.slane %v10137_v7, %v154_v62  ;;  %v9342_v14 = vld [vmem:[#allocation11 + $0xba0] ss:$28 sps:$4 sm:$0xff]   ;;  %v9354_v62 = vld [vmem:[#allocation11 + $0xc10] ss:$28 sps:$4 sm:$0xff]  }
 0x3e9   :  { %7254 = vmatprep.subr.bf16.mxu0 %v9329_v15  ;;  %v9350_v15 = vld [vmem:[#allocation11 + $0xbdc] ss:$28 sps:$4 sm:$0xff]  }
 0x3eb   :  { %7360 = vmatpush1.bf16.msra.mxu1 %v9243_v18 }
 0x3ec   :  { %7361 = vmatprep.subr.bf16.mxu1 %v9248_v26  ;;  %7255 = vmatpush1.bf16.msra.mxu0 %v9327_v27 }
 0x3ed   :  { %7256 = vmatprep.subr.bf16.mxu0 %v9335_v47 }
 0x3ef   :  { %7362 = vmatpush1.bf16.msra.mxu1 %v9246_v30 }
 0x3f0   :  { %7363 = vmatprep.subr.bf16.mxu1 %v9251_v31  ;;  %7257 = vmatpush1.bf16.msra.mxu0 %v9333_v52  ;;  %v9348_v31 = vld [vmem:[#allocation11 + $0xbd8] ss:$28 sps:$4 sm:$0xff]  }
 0x3f1   :  { %7258 = vmatprep.subr.bf16.mxu0 %v9341_v33 }
 0x3f3   :  { %7364 = vmatpush1.bf16.msra.mxu1 %v9249_v17  ;;  %v9356_v17 = vld [vmem:[#allocation11 + $0xc14] ss:$28 sps:$4 sm:$0xff]  }
 0x3f4   :  { %7365 = vmatprep.subr.bf16.mxu1 %v9254_v35  ;;  %7259 = vmatpush1.bf16.msra.mxu0 %v9339_v36 }
 0x3f5   :  { %7260 = vmatprep.subr.bf16.mxu0 %v9347_v51  ;;  %v9359_v51 = vld [vmem:[#allocation11 + $0x4c] ss:$28 sps:$4 sm:$0xff]  }
 0x3f7   :  { %7366 = vmatpush1.bf16.msra.mxu1 %v9252_v39  ;;  %v9362_v39 = vld [vmem:[#allocation11 + $0xc4c] ss:$28 sps:$4 sm:$0xff]  }
 0x3f8   :  { %7367 = vmatprep.subr.bf16.mxu1 %v9260_v41  ;;  %7261 = vmatpush1.bf16.msra.mxu0 %v9345_v12  ;;  %v9357_v41 = vld [vmem:[#allocation11 + $0x48] ss:$28 sps:$4 sm:$0xff]  }
 0x3f9   :  { %7435 = vmatprep.subr.bf16.mxu0 %v9353_v57  ;;  %v9360_v12 = vld [vmem:[#allocation11 + $0xc48] ss:$28 sps:$4 sm:$0xff]  }
 0x3fa   :  { %v9365_v57 = vld [vmem:[#allocation11 + $0x84] ss:$28 sps:$4 sm:$0xff]  }
 0x3fb   :  { %7368 = vmatpush1.bf16.msra.mxu1 %v9258_v43  ;;  %v9368_v43 = vld [vmem:[#allocation11 + $0xc84] ss:$28 sps:$4 sm:$0xff]  }
 0x3fc   :  { %7369 = vmatprep.subr.bf16.mxu1 %v9266_v61  ;;  %v9363_v61 = vld [vmem:[#allocation11 + $0x80] ss:$28 sps:$4 sm:$0xff]  }
 0x3ff   :  { %7370 = vmatpush1.bf16.msra.mxu1 %v9264_v45  ;;  %v9366_v45 = vld [vmem:[#allocation11 + $0xc80] ss:$28 sps:$4 sm:$0xff]  }
 0x400   :  { %7371 = vmatprep.subr.bf16.mxu1 %v9272_v50  ;;  %v9371_v50 = vld [vmem:[#allocation11 + $0xbc] ss:$28 sps:$4 sm:$0xff]  }
 0x403   :  { %7372 = vmatpush1.bf16.msra.mxu1 %v9270_v54  ;;  %v9374_v54 = vld [vmem:[#allocation11 + $0xcbc] ss:$28 sps:$4 sm:$0xff]  }
 0x404   :  { %7373 = vmatprep.subr.bf16.mxu1 %v9278_v56  ;;  %v9369_v56 = vld [vmem:[#allocation11 + $0xb8] ss:$28 sps:$4 sm:$0xff]  }
 0x407   :  { %7374 = vmatpush1.bf16.msra.mxu1 %v9276_v16  ;;  %v9372_v16 = vld [vmem:[#allocation11 + $0xcb8] ss:$28 sps:$4 sm:$0xff]  }
 0x408   :  { %7375 = vmatprep.subr.bf16.mxu1 %v9284_v49  ;;  %v9377_v49 = vld [vmem:[#allocation11 + $0xf4] ss:$28 sps:$4 sm:$0xff]  }
 0x40b   :  { %7376 = vmatpush1.bf16.msra.mxu1 %v9282_v34  ;;  %v9380_v34 = vld [vmem:[#allocation11 + $0xcf4] ss:$28 sps:$4 sm:$0xff]  }
 0x40c   :  { %7377 = vmatprep.subr.bf16.mxu1 %v9290_v58  ;;  %v9375_v58 = vld [vmem:[#allocation11 + $0xf0] ss:$28 sps:$4 sm:$0xff]  }
 0x40f   :  { %7378 = vmatpush1.bf16.msra.mxu1 %v9288_v59  ;;  %v9378_v59 = vld [vmem:[#allocation11 + $0xcf0] ss:$28 sps:$4 sm:$0xff]  }
 0x410   :  { %7379 = vmatprep.subr.bf16.mxu1 %v9296_v60  ;;  %v9383_v60 = vld [vmem:[#allocation11 + $0x12c] ss:$28 sps:$4 sm:$0xff]  }
 0x413   :  { %7380 = vmatpush1.bf16.msra.mxu1 %v9294_v44  ;;  %v9386_v44 = vld [vmem:[#allocation11 + $0xd2c] ss:$28 sps:$4 sm:$0xff]  }
 0x414   :  { %7381 = vmatprep.subr.bf16.mxu1 %v9302_v63  ;;  %v9381_v63 = vld [vmem:[#allocation11 + $0x128] ss:$28 sps:$4 sm:$0xff]  }
 0x417   :  { %7382 = vmatpush1.bf16.msra.mxu1 %v9300_v1  ;;  %v9384_v1 = vld [vmem:[#allocation11 + $0xd28] ss:$28 sps:$4 sm:$0xff]  }
 0x418   :  { %7383 = vmatprep.subr.bf16.mxu1 %v9308_v4  ;;  %v9389_v4 = vld [vmem:[#allocation11 + $0x164] ss:$28 sps:$4 sm:$0xff]  }
 0x41b   :  { %7384 = vmatpush1.bf16.msra.mxu1 %v9306_v0  ;;  %v9392_v0 = vld [vmem:[#allocation11 + $0xd64] ss:$28 sps:$4 sm:$0xff]  }
 0x41c   :  { %7394 = vmatprep.subr.bf16.mxu1 %v9314_v2  ;;  %v9387_v2 = vld [vmem:[#allocation11 + $0x160] ss:$28 sps:$4 sm:$0xff]  }
 0x41e   :  { %7386 = vmatmul.mubr.bf16.vlgmr.msra.gmra.mrb[16].mxu1 %v10145_v28 }
 0x41f   :  { %7395 = vmatpush1.bf16.msra.mxu1 %v9312_v3  ;;  %v9390_v3 = vld [vmem:[#allocation11 + $0xd60] ss:$28 sps:$4 sm:$0xff]  }
 0x420   :  { %7396 = vmatprep.subr.bf16.mxu1 %v9320_v5  ;;  %v9395_v5 = vld [vmem:[#allocation11 + $0x19c] ss:$28 sps:$4 sm:$0xff]  }
 0x423   :  { %7397 = vmatpush1.bf16.msra.mxu1 %v9318_v55  ;;  %v9398_v55 = vld [vmem:[#allocation11 + $0xd9c] ss:$28 sps:$4 sm:$0xff]  }
 0x424   :  { %7398 = vmatprep.subr.bf16.mxu1 %v9326_v22  ;;  %v9393_v22 = vld [vmem:[#allocation11 + $0x198] ss:$28 sps:$4 sm:$0xff]  }
 0x427   :  { %7399 = vmatpush1.bf16.msra.mxu1 %v9324_v6  ;;  %v9396_v6 = vld [vmem:[#allocation11 + $0xd98] ss:$28 sps:$4 sm:$0xff]  }
 0x428   :  { %7400 = vmatprep.subr.bf16.mxu1 %v9332_v8  ;;  %v9401_v8 = vld [vmem:[#allocation11 + $0x1d4] ss:$28 sps:$4 sm:$0xff]  }
 0x42b   :  { %7401 = vmatpush1.bf16.msra.mxu1 %v9330_v9  ;;  %v9404_v9 = vld [vmem:[#allocation11 + $0xdd4] ss:$28 sps:$4 sm:$0xff]  }
 0x42c   :  { %7402 = vmatprep.subr.bf16.mxu1 %v9338_v10  ;;  %v9399_v10 = vld [vmem:[#allocation11 + $0x1d0] ss:$28 sps:$4 sm:$0xff]  }
 0x42f   :  { %7403 = vmatpush1.bf16.msra.mxu1 %v9336_v11  ;;  %v9402_v11 = vld [vmem:[#allocation11 + $0xdd0] ss:$28 sps:$4 sm:$0xff]  }
 0x430   :  { %7404 = vmatprep.subr.bf16.mxu1 %v9344_v13  ;;  %v9407_v13 = vld [vmem:[#allocation11 + $0x20c] ss:$28 sps:$4 sm:$0xff]  }
 0x431   :  { %v4231_v18 = vpop.f32.mrb[12].mxu1 }
 0x432   :  { %v8893_v26 = vadd.f32 %v4231_v18, %v1009_v48  ;;  %v4233_v27 = vpop.f32.mrb[13].mxu1  ;;  %v9408_v48 = vld [vmem:[#allocation11 + $0x1d8] ss:$28 sps:$4 sm:$0xff]   ;;  %v9413_v18 = vld [vmem:[#allocation11 + $0x210] ss:$28 sps:$4 sm:$0xff]  }
 0x433   :  { %v8894_v47 = vadd.f32 %v4233_v27, %v1013_v53  ;;  %v4235_v30 = vpop.f32.mrb[14].mxu1  ;;  %7405 = vmatpush1.bf16.msra.mxu1 %v9342_v14  ;;  %v9405_v53 = vld [vmem:[#allocation11 + $0x208] ss:$28 sps:$4 sm:$0xff]   ;;  %v9409_v14 = vld [vmem:[#allocation11 + $0x18] ss:$28 sps:$4 sm:$0xff]  }
 0x434   :  { %v4244_v52 = vmax.f32 %v8893_v26, 0.0  ;;  %v4236_v33 = vpop.f32.mrb[15].mxu1  ;;  %7406 = vmatprep.subr.bf16.mxu1 %v9350_v15  ;;  %v9412_v15 = vld [vmem:[#allocation11 + $0x244] ss:$28 sps:$4 sm:$0xff]   ;;  %v9414_v27 = vld [vmem:[#allocation11 + $0x50] ss:$28 sps:$4 sm:$0xff]  }
 0x435   :  { %v4245_v35 = vmax.f32 %v8894_v47, 0.0  ;;  %v9410_v26 = vld [vmem:[#allocation11 + $0x240] ss:$28 sps:$4 sm:$0xff]   ;;  %v9418_v30 = vld [vmem:[#allocation11 + $0x248] ss:$28 sps:$4 sm:$0xff]  }
 0x436   :  { %v10159_v7 = vpack.c.bf16 %v4244_v52, %v4244_v52  ;;  %v9417_v47 = vld [vmem:[#allocation11 + $0x27c] ss:$28 sps:$4 sm:$0xff]   ;;  %v9419_v52 = vld [vmem:[#allocation11 + $0x88] ss:$28 sps:$4 sm:$0xff]   ;;  %v9422_v33 = vld [vmem:[#allocation11 + $0x2b4] ss:$28 sps:$4 sm:$0xff]  }
 0x437   :  { %v10157_v36 = vpack.c.bf16 %v4245_v35, %v4245_v35  ;;  %7407 = vmatpush1.bf16.msra.mxu1 %v9348_v31  ;;  %v9415_v31 = vld [vmem:[#allocation11 + $0x278] ss:$28 sps:$4 sm:$0xff]   ;;  %v9420_v35 = vld [vmem:[#allocation11 + $0x2b0] ss:$28 sps:$4 sm:$0xff]  }
 0x438   :  { %7408 = vmatprep.subr.bf16.mxu1 %v9356_v17  ;;  %v9423_v17 = vld [vmem:[#allocation11 + $0x280] ss:$28 sps:$4 sm:$0xff]  }
 0x439   :  { %7262 = vmatprep.mubr.bf16.mxu0 %v10157_v36  ;;  %7426 = vmatprep.mubr.bf16.mxu1 %v10157_v36 }
 0x43a   :  { %7263 = vmatmul.mubr.bf16.vlgmr.msra.gmra.mrb[12].mxu0 %v10159_v7 }
 0x43b   :  { %7436 = vmatpush1.bf16.msra.mxu0 %v9351_v19  ;;  %7409 = vmatpush1.bf16.msra.mxu1 %v9354_v62  ;;  %v9424_v19 = vld [vmem:[#allocation11 + $0xc0] ss:$28 sps:$4 sm:$0xff]   ;;  %v9427_v62 = vld [vmem:[#allocation11 + $0x2ec] ss:$28 sps:$4 sm:$0xff]  }
 0x43c   :  { %7467 = vmatprep.mubr.bf16.mxu0 %v10109_v42  ;;  %7437 = vmatprep.subr.bf16.mxu0 %v9359_v51  ;;  %v9425_v51 = vld [vmem:[#allocation11 + $0x2e8] ss:$28 sps:$4 sm:$0xff]  }
 0x43d   :  { %7410 = vmatprep.subr.bf16.mxu1 %v9362_v39  ;;  %v9429_v39 = vld [vmem:[#allocation11 + $0xf8] ss:$28 sps:$4 sm:$0xff]  }
 0x43f   :  { %7438 = vmatpush1.bf16.msra.mxu0 %v9357_v41  ;;  %7411 = vmatpush1.bf16.msra.mxu1 %v9360_v12  ;;  %v9432_v41 = vld [vmem:[#allocation11 + $0x324] ss:$28 sps:$4 sm:$0xff]   ;;  %v9433_v12 = vld [vmem:[#allocation11 + $0x2f0] ss:$28 sps:$4 sm:$0xff]  }
 0x440   :  { %7439 = vmatprep.subr.bf16.mxu0 %v9365_v57  ;;  %7412 = vmatprep.subr.bf16.mxu1 %v9368_v43  ;;  %v9430_v57 = vld [vmem:[#allocation11 + $0x320] ss:$28 sps:$4 sm:$0xff]   ;;  %v9434_v43 = vld [vmem:[#allocation11 + $0x130] ss:$28 sps:$4 sm:$0xff]  }
 0x443   :  { %7440 = vmatpush1.bf16.msra.mxu0 %v9363_v61  ;;  %7413 = vmatpush1.bf16.msra.mxu1 %v9366_v45  ;;  %v9437_v61 = vld [vmem:[#allocation11 + $0x35c] ss:$28 sps:$4 sm:$0xff]   ;;  %v9438_v45 = vld [vmem:[#allocation11 + $0x328] ss:$28 sps:$4 sm:$0xff]  }
 0x444   :  { %7441 = vmatprep.subr.bf16.mxu0 %v9371_v50  ;;  %7414 = vmatprep.subr.bf16.mxu1 %v9374_v54  ;;  %v9435_v50 = vld [vmem:[#allocation11 + $0x358] ss:$28 sps:$4 sm:$0xff]   ;;  %v9439_v54 = vld [vmem:[#allocation11 + $0x168] ss:$28 sps:$4 sm:$0xff]  }
 0x447   :  { %7442 = vmatpush1.bf16.msra.mxu0 %v9369_v56  ;;  %7415 = vmatpush1.bf16.msra.mxu1 %v9372_v16  ;;  %v9442_v56 = vld [vmem:[#allocation11 + $0x394] ss:$28 sps:$4 sm:$0xff]   ;;  %v9443_v16 = vld [vmem:[#allocation11 + $0x360] ss:$28 sps:$4 sm:$0xff]  }
 0x448   :  { %7443 = vmatprep.subr.bf16.mxu0 %v9377_v49  ;;  %7416 = vmatprep.subr.bf16.mxu1 %v9380_v34  ;;  %v9440_v49 = vld [vmem:[#allocation11 + $0x390] ss:$28 sps:$4 sm:$0xff]   ;;  %v9444_v34 = vld [vmem:[#allocation11 + $0x1a0] ss:$28 sps:$4 sm:$0xff]  }
 0x44b   :  { %7444 = vmatpush1.bf16.msra.mxu0 %v9375_v58  ;;  %7417 = vmatpush1.bf16.msra.mxu1 %v9378_v59  ;;  %v9447_v58 = vld [vmem:[#allocation11 + $0x3cc] ss:$28 sps:$4 sm:$0xff]   ;;  %v9448_v59 = vld [vmem:[#allocation11 + $0x558] ss:$28 sps:$4 sm:$0xff]  }
 0x44c   :  { %7445 = vmatprep.subr.bf16.mxu0 %v9383_v60  ;;  %7418 = vmatprep.subr.bf16.mxu1 %v9386_v44  ;;  %v9445_v60 = vld [vmem:[#allocation11 + $0x3c8] ss:$28 sps:$4 sm:$0xff]   ;;  %v9449_v44 = vld [vmem:[#allocation11 + $0x398] ss:$28 sps:$4 sm:$0xff]  }
 0x44f   :  { %7446 = vmatpush1.bf16.msra.mxu0 %v9381_v63  ;;  %7419 = vmatpush1.bf16.msra.mxu1 %v9384_v1  ;;  %v9452_v63 = vld [vmem:[#allocation11 + $0x404] ss:$28 sps:$4 sm:$0xff]   ;;  %v9453_v1 = vld [vmem:[#allocation11 + $0x590] ss:$28 sps:$4 sm:$0xff]  }
 0x450   :  { %7447 = vmatprep.subr.bf16.mxu0 %v9389_v4  ;;  %7420 = vmatprep.subr.bf16.mxu1 %v9392_v0  ;;  %v9450_v4 = vld [vmem:[#allocation11 + $0x400] ss:$28 sps:$4 sm:$0xff]   ;;  %v9454_v0 = vld [vmem:[#allocation11 + $0x3d0] ss:$28 sps:$4 sm:$0xff]  }
 0x453   :  { %7448 = vmatpush1.bf16.msra.mxu0 %v9387_v2  ;;  %7421 = vmatpush1.bf16.msra.mxu1 %v9390_v3  ;;  %v9457_v2 = vld [vmem:[#allocation11 + $0x43c] ss:$28 sps:$4 sm:$0xff]   ;;  %v9458_v3 = vld [vmem:[#allocation11 + $0x5c8] ss:$28 sps:$4 sm:$0xff]  }
 0x454   :  { %7449 = vmatprep.subr.bf16.mxu0 %v9395_v5  ;;  %7422 = vmatprep.subr.bf16.mxu1 %v9398_v55  ;;  %v9455_v5 = vld [vmem:[#allocation11 + $0x438] ss:$28 sps:$4 sm:$0xff]   ;;  %v9459_v55 = vld [vmem:[#allocation11 + $0x408] ss:$28 sps:$4 sm:$0xff]  }
 0x457   :  { %7450 = vmatpush1.bf16.msra.mxu0 %v9393_v22  ;;  %7423 = vmatpush1.bf16.msra.mxu1 %v9396_v6  ;;  %v9462_v22 = vld [vmem:[#allocation11 + $0x474] ss:$28 sps:$4 sm:$0xff]   ;;  %v9463_v6 = vld [vmem:[#allocation11 + $0x600] ss:$28 sps:$4 sm:$0xff]  }
 0x458   :  { %7451 = vmatprep.subr.bf16.mxu0 %v9401_v8  ;;  %7424 = vmatprep.subr.bf16.mxu1 %v9404_v9  ;;  %v9460_v8 = vld [vmem:[#allocation11 + $0x470] ss:$28 sps:$4 sm:$0xff]  }
 0x459   :  { %v9467_v9 = vld [vmem:[#allocation11 + $0x4ac] ss:$28 sps:$4 sm:$0xff]  }
 0x45b   :  { %7452 = vmatpush1.bf16.msra.mxu0 %v9399_v10  ;;  %7425 = vmatpush1.bf16.msra.mxu1 %v9402_v11  ;;  %v9465_v10 = vld [vmem:[#allocation11 + $0x4a8] ss:$28 sps:$4 sm:$0xff]   ;;  %v9469_v11 = vld [vmem:[#allocation11 + $0x478] ss:$28 sps:$4 sm:$0xff]  }
 0x45c   :  { %7453 = vmatprep.subr.bf16.mxu0 %v9407_v13  ;;  %8797 = vmatprep.subr.bf16.mxu1 %v9408_v48  ;;  %v9472_v13 = vld [vmem:[#allocation11 + $0x4e4] ss:$28 sps:$4 sm:$0xff]   ;;  %v9473_v48 = vld [vmem:[#allocation11 + $0x670] ss:$28 sps:$4 sm:$0xff]  }
 0x45e   :  { %7427 = vmatmul.mubr.bf16.vlgmr.msra.gmra.mrb[16].mxu1 %v10159_v7 }
 0x45f   :  { %7454 = vmatpush1.bf16.msra.mxu0 %v9405_v53  ;;  %8798 = vmatpush3.bf16.msra.mxu1 %v9409_v14  ;;  %v9470_v53 = vld [vmem:[#allocation11 + $0x4e0] ss:$28 sps:$4 sm:$0xff]   ;;  %v9474_v14 = vld [vmem:[#allocation11 + $0x4b0] ss:$28 sps:$4 sm:$0xff]  }
 0x460   :  { %7631 = vmatprep.mubr.bf16.mxu1 %v10109_v42  ;;  %7455 = vmatprep.subr.bf16.mxu0 %v9412_v15  ;;  %v9428_v42 = vld [vmem:[#allocation11 + $0x2b8] ss:$28 sps:$4 sm:$0xff]  }
 0x461   :  { %8799 = vmatprep.subr.bf16.mxu1 %v9413_v18  ;;  %v9477_v15 = vld [vmem:[#allocation11 + $0x51c] ss:$28 sps:$4 sm:$0xff]   ;;  %v9478_v18 = vld [vmem:[#allocation11 + $0x6a8] ss:$28 sps:$4 sm:$0xff]  }
 0x463   :  { %7456 = vmatpush1.bf16.msra.mxu0 %v9410_v26  ;;  %8800 = vmatpush3.bf16.msra.mxu1 %v9414_v27  ;;  %v9475_v26 = vld [vmem:[#allocation11 + $0x518] ss:$28 sps:$4 sm:$0xff]   ;;  %v9479_v27 = vld [vmem:[#allocation11 + $0x4e8] ss:$28 sps:$4 sm:$0xff]  }
 0x464   :  { %7457 = vmatprep.subr.bf16.mxu0 %v9417_v47  ;;  %8801 = vmatprep.subr.bf16.mxu1 %v9418_v30  ;;  %v9482_v47 = vld [vmem:[#allocation11 + $0x554] ss:$28 sps:$4 sm:$0xff]   ;;  %v9483_v30 = vld [vmem:[#allocation11 + $0x6e0] ss:$28 sps:$4 sm:$0xff]  }
 0x467   :  { %7458 = vmatpush1.bf16.msra.mxu0 %v9415_v31  ;;  %8802 = vmatpush3.bf16.msra.mxu1 %v9419_v52  ;;  %v9480_v31 = vld [vmem:[#allocation11 + $0x550] ss:$28 sps:$4 sm:$0xff]   ;;  %v9484_v52 = vld [vmem:[#allocation11 + $0x520] ss:$28 sps:$4 sm:$0xff]  }
 0x468   :  { %7459 = vmatprep.subr.bf16.mxu0 %v9422_v33  ;;  %8803 = vmatprep.subr.bf16.mxu1 %v9423_v17  ;;  %v9487_v33 = vld [vmem:[#allocation11 + $0x58c] ss:$28 sps:$4 sm:$0xff]   ;;  %v9488_v17 = vld [vmem:[#allocation11 + $0x8d8] ss:$28 sps:$4 sm:$0xff]  }
 0x46b   :  { %7460 = vmatpush1.bf16.msra.mxu0 %v9420_v35  ;;  %8804 = vmatpush3.bf16.msra.mxu1 %v9424_v19  ;;  %v9485_v35 = vld [vmem:[#allocation11 + $0x588] ss:$28 sps:$4 sm:$0xff]   ;;  %v9489_v19 = vld [vmem:[#allocation11 + $0x718] ss:$28 sps:$4 sm:$0xff]  }
 0x46c   :  { %7461 = vmatprep.subr.bf16.mxu0 %v9427_v62  ;;  %8805 = vmatprep.subr.bf16.mxu1 %v9428_v42  ;;  %v9492_v62 = vld [vmem:[#allocation11 + $0x5c4] ss:$28 sps:$4 sm:$0xff]   ;;  %v9493_v42 = vld [vmem:[#allocation11 + $0x910] ss:$28 sps:$4 sm:$0xff]  }
 0x46f   :  { %7462 = vmatpush1.bf16.msra.mxu0 %v9425_v51  ;;  %8806 = vmatpush3.bf16.msra.mxu1 %v9429_v39  ;;  %v9490_v51 = vld [vmem:[#allocation11 + $0x5c0] ss:$28 sps:$4 sm:$0xff]   ;;  %v9494_v39 = vld [vmem:[#allocation11 + $0x750] ss:$28 sps:$4 sm:$0xff]  }
 0x470   :  { %7463 = vmatprep.subr.bf16.mxu0 %v9432_v41  ;;  %8807 = vmatprep.subr.bf16.mxu1 %v9433_v12  ;;  %v9497_v41 = vld [vmem:[#allocation11 + $0x5fc] ss:$28 sps:$4 sm:$0xff]   ;;  %v9498_v12 = vld [vmem:[#allocation11 + $0x948] ss:$28 sps:$4 sm:$0xff]  }
 0x473   :  { %7464 = vmatpush1.bf16.msra.mxu0 %v9430_v57  ;;  %8808 = vmatpush3.bf16.msra.mxu1 %v9434_v43  ;;  %v9495_v57 = vld [vmem:[#allocation11 + $0x5f8] ss:$28 sps:$4 sm:$0xff]   ;;  %v9499_v43 = vld [vmem:[#allocation11 + $0x788] ss:$28 sps:$4 sm:$0xff]  }
 0x474   :  { %7465 = vmatprep.subr.bf16.mxu0 %v9437_v61  ;;  %8809 = vmatprep.subr.bf16.mxu1 %v9438_v45  ;;  %v9502_v61 = vld [vmem:[#allocation11 + $0x634] ss:$28 sps:$4 sm:$0xff]   ;;  %v9503_v45 = vld [vmem:[#allocation11 + $0x980] ss:$28 sps:$4 sm:$0xff]  }
 0x477   :  { %7466 = vmatpush1.bf16.msra.mxu0 %v9435_v50  ;;  %8810 = vmatpush3.bf16.msra.mxu1 %v9439_v54  ;;  %v9500_v50 = vld [vmem:[#allocation11 + $0x630] ss:$28 sps:$4 sm:$0xff]   ;;  %v9504_v54 = vld [vmem:[#allocation11 + $0x7c0] ss:$28 sps:$4 sm:$0xff]  }
 0x478   :  { %7476 = vmatprep.subr.bf16.mxu0 %v9442_v56  ;;  %8811 = vmatprep.subr.bf16.mxu1 %v9443_v16  ;;  %v9507_v56 = vld [vmem:[#allocation11 + $0x66c] ss:$28 sps:$4 sm:$0xff]   ;;  %v9508_v16 = vld [vmem:[#allocation11 + $0x9b8] ss:$28 sps:$4 sm:$0xff]  }
 0x47a   :  { %7468 = vmatmul.mubr.bf16.vlgmr.msra.gmra.mrb[16].mxu0 %v10115_v37 }
 0x47b   :  { %7477 = vmatpush1.bf16.msra.mxu0 %v9440_v49  ;;  %7508 = vmatprep.mubr.bf16.mxu0 %v10124_v32  ;;  %v9505_v49 = vld [vmem:[#allocation11 + $0x668] ss:$28 sps:$4 sm:$0xff]  }
 0x47c   :  { %8812 = vmatpush3.bf16.msra.mxu1 %v9444_v34  ;;  %7478 = vmatprep.subr.bf16.mxu0 %v9447_v58  ;;  %v9509_v34 = vld [vmem:[#allocation11 + $0x7f8] ss:$28 sps:$4 sm:$0xff]   ;;  %v9512_v58 = vld [vmem:[#allocation11 + $0x6a4] ss:$28 sps:$4 sm:$0xff]  }
 0x47d   :  { %8819 = vmatprep.subr.bf16.mxu1 %v9448_v59  ;;  %v9513_v59 = vld [vmem:[#allocation11 + $0x9f0] ss:$28 sps:$4 sm:$0xff]  }
 0x47f   :  { %7479 = vmatpush1.bf16.msra.mxu0 %v9445_v60  ;;  %7632 = vmatmul.mubr.bf16.vlgmr.msra.gmra.mrb[20].mxu1 %v10115_v37  ;;  %v9464_v37 = vld [vmem:[#allocation11 + $0x440] ss:$28 sps:$4 sm:$0xff]  }
 0x480   :  { %8820 = vmatpush3.bf16.msra.mxu1 %v9449_v44  ;;  %7671 = vmatprep.mubr.bf16.mxu1 %v10124_v32  ;;  %v9468_v32 = vld [vmem:[#allocation11 + $0x638] ss:$28 sps:$4 sm:$0xff]   ;;  %v9510_v60 = vld [vmem:[#allocation11 + $0x6a0] ss:$28 sps:$4 sm:$0xff]   ;;  %v9514_v44 = vld [vmem:[#allocation11 + $0x830] ss:$28 sps:$4 sm:$0xff]  }
 0x481   :  { %7480 = vmatprep.subr.bf16.mxu0 %v9452_v63  ;;  %8821 = vmatprep.subr.bf16.mxu1 %v9453_v1  ;;  %v9517_v63 = vld [vmem:[#allocation11 + $0x6dc] ss:$28 sps:$4 sm:$0xff]   ;;  %v9518_v1 = vld [vmem:[#allocation11 + $0xa28] ss:$28 sps:$4 sm:$0xff]  }
 0x483   :  { %7481 = vmatpush1.bf16.msra.mxu0 %v9450_v4  ;;  %v9515_v4 = vld [vmem:[#allocation11 + $0x6d8] ss:$28 sps:$4 sm:$0xff]  }
 0x484   :  { %8822 = vmatpush3.bf16.msra.mxu1 %v9454_v0  ;;  %7482 = vmatprep.subr.bf16.mxu0 %v9457_v2  ;;  %v9519_v0 = vld [vmem:[#allocation11 + $0x868] ss:$28 sps:$4 sm:$0xff]   ;;  %v9522_v2 = vld [vmem:[#allocation11 + $0x714] ss:$28 sps:$4 sm:$0xff]  }
 0x485   :  { %8823 = vmatprep.subr.bf16.mxu1 %v9458_v3  ;;  %v9523_v3 = vld [vmem:[#allocation11 + $0xa60] ss:$28 sps:$4 sm:$0xff]  }
 0x487   :  { %7483 = vmatpush1.bf16.msra.mxu0 %v9455_v5  ;;  %v9520_v5 = vld [vmem:[#allocation11 + $0x710] ss:$28 sps:$4 sm:$0xff]  }
 0x488   :  { %8824 = vmatpush3.bf16.msra.mxu1 %v9459_v55  ;;  %7484 = vmatprep.subr.bf16.mxu0 %v9462_v22  ;;  %v9524_v55 = vld [vmem:[#allocation11 + $0x8a0] ss:$28 sps:$4 sm:$0xff]   ;;  %v9527_v22 = vld [vmem:[#allocation11 + $0x74c] ss:$28 sps:$4 sm:$0xff]  }
 0x489   :  { %8825 = vmatprep.subr.bf16.mxu1 %v9463_v6  ;;  %v9528_v6 = vld [vmem:[#allocation11 + $0xc58] ss:$28 sps:$4 sm:$0xff]  }
 0x48b   :  { %7485 = vmatpush1.bf16.msra.mxu0 %v9460_v8  ;;  %v9525_v8 = vld [vmem:[#allocation11 + $0x748] ss:$28 sps:$4 sm:$0xff]  }
 0x48c   :  { %8826 = vmatpush3.bf16.msra.mxu1 %v9464_v37  ;;  %7486 = vmatprep.subr.bf16.mxu0 %v9467_v9  ;;  %v9529_v37 = vld [vmem:[#allocation11 + $0xa98] ss:$28 sps:$4 sm:$0xff]   ;;  %v9532_v9 = vld [vmem:[#allocation11 + $0x784] ss:$28 sps:$4 sm:$0xff]  }
 0x48d   :  { %8827 = vmatprep.subr.bf16.mxu1 %v9468_v32  ;;  %v9533_v32 = vld [vmem:[#allocation11 + $0xc90] ss:$28 sps:$4 sm:$0xff]  }
 0x48f   :  { %7487 = vmatpush1.bf16.msra.mxu0 %v9465_v10  ;;  %v9530_v10 = vld [vmem:[#allocation11 + $0x780] ss:$28 sps:$4 sm:$0xff]  }
 0x490   :  { %8828 = vmatpush3.bf16.msra.mxu1 %v9469_v11  ;;  %7488 = vmatprep.subr.bf16.mxu0 %v9472_v13  ;;  %v9534_v11 = vld [vmem:[#allocation11 + $0xad0] ss:$28 sps:$4 sm:$0xff]   ;;  %v9537_v13 = vld [vmem:[#allocation11 + $0x7bc] ss:$28 sps:$4 sm:$0xff]  }
 0x491   :  { %8829 = vmatprep.subr.bf16.mxu1 %v9473_v48  ;;  %v9539_v48 = vld [vmem:[#allocation11 + $0xb08] ss:$28 sps:$4 sm:$0xff]  }
 0x493   :  { %7489 = vmatpush1.bf16.msra.mxu0 %v9470_v53  ;;  %v9542_v53 = vld [vmem:[#allocation11 + $0x7f4] ss:$28 sps:$4 sm:$0xff]  }
 0x494   :  { %8830 = vmatpush3.bf16.msra.mxu1 %v9474_v14  ;;  %7490 = vmatprep.subr.bf16.mxu0 %v9477_v15  ;;  %v9543_v14 = vld [vmem:[#allocation11 + $0xd00] ss:$28 sps:$4 sm:$0xff]   ;;  %v9540_v15 = vld [vmem:[#allocation11 + $0x7f0] ss:$28 sps:$4 sm:$0xff]  }
 0x495   :  { %8831 = vmatprep.subr.bf16.mxu1 %v9478_v18  ;;  %v9544_v18 = vld [vmem:[#allocation11 + $0xb40] ss:$28 sps:$4 sm:$0xff]  }
 0x497   :  { %7491 = vmatpush1.bf16.msra.mxu0 %v9475_v26  ;;  %v9547_v26 = vld [vmem:[#allocation11 + $0x82c] ss:$28 sps:$4 sm:$0xff]  }
 0x498   :  { %8832 = vmatpush3.bf16.msra.mxu1 %v9479_v27  ;;  %7492 = vmatprep.subr.bf16.mxu0 %v9482_v47  ;;  %v9548_v27 = vld [vmem:[#allocation11 + $0xd38] ss:$28 sps:$4 sm:$0xff]   ;;  %v9545_v47 = vld [vmem:[#allocation11 + $0x828] ss:$28 sps:$4 sm:$0xff]  }
 0x499   :  { %8833 = vmatprep.subr.bf16.mxu1 %v9483_v30  ;;  %v9549_v30 = vld [vmem:[#allocation11 + $0xb78] ss:$28 sps:$4 sm:$0xff]  }
 0x49b   :  { %7493 = vmatpush1.bf16.msra.mxu0 %v9480_v31  ;;  %v9552_v31 = vld [vmem:[#allocation11 + $0x864] ss:$28 sps:$4 sm:$0xff]  }
 0x49c   :  { %8834 = vmatpush3.bf16.msra.mxu1 %v9484_v52  ;;  %7494 = vmatprep.subr.bf16.mxu0 %v9487_v33  ;;  %v9553_v52 = vld [vmem:[#allocation11 + $0xd70] ss:$28 sps:$4 sm:$0xff]   ;;  %v9550_v33 = vld [vmem:[#allocation11 + $0x860] ss:$28 sps:$4 sm:$0xff]  }
 0x49d   :  { %8841 = vmatprep.subr.bf16.mxu1 %v9488_v17  ;;  %v9554_v17 = vld [vmem:[#allocation11 + $0xbb0] ss:$28 sps:$4 sm:$0xff]  }
 0x49f   :  { %7495 = vmatpush1.bf16.msra.mxu0 %v9485_v35  ;;  %7672 = vmatmul.mubr.bf16.vlgmr.msra.gmra.mrb[24].mxu1 %v10130_v40  ;;  %v9557_v35 = vld [vmem:[#allocation11 + $0x89c] ss:$28 sps:$4 sm:$0xff]  }
 0x4a0   :  { %8842 = vmatpush3.bf16.msra.mxu1 %v9489_v19  ;;  %7711 = vmatprep.mubr.bf16.mxu1 %v10143_v25  ;;  %v9558_v19 = vld [vmem:[#allocation11 + $0xda8] ss:$28 sps:$4 sm:$0xff]  }
 0x4a1   :  { %7496 = vmatprep.subr.bf16.mxu0 %v9492_v62  ;;  %8843 = vmatprep.subr.bf16.mxu1 %v9493_v42  ;;  %v9555_v62 = vld [vmem:[#allocation11 + $0x898] ss:$28 sps:$4 sm:$0xff]   ;;  %v9559_v42 = vld [vmem:[#allocation11 + $0xbe8] ss:$28 sps:$4 sm:$0xff]  }
 0x4a3   :  { %7497 = vmatpush1.bf16.msra.mxu0 %v9490_v51  ;;  %v9562_v51 = vld [vmem:[#allocation11 + $0x8d4] ss:$28 sps:$4 sm:$0xff]  }
 0x4a4   :  { %8844 = vmatpush3.bf16.msra.mxu1 %v9494_v39  ;;  %7498 = vmatprep.subr.bf16.mxu0 %v9497_v41  ;;  %v9563_v39 = vld [vmem:[#allocation11 + $0xde0] ss:$28 sps:$4 sm:$0xff]   ;;  %v9560_v41 = vld [vmem:[#allocation11 + $0x8d0] ss:$28 sps:$4 sm:$0xff]  }
 0x4a5   :  { %8845 = vmatprep.subr.bf16.mxu1 %v9498_v12  ;;  %v9564_v12 = vld [vmem:[#allocation11 + $0xc20] ss:$28 sps:$4 sm:$0xff]  }
 0x4a7   :  { %7499 = vmatpush1.bf16.msra.mxu0 %v9495_v57  ;;  %v9567_v57 = vld [vmem:[#allocation11 + $0x90c] ss:$28 sps:$4 sm:$0xff]  }
 0x4a8   :  { %8846 = vmatpush3.bf16.msra.mxu1 %v9499_v43  ;;  %7500 = vmatprep.subr.bf16.mxu0 %v9502_v61  ;;  %v9565_v43 = vld [vmem:[#allocation11 + $0x908] ss:$28 sps:$4 sm:$0xff]  }
 0x4a9   :  { %8847 = vmatprep.subr.bf16.mxu1 %v9503_v45  ;;  %v9570_v61 = vld [vmem:[#allocation11 + $0x944] ss:$28 sps:$4 sm:$0xff]  }
 0x4aa   :  { %v9568_v45 = vld [vmem:[#allocation11 + $0x940] ss:$28 sps:$4 sm:$0xff]  }
 0x4ab   :  { %7501 = vmatpush1.bf16.msra.mxu0 %v9500_v50  ;;  %v9573_v50 = vld [vmem:[#allocation11 + $0x97c] ss:$28 sps:$4 sm:$0xff]  }
 0x4ac   :  { %8848 = vmatpush3.bf16.msra.mxu1 %v9504_v54  ;;  %7502 = vmatprep.subr.bf16.mxu0 %v9507_v56  ;;  %v9571_v54 = vld [vmem:[#allocation11 + $0x978] ss:$28 sps:$4 sm:$0xff]  }
 0x4ad   :  { %8849 = vmatprep.subr.bf16.mxu1 %v9508_v16  ;;  %v9576_v56 = vld [vmem:[#allocation11 + $0x9b4] ss:$28 sps:$4 sm:$0xff]  }
 0x4ae   :  { %v9574_v16 = vld [vmem:[#allocation11 + $0x9b0] ss:$28 sps:$4 sm:$0xff]  }
 0x4af   :  { %7503 = vmatpush1.bf16.msra.mxu0 %v9505_v49  ;;  %v9579_v49 = vld [vmem:[#allocation11 + $0x9ec] ss:$28 sps:$4 sm:$0xff]  }
 0x4b0   :  { %8850 = vmatpush3.bf16.msra.mxu1 %v9509_v34  ;;  %7504 = vmatprep.subr.bf16.mxu0 %v9512_v58  ;;  %v9577_v34 = vld [vmem:[#allocation11 + $0x9e8] ss:$28 sps:$4 sm:$0xff]  }
 0x4b1   :  { %8851 = vmatprep.subr.bf16.mxu1 %v9513_v59  ;;  %v9582_v58 = vld [vmem:[#allocation11 + $0xa24] ss:$28 sps:$4 sm:$0xff]  }
 0x4b2   :  { %v9580_v59 = vld [vmem:[#allocation11 + $0xa20] ss:$28 sps:$4 sm:$0xff]  }
 0x4b3   :  { %7505 = vmatpush1.bf16.msra.mxu0 %v9510_v60  ;;  %v9585_v60 = vld [vmem:[#allocation11 + $0xa5c] ss:$28 sps:$4 sm:$0xff]  }
 0x4b4   :  { %8852 = vmatpush3.bf16.msra.mxu1 %v9514_v44  ;;  %7506 = vmatprep.subr.bf16.mxu0 %v9517_v63  ;;  %v9583_v44 = vld [vmem:[#allocation11 + $0xa58] ss:$28 sps:$4 sm:$0xff]  }
 0x4b5   :  { %8853 = vmatprep.subr.bf16.mxu1 %v9518_v1  ;;  %v9588_v63 = vld [vmem:[#allocation11 + $0xa94] ss:$28 sps:$4 sm:$0xff]  }
 0x4b6   :  { %v9586_v1 = vld [vmem:[#allocation11 + $0xa90] ss:$28 sps:$4 sm:$0xff]  }
 0x4b7   :  { %7507 = vmatpush1.bf16.msra.mxu0 %v9515_v4  ;;  %v9591_v4 = vld [vmem:[#allocation11 + $0xacc] ss:$28 sps:$4 sm:$0xff]  }
 0x4b8   :  { %8854 = vmatpush3.bf16.msra.mxu1 %v9519_v0  ;;  %7517 = vmatprep.subr.bf16.mxu0 %v9522_v2  ;;  %v9589_v0 = vld [vmem:[#allocation11 + $0xac8] ss:$28 sps:$4 sm:$0xff]  }
 0x4b9   :  { %8855 = vmatprep.subr.bf16.mxu1 %v9523_v3  ;;  %v9594_v2 = vld [vmem:[#allocation11 + $0xb04] ss:$28 sps:$4 sm:$0xff]  }
 0x4ba   :  { %7509 = vmatmul.mubr.bf16.vlgmr.msra.gmra.mrb[16].mxu0 %v10130_v40  ;;  %v9538_v40 = vld [vmem:[#allocation11 + $0xcc8] ss:$28 sps:$4 sm:$0xff]   ;;  %v9592_v3 = vld [vmem:[#allocation11 + $0xb00] ss:$28 sps:$4 sm:$0xff]  }
 0x4bb   :  { %7518 = vmatpush1.bf16.msra.mxu0 %v9520_v5  ;;  %7549 = vmatprep.mubr.bf16.mxu0 %v10143_v25  ;;  %v9535_v25 = vld [vmem:[#allocation11 + $0x7b8] ss:$28 sps:$4 sm:$0xff]  }
 0x4bc   :  { %8856 = vmatpush3.bf16.msra.mxu1 %v9524_v55  ;;  %7519 = vmatprep.subr.bf16.mxu0 %v9527_v22  ;;  %v9597_v5 = vld [vmem:[#allocation11 + $0xb3c] ss:$28 sps:$4 sm:$0xff]   ;;  %v9600_v22 = vld [vmem:[#allocation11 + $0xb74] ss:$28 sps:$4 sm:$0xff]  }
 0x4bd   :  { %8863 = vmatprep.subr.bf16.mxu1 %v9528_v6  ;;  %v9595_v55 = vld [vmem:[#allocation11 + $0xb38] ss:$28 sps:$4 sm:$0xff]   ;;  %v9598_v6 = vld [vmem:[#allocation11 + $0xb70] ss:$28 sps:$4 sm:$0xff]  }
 0x4bf   :  { %7520 = vmatpush1.bf16.msra.mxu0 %v9525_v8  ;;  %7712 = vmatmul.mubr.bf16.vlgmr.msra.gmra.mrb[28].mxu1 %v10145_v28  ;;  %v10180_v8 = vld [vmem:[#allocation13] sm:$0xff] }
 0x4c0   :  { %8864 = vmatpush3.bf16.msra.mxu1 %v9529_v37  ;;  %7751 = vmatprep.mubr.bf16.mxu1 %v10157_v36  ;;  %v9601_v37 = vld [vmem:[#allocation11 + $0xba8] ss:$28 sps:$4 sm:$0xff]  }
 0x4c1   :  { %7521 = vmatprep.subr.bf16.mxu0 %v9532_v9  ;;  %8865 = vmatprep.subr.bf16.mxu1 %v9533_v32  ;;  %v4775_v9 = vrot.slane %v10180_v8, %v10008_v23  ;;  %v9606_v32 = vld [vmem:[#allocation11 + $0xbe4] ss:$28 sps:$4 sm:$0xff]   ;;  %v9612_v23 = vld [vmem:[#allocation11 + $0xc54] ss:$28 sps:$4 sm:$0xff]  }
 0x4c3   :  { %7522 = vmatpush1.bf16.msra.mxu0 %v9530_v10 }
 0x4c4   :  { %8866 = vmatpush3.bf16.msra.mxu1 %v9534_v11  ;;  %7523 = vmatprep.subr.bf16.mxu0 %v9537_v13 }
 0x4c5   :  { %8867 = vmatprep.subr.bf16.mxu1 %v9538_v40 }
 0x4c7   :  { %7524 = vmatpush1.bf16.msra.mxu0 %v9535_v25 }
 0x4c8   :  { %8868 = vmatpush3.bf16.msra.mxu1 %v9539_v48  ;;  %7525 = vmatprep.subr.bf16.mxu0 %v9542_v53  ;;  %v9604_v48 = vld [vmem:[#allocation11 + $0xbe0] ss:$28 sps:$4 sm:$0xff]  }
 0x4c9   :  { %8869 = vmatprep.subr.bf16.mxu1 %v9543_v14 }
 0x4cb   :  { %7526 = vmatpush1.bf16.msra.mxu0 %v9540_v15  ;;  %v9609_v15 = vld [vmem:[#allocation11 + $0xc1c] ss:$28 sps:$4 sm:$0xff]  }
 0x4cc   :  { %8870 = vmatpush3.bf16.msra.mxu1 %v9544_v18  ;;  %7527 = vmatprep.subr.bf16.mxu0 %v9547_v26  ;;  %v9610_v26 = vld [vmem:[#allocation11 + $0xc50] ss:$28 sps:$4 sm:$0xff]  }
 0x4cd   :  { %8871 = vmatprep.subr.bf16.mxu1 %v9548_v27  ;;  %v9615_v27 = vld [vmem:[#allocation11 + $0xc8c] ss:$28 sps:$4 sm:$0xff]  }
 0x4cf   :  { %7528 = vmatpush1.bf16.msra.mxu0 %v9545_v47  ;;  %v9613_v47 = vld [vmem:[#allocation11 + $0xc88] ss:$28 sps:$4 sm:$0xff]  }
 0x4d0   :  { %8872 = vmatpush3.bf16.msra.mxu1 %v9549_v30  ;;  %7529 = vmatprep.subr.bf16.mxu0 %v9552_v31  ;;  %v9618_v31 = vld [vmem:[#allocation11 + $0xcc4] ss:$28 sps:$4 sm:$0xff]  }
 0x4d1   :  { %8873 = vmatprep.subr.bf16.mxu1 %v9553_v52 }
 0x4d3   :  { %7530 = vmatpush1.bf16.msra.mxu0 %v9550_v33 }
 0x4d4   :  { %8874 = vmatpush3.bf16.msra.mxu1 %v9554_v17  ;;  %7531 = vmatprep.subr.bf16.mxu0 %v9557_v35  ;;  %v9616_v35 = vld [vmem:[#allocation11 + $0xcc0] ss:$28 sps:$4 sm:$0xff]  }
 0x4d5   :  { %8875 = vmatprep.subr.bf16.mxu1 %v9558_v19  ;;  %v9621_v19 = vld [vmem:[#allocation11 + $0xcfc] ss:$28 sps:$4 sm:$0xff]  }
 0x4d7   :  { %7532 = vmatpush1.bf16.msra.mxu0 %v9555_v62  ;;  %v9619_v62 = vld [vmem:[#allocation11 + $0xcf8] ss:$28 sps:$4 sm:$0xff]  }
 0x4d8   :  { %8876 = vmatpush3.bf16.msra.mxu1 %v9559_v42  ;;  %7533 = vmatprep.subr.bf16.mxu0 %v9562_v51  ;;  %v9624_v42 = vld [vmem:[#allocation11 + $0xd34] ss:$28 sps:$4 sm:$0xff]  }
 0x4d9   :  { %8877 = vmatprep.subr.bf16.mxu1 %v9563_v39  ;;  %v9622_v51 = vld [vmem:[#allocation11 + $0xd30] ss:$28 sps:$4 sm:$0xff]  }
 0x4da   :  { %v9627_v39 = vld [vmem:[#allocation11 + $0xd6c] ss:$28 sps:$4 sm:$0xff]  }
 0x4db   :  { %7534 = vmatpush1.bf16.msra.mxu0 %v9560_v41 }
 0x4dc   :  { %8878 = vmatpush3.bf16.msra.mxu1 %v9564_v12  ;;  %7535 = vmatprep.subr.bf16.mxu0 %v9567_v57  ;;  %v9625_v57 = vld [vmem:[#allocation11 + $0xd68] ss:$28 sps:$4 sm:$0xff]  }
 0x4df   :  { %7536 = vmatpush1.bf16.msra.mxu0 %v9565_v43  ;;  %7752 = vmatmul.mubr.bf16.vlgmr.msra.gmra.mrb[32].mxu1 %v10159_v7  ;;  %v9630_v43 = vld [vmem:[#allocation11 + $0xda4] ss:$28 sps:$4 sm:$0xff]  }
 0x4e0   :  { %7537 = vmatprep.subr.bf16.mxu0 %v9570_v61  ;;  %v4779_v61 = vrot.slane %v10180_v8, %v10003_v21 }
 0x4e3   :  { %7538 = vmatpush1.bf16.msra.mxu0 %v9568_v45  ;;  %v9628_v45 = vld [vmem:[#allocation11 + $0xda0] ss:$28 sps:$4 sm:$0xff]  }
 0x4e4   :  { %7539 = vmatprep.subr.bf16.mxu0 %v9573_v50  ;;  %v4783_v50 = vrot.slane %v10180_v8, %v10011_v24 }
 0x4e7   :  { %7540 = vmatpush1.bf16.msra.mxu0 %v9571_v54  ;;  %v9633_v54 = vld [vmem:[#allocation11 + $0xddc] ss:$28 sps:$4 sm:$0xff]  }
 0x4e8   :  { %7541 = vmatprep.subr.bf16.mxu0 %v9576_v56 }
 0x4eb   :  { %7542 = vmatpush1.bf16.msra.mxu0 %v9574_v16 }
 0x4ec   :  { %7543 = vmatprep.subr.bf16.mxu0 %v9579_v49 }
 0x4ef   :  { %7544 = vmatpush1.bf16.msra.mxu0 %v9577_v34 }
 0x4f0   :  { %7545 = vmatprep.subr.bf16.mxu0 %v9582_v58 }
 0x4f3   :  { %7546 = vmatpush1.bf16.msra.mxu0 %v9580_v59  ;;  %v9631_v59 = vld [vmem:[#allocation11 + $0xdd8] ss:$28 sps:$4 sm:$0xff]  }
 0x4f4   :  { %7547 = vmatprep.subr.bf16.mxu0 %v9585_v60 }
 0x4f7   :  { %7548 = vmatpush1.bf16.msra.mxu0 %v9583_v44 }
 0x4f8   :  { %7558 = vmatprep.subr.bf16.mxu0 %v9588_v63 }
 0x4fa   :  { %7550 = vmatmul.mubr.bf16.vlgmr.msra.gmra.mrb[16].mxu0 %v10145_v28  ;;  %v9603_v28 = vld [vmem:[#allocation11 + $0xbac] ss:$28 sps:$4 sm:$0xff]  }
 0x4fb   :  { %7559 = vmatpush1.bf16.msra.mxu0 %v9586_v1  ;;  %7590 = vmatprep.mubr.bf16.mxu0 %v10157_v36  ;;  %v4771_v36 = vrot.slane %v10180_v8, %v10000_v20  ;;  %v9607_v20 = vld [vmem:[#allocation11 + $0xc18] ss:$28 sps:$4 sm:$0xff]  }
 0x4fc   :  { %7560 = vmatprep.subr.bf16.mxu0 %v9591_v4 }
 0x4ff   :  { %7561 = vmatpush1.bf16.msra.mxu0 %v9589_v0 }
 0x500   :  { %7562 = vmatprep.subr.bf16.mxu0 %v9594_v2 }
 0x503   :  { %7563 = vmatpush1.bf16.msra.mxu0 %v9592_v3 }
 0x504   :  { %7564 = vmatprep.subr.bf16.mxu0 %v9597_v5 }
 0x507   :  { %7565 = vmatpush1.bf16.msra.mxu0 %v9595_v55 }
 0x508   :  { %7566 = vmatprep.subr.bf16.mxu0 %v9600_v22 }
 0x50b   :  { %7567 = vmatpush1.bf16.msra.mxu0 %v9598_v6 }
 0x50c   :  { %7568 = vmatprep.subr.bf16.mxu0 %v9603_v28  ;;  %v4795_v28 = vrot.slane %v10180_v8, %v10068_v38 }
 0x50d   :  { %v7264_v10 = vpop.f32.mrb[12].mxu0 }
 0x50e   :  { %v8895_v11 = vadd.f32 %v7264_v10, %v4771_v36  ;;  %v7266_v13 = vpop.f32.mrb[13].mxu0 }
 0x50f   :  { %v8896_v40 = vadd.f32 %v7266_v13, %v4775_v9  ;;  %7569 = vmatpush1.bf16.msra.mxu0 %v9601_v37  ;;  %v7268_v25 = vpop.f32.mrb[14].mxu0 }
 0x510   :  { %v8790_v53 = vmul.f32 -1.442695, %v8895_v11  ;;  %v7269_v14 = vpop.f32.mrb[15].mxu0  ;;  %7570 = vmatprep.subr.bf16.mxu0 %v9606_v32 }
 0x511   :  { %v8791_v18 = vmul.f32 -1.442695, %v8896_v40 }
 0x512   :  { %9634 = vpow2.f32 %v8790_v53 }
 0x513   :  { %9636 = vpow2.f32 %v8791_v18  ;;  %7571 = vmatpush1.bf16.msra.mxu0 %v9604_v48 }
 0x514   :  { %7572 = vmatprep.subr.bf16.mxu0 %v9609_v15 }
 0x517   :  { %7573 = vmatpush1.bf16.msra.mxu0 %v9607_v20 }
 0x518   :  { %7574 = vmatprep.subr.bf16.mxu0 %v9612_v23 }
 0x51b   :  { %7575 = vmatpush1.bf16.msra.mxu0 %v9610_v26 }
 0x51c   :  { %v9635_v30 = vpop.eup %9634  ;;  %7576 = vmatprep.subr.bf16.mxu0 %v9615_v27 }
 0x51d   :  { %v9637_v52 = vpop.eup %9636  ;;  %v7780_v33 = vadd.f32 1.0, %v9635_v30 }
 0x51e   :  { %v7781_v17 = vadd.f32 1.0, %v9637_v52  ;;  %v4787_v52 = vrot.slane %v10180_v8, %v10049_v46 }
 0x51f   :  { %9638 = vrcp.f32 %v7780_v33  ;;  %7577 = vmatpush1.bf16.msra.mxu0 %v9613_v47  ;;  %v4791_v33 = vrot.slane %v10180_v8, %v10022_v29 }
 0x520   :  { %9640 = vrcp.f32 %v7781_v17  ;;  %7578 = vmatprep.subr.bf16.mxu0 %v9618_v31 }
 0x523   :  { %7579 = vmatpush1.bf16.msra.mxu0 %v9616_v35 }
 0x524   :  { %7580 = vmatprep.subr.bf16.mxu0 %v9621_v19 }
 0x527   :  { %7581 = vmatpush1.bf16.msra.mxu0 %v9619_v62 }
 0x528   :  { %7582 = vmatprep.subr.bf16.mxu0 %v9624_v42 }
 0x529   :  { %v9639_v41 = vpop.eup %9638 }
 0x52a   :  { %v9641_v12 = vpop.eup %9640  ;;  %7801 = vst [vmem:[#allocation14] sm:$0xff] %v9639_v41 }
 0x52b   :  { %7802 = vst [vmem:[#allocation14 + $0x8] sm:$0xff] %v9641_v12  ;;  %7583 = vmatpush1.bf16.msra.mxu0 %v9622_v51 }
 0x52c   :  { %7584 = vmatprep.subr.bf16.mxu0 %v9627_v39 }
 0x52f   :  { %7585 = vmatpush1.bf16.msra.mxu0 %v9625_v57 }
 0x530   :  { %7586 = vmatprep.subr.bf16.mxu0 %v9630_v43 }
 0x531   :  { %v7428_v56 = vpop.f32.mrb[16].mxu1 }
 0x532   :  { %v8897_v16 = vadd.f32 %v7428_v56, %v4779_v61  ;;  %v7430_v49 = vpop.f32.mrb[17].mxu1 }
 0x533   :  { %v8898_v34 = vadd.f32 %v7430_v49, %v4783_v50  ;;  %7587 = vmatpush1.bf16.msra.mxu0 %v9628_v45  ;;  %v7432_v58 = vpop.f32.mrb[18].mxu1 }
 0x534   :  { %v8792_v60 = vmul.f32 -1.442695, %v8897_v16  ;;  %v7433_v44 = vpop.f32.mrb[19].mxu1  ;;  %7588 = vmatprep.subr.bf16.mxu0 %v9633_v54 }
 0x535   :  { %v8793_v63 = vmul.f32 -1.442695, %v8898_v34 }
 0x536   :  { %9642 = vpow2.f32 %v8792_v60 }
 0x537   :  { %9644 = vpow2.f32 %v8793_v63  ;;  %7589 = vmatpush1.bf16.msra.mxu0 %v9631_v59 }
 0x53a   :  { %7591 = vmatmul.mubr.bf16.vlgmr.msra.gmra.mrb[16].mxu0 %v10159_v7 }
 0x540   :  { %v9643_v21 = vpop.eup %9642 }
 0x541   :  { %v9645_v24 = vpop.eup %9644  ;;  %v7782_v1 = vadd.f32 1.0, %v9643_v21 }
 0x542   :  { %v7783_v4 = vadd.f32 1.0, %v9645_v24 }
 0x543   :  { %9646 = vrcp.f32 %v7782_v1 }
 0x544   :  { %9648 = vrcp.f32 %v7783_v4 }
 0x54d   :  { %v9647_v0 = vpop.eup %9646 }
 0x54e   :  { %v9649_v2 = vpop.eup %9648  ;;  %7803 = vst [vmem:[#allocation14 + $0x10] sm:$0xff] %v9647_v0 }
 0x54f   :  { %7804 = vst [vmem:[#allocation14 + $0x18] sm:$0xff] %v9649_v2 }
 0x552   :  { %v8813_v3 = vpop.f32.mrb[20].mxu1 }
 0x553   :  { %v8814_v5 = vpop.f32.mrb[21].mxu1 }
 0x554   :  { %v8815_v55 = vadd.f32 %v8814_v5, %v8813_v3  ;;  %v8816_v22 = vpop.f32.mrb[22].mxu1 }
 0x555   :  { %v8817_v6 = vpop.f32.mrb[23].mxu1 }
 0x556   :  { %v7634_v37 = vadd.f32 %v8815_v55, %v4795_v28 }
 0x572   :  { %v8835_v36 = vpop.f32.mrb[24].mxu1 }
 0x573   :  { %v8836_v7 = vpop.f32.mrb[25].mxu1 }
 0x574   :  { %v8837_v9 = vadd.f32 %v8836_v7, %v8835_v36  ;;  %v8838_v32 = vpop.f32.mrb[26].mxu1 }
 0x575   :  { %v8839_v10 = vpop.f32.mrb[27].mxu1 }
 0x576   :  { %v7674_v11 = vadd.f32 %v8837_v9, %v7634_v37 }
 0x592   :  { %v8857_v13 = vpop.f32.mrb[28].mxu1 }
 0x593   :  { %v8858_v40 = vpop.f32.mrb[29].mxu1 }
 0x594   :  { %v8859_v25 = vadd.f32 %v8858_v40, %v8857_v13  ;;  %v8860_v48 = vpop.f32.mrb[30].mxu1 }
 0x595   :  { %v8861_v53 = vpop.f32.mrb[31].mxu1 }
 0x596   :  { %v7714_v14 = vadd.f32 %v8859_v25, %v7674_v11 }
 0x5b2   :  { %v8879_v15 = vpop.f32.mrb[32].mxu1 }
 0x5b3   :  { %v8880_v18 = vpop.f32.mrb[33].mxu1 }
 0x5b4   :  { %v8881_v20 = vadd.f32 %v8880_v18, %v8879_v15  ;;  %v8882_v23 = vpop.f32.mrb[34].mxu1 }
 0x5b5   :  { %v8883_v26 = vpop.f32.mrb[35].mxu1 }
 0x5b6   :  { %v7754_v27 = vadd.f32 %v8881_v20, %v7714_v14 }
 0x5b8   :  { %v8796_v38 = vmul.f32 -1.442695, %v7754_v27 }
 0x5ba   :  { %9650 = vpow2.f32 %v8796_v38 }
 0x5c4   :  { %v9651_v47 = vpop.eup %9650 }
 0x5c5   :  { %v7786_v30 = vadd.f32 1.0, %v9651_v47 }
 0x5c7   :  { %9652 = vrcp.f32 %v7786_v30 }
 0x5d1   :  { %v9653_v31 = vpop.eup %9652 }
 0x5d2   :  { %7807 = vst [vmem:[#allocation14 + $0x30] sm:$0xff] %v9653_v31 }
 0x60d   :  { %v7592_v17 = vpop.f32.mrb[16].mxu0 }
 0x60e   :  { %v8899_v35 = vadd.f32 %v7592_v17, %v4787_v52  ;;  %v7594_v19 = vpop.f32.mrb[17].mxu0 }
 0x60f   :  { %v8900_v62 = vadd.f32 %v7594_v19, %v4791_v33  ;;  %v7596_v42 = vpop.f32.mrb[18].mxu0 }
 0x610   :  { %v8794_v51 = vmul.f32 -1.442695, %v8899_v35  ;;  %v7597_v39 = vpop.f32.mrb[19].mxu0 }
 0x611   :  { %v8795_v41 = vmul.f32 -1.442695, %v8900_v62 }
 0x612   :  { %9654 = vpow2.f32 %v8794_v51 }
 0x613   :  { %9656 = vpow2.f32 %v8795_v41 }
 0x61c   :  { %v9655_v12 = vpop.eup %9654 }
 0x61d   :  { %v9657_v57 = vpop.eup %9656  ;;  %v7784_v43 = vadd.f32 1.0, %v9655_v12 }
 0x61e   :  { %v7785_v61 = vadd.f32 1.0, %v9657_v57 }
 0x61f   :  { %9658 = vrcp.f32 %v7784_v43 }
 0x620   :  { %9660 = vrcp.f32 %v7785_v61 }
 0x629   :  { %v9659_v46 = vpop.eup %9658 }
 0x62a   :  { %v9661_v29 = vpop.eup %9660  ;;  %7805 = vst [vmem:[#allocation14 + $0x20] sm:$0xff] %v9659_v46 }
 0x62b   :  { %7806 = vst [vmem:[#allocation14 + $0x28] sm:$0xff] %v9661_v29 }
 0x62c   :  { %9828 = shalt.err (!%p9825_p4)
}
 0x62d   :  { %s9829_s27 = scalar_lea.hbm %s10216_s7, 896 }
 0x62e   :  { %p9830_p5 = scmp.ne.s32.totalorder %s10216_s7, %s9829_s27  ;;  %p9833_p6 = scmp.lt.u32.totalorder %s9829_s27, %s10216_s7 }
 0x630   :  { %p9835_p7 = pnand %p9833_p6, %p9830_p5 }
 0x632   :  { %9838 = shalt.err (!%p9835_p7)
}
 0x633   :  { %7817 = dma.vmem_to_hbm [thread:$0]  %s7815_s12, 896, %s10216_s7, [#allocation4]  }
 0x634   :  { %9847 = dma.done.wait [#allocation4], 896  }
 0x635   :  { %9848 = vsyncadd [#allocation4], 4294966400 }
 0x636   :  { %7821 = vsyncpa [#allocation3], 1 }
 0x637   :  { %7822 = vsyncpa [#allocation6], 1 }
 0x638   :  { %7823 = vsyncpa [#allocation9], 1 }
 0x639   :  { %7824 = vsyncpa [#allocation12], 1 }
 0x63a   :  { %7825 = vsyncpa [#allocation4], 1 }

</bundles_post_ra>
